<compile_context>
chip_gen: v7x
topology: tpu7x:2x2x1
jax: 0.10.0
libtpu: 0.0.40
codegen_flags: <defaults>
</compile_context>

<pallas_src>
import functools

import jax
import jax.numpy as jnp
from jax.experimental import pallas as pl
from jax.experimental.pallas import tpu as pltpu


_TILE_ROWS_CAP = 4096   # widest kernel (gated msg) ~ a few MiB/buffer at this tile

_CPARAMS = pltpu.CompilerParams(
    dimension_semantics=("parallel",),      # shard row tiles across v7x's 2 TCs
    vmem_limit_bytes=32 * 1024 * 1024,
)


def _round_up(n, m):
    return ((n + m - 1) // m) * m


def _row_tile(n):
    # >= 2 grid steps whenever possible (so "parallel" engages both v7x TensorCores),
    # rows a multiple of 8 (sublane), capped at 4096.
    t = _round_up(max((n + 1) // 2, 1), 8)
    return max(8, min(_TILE_ROWS_CAP, t))


def _row_spec(tile, d):
    return pl.BlockSpec((tile, d), lambda i: (i, 0))


def _full_spec(shape):
    return pl.BlockSpec(shape, lambda i: (0, 0))


# ----------------------------- kernel bodies ------------------------------

def _make_multilinear_kernel(part_dims, relu):
    """y = sum_i(x_i @ W[rows_i]) + b  (== Linear(concat(x_i)) without the concat)."""
    n_parts = len(part_dims)

    def kernel(*refs):
        part_refs = refs[:n_parts]
        w_ref, b_ref, o_ref = refs[n_parts:n_parts + 3]
        w = w_ref[...]
        acc = None
        off = 0
        for p_ref, d in zip(part_refs, part_dims):
            x = p_ref[...].astype(jnp.bfloat16)
            y = jnp.dot(x, w[off:off + d, :], preferred_element_type=jnp.float32)
            acc = y if acc is None else acc + y
            off += d
        acc = acc + b_ref[...]
        if relu:
            acc = jnp.maximum(acc, 0.0)
        o_ref[...] = acc.astype(o_ref.dtype)

    return kernel


def _make_gated_kernel(part_dims):
    """Gated edge-message MLP with fused concat and a VPU (non-MXU) gate column."""
    n_parts = len(part_dims)

    def kernel(*refs):
        part_refs = refs[:n_parts]
        (w1_ref, b1_ref, w2f_ref, b2f_ref, w2k_ref, b2k_ref,
         o_ref) = refs[n_parts:n_parts + 7]
        w1 = w1_ref[...]
        acc = None
        off = 0
        for p_ref, d in zip(part_refs, part_dims):
            x = p_ref[...].astype(jnp.bfloat16)
            y = jnp.dot(x, w1[off:off + d, :], preferred_element_type=jnp.float32)
            acc = y if acc is None else acc + y
            off += d
        hmid = jnp.maximum(acc + b1_ref[...], 0.0)                 # (T, 2h) f32
        f = (jnp.dot(hmid.astype(jnp.bfloat16), w2f_ref[...],
                     preferred_element_type=jnp.float32) + b2f_ref[...])   # (T, 4h)
        # gate: 1-wide column computed on VPU mul + XLU lane reduce (no 1-col matmul)
        kz = jnp.sum(hmid * w2k_ref[...], axis=-1, keepdims=True) + b2k_ref[...]
        gate = jax.nn.sigmoid(kz)                                  # EUP, f32
        o_ref[...] = f * gate                                      # f32 -> segment ops

    return kernel


def _reduce_term(x_bf, sums, mx, mn, deg, w_r, b_r, h, mean_last):
    """Linear(cat([x, a_sum1, a_max, a_min, a_sum2_or_mean])) without the concat."""
    has_in = deg > 0.0
    a1 = sums[:, :h]
    a4 = sums[:, h:]
    a2 = jnp.where(has_in, mx, 0.0)     # mask +-inf for zero-in-degree nodes
    a3 = jnp.where(has_in, mn, 0.0)
    if mean_last:
        a4 = a4 / jnp.maximum(deg, 1.0)
    r = jnp.dot(x_bf, w_r[0:h, :], preferred_element_type=jnp.float32)
    r = r + jnp.dot(a1.astype(jnp.bfloat16), w_r[h:2 * h, :],
                    preferred_element_type=jnp.float32)
    r = r + jnp.dot(a2.astype(jnp.bfloat16), w_r[2 * h:3 * h, :],
                    preferred_element_type=jnp.float32)
    r = r + jnp.dot(a3.astype(jnp.bfloat16), w_r[3 * h:4 * h, :],
                    preferred_element_type=jnp.float32)
    r = r + jnp.dot(a4.astype(jnp.bfloat16), w_r[4 * h:5 * h, :],
                    preferred_element_type=jnp.float32)
    return r + b_r


def _make_reduce_mlp_kernel(h, mean_last):
    """reduce-Linear fused with the downstream MLP(cat([x, new]), h, h) (embedding)."""
    def kernel(x_ref, s_ref, mx_ref, mn_ref, dg_ref,
               wr_ref, br_ref, w1_ref, b1_ref, w2_ref, b2_ref, o_ref):
        x_bf = x_ref[...].astype(jnp.bfloat16)
        r = _reduce_term(x_bf, s_ref[...], mx_ref[...], mn_ref[...], dg_ref[...],
                         wr_ref[...], br_ref[...], h, mean_last)
        w1 = w1_ref[...]
        h1 = (jnp.dot(x_bf, w1[0:h, :], preferred_element_type=jnp.float32)
              + jnp.dot(r.astype(jnp.bfloat16), w1[h:2 * h, :],
                        preferred_element_type=jnp.float32)
              + b1_ref[...])
        h1 = jnp.maximum(h1, 0.0)
        out = (jnp.dot(h1.astype(jnp.bfloat16), w2_ref[...],
                       preferred_element_type=jnp.float32) + b2_ref[...])
        o_ref[...] = out.astype(o_ref.dtype)

    return kernel


def _make_dual_reduce_linear_kernel(h, mean1, mean2):
    """Two reduce-Linears (shared dst features) + add + final Linear, fused."""
    def kernel(x_ref, s1_ref, mx1_ref, mn1_ref, dg1_ref,
               s2_ref, mx2_ref, mn2_ref, dg2_ref,
               wr1_ref, br1_ref, wr2_ref, br2_ref, wf_ref, bf_ref, o_ref):
        x_bf = x_ref[...].astype(jnp.bfloat16)
        r1 = _reduce_term(x_bf, s1_ref[...], mx1_ref[...], mn1_ref[...], dg1_ref[...],
                          wr1_ref[...], br1_ref[...], h, mean1)
        r2 = _reduce_term(x_bf, s2_ref[...], mx2_ref[...], mn2_ref[...], dg2_ref[...],
                          wr2_ref[...], br2_ref[...], h, mean2)
        out = (jnp.dot((r1 + r2).astype(jnp.bfloat16), wf_ref[...],
                       preferred_element_type=jnp.float32) + bf_ref[...])
        o_ref[...] = out.astype(o_ref.dtype)

    return kernel


def _head3_kernel(x_ref, w1_ref, b1_ref, w2_ref, b2_ref, w3_ref, b3_ref, o_ref):
    # mlp_congestion (Linear->ReLU->Linear) fused with lin_congestion
    x = x_ref[...].astype(jnp.bfloat16)
    h1 = jnp.maximum(jnp.dot(x, w1_ref[...], preferred_element_type=jnp.float32)
                     + b1_ref[...], 0.0)
    h2 = (jnp.dot(h1.astype(jnp.bfloat16), w2_ref[...],
                  preferred_element_type=jnp.float32) + b2_ref[...])
    o_ref[...] = (jnp.dot(h2.astype(jnp.bfloat16), w3_ref[...],
                          preferred_element_type=jnp.float32) + b3_ref[...])


# ----------------------------- pallas wrappers ------------------------------

def pallas_multilinear(parts, p, relu=False, out_dtype=jnp.bfloat16):
    n = parts[0].shape[0]
    part_dims = tuple(int(x.shape[1]) for x in parts)
    d_in = sum(part_dims)
    d_out = p["w"].shape[1]
    tile = _row_tile(n)
    in_specs = ([_row_spec(tile, d) for d in part_dims]
                + [_full_spec((d_in, d_out)), _full_spec((1, d_out))])
    flops = 2 * n * d_in * d_out
    bytes_accessed = int(sum(x.size * x.dtype.itemsize for x in parts)
                         + d_in * d_out * 2
                         + n * d_out * jnp.dtype(out_dtype).itemsize)
    return pl.pallas_call(
        _make_multilinear_kernel(part_dims, relu),
        out_shape=jax.ShapeDtypeStruct((n, d_out), out_dtype),
        grid=(pl.cdiv(n, tile),),
        in_specs=in_specs,
        out_specs=_row_spec(tile, d_out),
        compiler_params=_CPARAMS,
        cost_estimate=pl.CostEstimate(flops=int(flops), transcendentals=0,
                                      bytes_accessed=bytes_accessed),
    )(*parts, p["w"], p["b"])


def pallas_gated_msg(parts, p, n_hid):
    e = parts[0].shape[0]
    part_dims = tuple(int(x.shape[1]) for x in parts)
    d_in = sum(part_dims)
    d_hid = p["w1"].shape[1]
    d_out = 4 * n_hid
    tile = _row_tile(e)
    in_specs = ([_row_spec(tile, d) for d in part_dims]
                + [_full_spec((d_in, d_hid)), _full_spec((1, d_hid)),
                   _full_spec((d_hid, d_out)), _full_spec((1, d_out)),
                   _full_spec((1, d_hid)), _full_spec((1, 1))])
    flops = 2 * e * d_in * d_hid + 2 * e * d_hid * d_out + 2 * e * d_hid
    bytes_accessed = int(sum(x.size * x.dtype.itemsize for x in parts)
                         + (d_in * d_hid + d_hid * d_out) * 2
                         + e * d_out * 4)
    return pl.pallas_call(
        _make_gated_kernel(part_dims),
        out_shape=jax.ShapeDtypeStruct((e, d_out), jnp.float32),
        grid=(pl.cdiv(e, tile),),
        in_specs=in_specs,
        out_specs=_row_spec(tile, d_out),
        compiler_params=_CPARAMS,
        cost_estimate=pl.CostEstimate(flops=int(flops), transcendentals=int(e),
                                      bytes_accessed=bytes_accessed),
    )(*parts, p["w1"], p["b1"], p["w2f"], p["b2f"], p["w2k"], p["b2k"])


def pallas_reduce_mlp(x, sums, mx, mn, deg, p_r, p_mlp, h, mean_last):
    n = x.shape[0]
    tile = _row_tile(n)
    in_specs = [
        _row_spec(tile, h), _row_spec(tile, 2 * h), _row_spec(tile, h),
        _row_spec(tile, h), _row_spec(tile, 1),
        _full_spec((5 * h, h)), _full_spec((1, h)),
        _full_spec((2 * h, h)), _full_spec((1, h)),
        _full_spec((h, h)), _full_spec((1, h)),
    ]
    flops = 2 * n * (5 * h * h + 2 * h * h + h * h)
    bytes_accessed = int(n * (2 * h + (2 * h + h + h + 1) * 4) + 8 * h * h * 2 + n * h * 2)
    return pl.pallas_call(
        _make_reduce_mlp_kernel(h, mean_last),
        out_shape=jax.ShapeDtypeStruct((n, h), jnp.bfloat16),
        grid=(pl.cdiv(n, tile),),
        in_specs=in_specs,
        out_specs=_row_spec(tile, h),
        compiler_params=_CPARAMS,
        cost_estimate=pl.CostEstimate(flops=int(flops), transcendentals=0,
                                      bytes_accessed=bytes_accessed),
    )(x, sums, mx, mn, deg, p_r["w"], p_r["b"],
      p_mlp["l1"]["w"], p_mlp["l1"]["b"], p_mlp["l2"]["w"], p_mlp["l2"]["b"])


def pallas_dual_reduce_linear(x, agg1, agg2, p_r1, p_r2, p_lin, h, mean1, mean2):
    s1, mx1, mn1, dg1 = agg1
    s2, mx2, mn2, dg2 = agg2
    n = x.shape[0]
    tile = _row_tile(n)
    in_specs = [
        _row_spec(tile, h),
        _row_spec(tile, 2 * h), _row_spec(tile, h), _row_spec(tile, h), _row_spec(tile, 1),
        _row_spec(tile, 2 * h), _row_spec(tile, h), _row_spec(tile, h), _row_spec(tile, 1),
        _full_spec((5 * h, h)), _full_spec((1, h)),
        _full_spec((5 * h, h)), _full_spec((1, h)),
        _full_spec((h, h)), _full_spec((1, h)),
    ]
    flops = 2 * n * (2 * 5 * h * h + h * h)
    bytes_accessed = int(n * (2 * h + 2 * (2 * h + h + h + 1) * 4)
                         + (10 * h * h + h * h) * 2 + n * h * 2)
    return pl.pallas_call(
        _make_dual_reduce_linear_kernel(h, mean1, mean2),
        out_shape=jax.ShapeDtypeStruct((n, h), jnp.bfloat16),
        grid=(pl.cdiv(n, tile),),
        in_specs=in_specs,
        out_specs=_row_spec(tile, h),
        compiler_params=_CPARAMS,
        cost_estimate=pl.CostEstimate(flops=int(flops), transcendentals=0,
                                      bytes_accessed=bytes_accessed),
    )(x, s1, mx1, mn1, dg1, s2, mx2, mn2, dg2,
      p_r1["w"], p_r1["b"], p_r2["w"], p_r2["b"], p_lin["w"], p_lin["b"])


def pallas_congestion_head(x, p_mlp, p_lin):
    n, d_in = x.shape
    d_h1 = p_mlp["l1"]["w"].shape[1]
    d_h2 = p_mlp["l2"]["w"].shape[1]
    d_out = p_lin["w"].shape[1]
    tile = _row_tile(n)
    flops = 2 * n * (d_in * d_h1 + d_h1 * d_h2 + d_h2 * d_out)
    bytes_accessed = int(n * d_in * x.dtype.itemsize + n * d_out * 4
                         + (d_in * d_h1 + d_h1 * d_h2 + d_h2 * d_out) * 2)
    return pl.pallas_call(
        _head3_kernel,
        out_shape=jax.ShapeDtypeStruct((n, d_out), jnp.float32),
        grid=(pl.cdiv(n, tile),),
        in_specs=[_row_spec(tile, d_in),
                  _full_spec((d_in, d_h1)), _full_spec((1, d_h1)),
                  _full_spec((d_h1, d_h2)), _full_spec((1, d_h2)),
                  _full_spec((d_h2, d_out)), _full_spec((1, d_out))],
        out_specs=_row_spec(tile, d_out),
        compiler_params=_CPARAMS,
        cost_estimate=pl.CostEstimate(flops=int(flops), transcendentals=0,
                                      bytes_accessed=bytes_accessed),
    )(x, p_mlp["l1"]["w"], p_mlp["l1"]["b"],
      p_mlp["l2"]["w"], p_mlp["l2"]["b"], p_lin["w"], p_lin["b"])


# ------------------------ graph glue (XLA gathers / segment ops) -----------------------

def segment_aggregate(gated, dst, n_dst, h):
    # gated columns: [f_sum_a | f_sum_b | f_max | f_min]; edges are dst-sorted.
    # TODO(synk): fuse these reductions into the gated-message kernel (CSR prefetch).
    sums = jax.ops.segment_sum(gated[:, :2 * h], dst, num_segments=n_dst,
                               indices_are_sorted=True)
    mx = jax.ops.segment_max(gated[:, 2 * h:3 * h], dst, num_segments=n_dst,
                             indices_are_sorted=True)
    mn = jax.ops.segment_min(gated[:, 3 * h:], dst, num_segments=n_dst,
                             indices_are_sorted=True)
    return sums, mx, mn


# ------------------------------- sub-modules --------------------------------

def embedding_forward(P, G, nf_gc, nf_gs, h):
    x_gc = pallas_multilinear([nf_gc], P["lin_gc"])
    x_gs = pallas_multilinear([nf_gs], P["lin_gs"])

    e = G["e_s2c"]                                   # gs -> gc
    g1 = pallas_gated_msg([x_gs[e["src"]], x_gc[e["dst"]]], P["mlp_msg_Gs2c"], h)
    s1, mx1, mn1 = segment_aggregate(g1, e["dst"], G["n_gc"], h)
    out_fc = pallas_reduce_mlp(x_gc, s1, mx1, mn1, e["deg"],
                               P["mlp_reduce_Gs2c"], P["mlp_gc"], h, mean_last=False)

    e = G["e_c2s"]                                   # gc -> gs
    g2 = pallas_gated_msg([x_gc[e["src"]], x_gs[e["dst"]]], P["mlp_msg_Gc2s"], h)
    s2, mx2, mn2 = segment_aggregate(g2, e["dst"], G["n_gs"], h)
    out_fs = pallas_reduce_mlp(x_gs, s2, mx2, mn2, e["deg"],
                               P["mlp_reduce_Gc2s"], P["mlp_gs"], h, mean_last=False)
    return out_fc, out_fs


def gsegmentdown_forward(P, G, nf_gc0, nf_gc1, nf_gs, h):
    # x_gc == [nf_gc0 | nf_gc1] (never materialized); x_gs == nf_gs
    e1 = G["e_ss1"]                                  # gs -> gs
    g1 = pallas_gated_msg([nf_gs[e1["src"]], nf_gs[e1["dst"]]], P["mlp_msg_Gss"], h)
    s1, mx1, mn1 = segment_aggregate(g1, e1["dst"], G["n_gs"], h)

    e2 = G["e_c2s"]                                  # gc -> gs
    g2 = pallas_gated_msg([nf_gc0[e2["src"]], nf_gc1[e2["src"]], nf_gs[e2["dst"]]],
                          P["mlp_msg_Gc2s"], h)
    s2, mx2, mn2 = segment_aggregate(g2, e2["dst"], G["n_gs"], h)

    out_fc = pallas_multilinear([nf_gc0, nf_gc1], P["lin_gc"])
    out_fs = pallas_dual_reduce_linear(
        nf_gs, (s1, mx1, mn1, e1["deg"]), (s2, mx2, mn2, e2["deg"]),
        P["mlp_reduce_Gss"], P["mlp_reduce_Gc2s"], P["lin_gs"], h,
        mean1=True, mean2=True)
    return out_fc, out_fs


def gcellup_forward(P, G, nf_gc, nf_gs0, nf_gs1, h):
    # x_gc == nf_gc; x_gs == [nf_gs0 | nf_gs1] (never materialized)
    e1 = G["e_cc"]                                   # gc -> gc
    g1 = pallas_gated_msg([nf_gc[e1["src"]], nf_gc[e1["dst"]]], P["mlp_msg_Gcc"], h)
    s1, mx1, mn1 = segment_aggregate(g1, e1["dst"], G["n_gc"], h)

    e2 = G["e_s2c"]                                  # gs -> gc
    g2 = pallas_gated_msg([nf_gs0[e2["src"]], nf_gs1[e2["src"]], nf_gc[e2["dst"]]],
                          P["mlp_msg_Gs2c"], h)
    s2, mx2, mn2 = segment_aggregate(g2, e2["dst"], G["n_gc"], h)

    out_fc = pallas_dual_reduce_linear(
        nf_gc, (s1, mx1, mn1, e1["deg"]), (s2, mx2, mn2, e2["deg"]),
        P["mlp_reduce_Gcc"], P["mlp_reduce_Gs2c"], P["lin_gc"], h,
        mean1=True, mean2=True)
    out_fs = pallas_multilinear([nf_gs0, nf_gs1], P["lin_gs"])
    return out_fc, out_fs


def mymodel_forward(P, G, nf_gc, nf_gs, h):
    fgc0 = pallas_multilinear([nf_gc], P["aux_fgc0"])
    fgc1, fgs1 = embedding_forward(P["em"], G, nf_gc, nf_gs, h)
    fgc2, fgs2 = gsegmentdown_forward(P["gsdm1"], G, fgc1, fgc0, fgs1, h)
    fgc3, fgs3 = gsegmentdown_forward(P["gsdm2"], G, fgc2, fgc1, fgs2, h)
    fgc4, fgs4 = gsegmentdown_forward(P["gsdm3"], G, fgc3, fgc2, fgs3, h)
    fgc5, fgs5 = gcellup_forward(P["gcum1"], G, fgc4, fgs4, fgs3, h)
    fgc6, fgs6 = gcellup_forward(P["gcum2"], G, fgc5, fgs5, fgs2, h)
    fgc7, _ = gcellup_forward(P["gcum3"], G, fgc6, fgs6, fgs1, h)
    return pallas_congestion_head(fgc7, P["mlp_congestion"], P["lin_congestion"])


# ------------------------------ parameter init -------------------------------

def init_linear(key, d_in, d_out):
    kw, kb = jax.random.split(key)
    s = 1.0 / (d_in ** 0.5)
    return {
        "w": jax.random.uniform(kw, (d_in, d_out), jnp.float32, -s, s).astype(jnp.bfloat16),
        "b": jax.random.uniform(kb, (1, d_out), jnp.float32, -s, s),
    }


def init_mlp2(key, d_in, d_hid, d_out):
    k1, k2 = jax.random.split(key)
    return {"l1": init_linear(k1, d_in, d_hid), "l2": init_linear(k2, d_hid, d_out)}


def init_gated(key, d_in, d_hid, n_hid):
    k1, k2, k3, k4, k5, k6 = jax.random.split(key, 6)
    s1 = 1.0 / (d_in ** 0.5)
    s2 = 1.0 / (d_hid ** 0.5)
    return {
        "w1": jax.random.uniform(k1, (d_in, d_hid), jnp.float32, -s1, s1).astype(jnp.bfloat16),
        "b1": jax.random.uniform(k2, (1, d_hid), jnp.float32, -s1, s1),
        "w2f": jax.random.uniform(k3, (d_hid, 4 * n_hid), jnp.float32, -s2, s2).astype(jnp.bfloat16),
        "b2f": jax.random.uniform(k4, (1, 4 * n_hid), jnp.float32, -s2, s2),
        "w2k": jax.random.uniform(k5, (1, d_hid), jnp.float32, -s2, s2),  # gate row (VPU path)
        "b2k": jax.random.uniform(k6, (1, 1), jnp.float32, -s2, s2),
    }


def init_embedding(key, n_gc, n_gs, h):
    ks = jax.random.split(key, 8)
    return {
        "lin_gc": init_linear(ks[0], n_gc, h),
        "lin_gs": init_linear(ks[1], n_gs, h),
        "mlp_msg_Gs2c": init_gated(ks[2], 2 * h, 2 * h, h),
        "mlp_reduce_Gs2c": init_linear(ks[3], 5 * h, h),
        "mlp_msg_Gc2s": init_gated(ks[4], 2 * h, 2 * h, h),
        "mlp_reduce_Gc2s": init_linear(ks[5], 5 * h, h),
        "mlp_gc": init_mlp2(ks[6], 2 * h, h, h),
        "mlp_gs": init_mlp2(ks[7], 2 * h, h, h),
    }


def init_gsd(key, h):
    ks = jax.random.split(key, 6)
    return {
        "mlp_msg_Gc2s": init_gated(ks[0], 3 * h, 2 * h, h),   # src gc=2h, dst gs=h
        "mlp_reduce_Gc2s": init_linear(ks[1], 5 * h, h),
        "mlp_msg_Gss": init_gated(ks[2], 2 * h, 2 * h, h),
        "mlp_reduce_Gss": init_linear(ks[3], 5 * h, h),
        "lin_gc": init_linear(ks[4], 2 * h, h),
        "lin_gs": init_linear(ks[5], h, h),
    }


def init_gcu(key, h):
    ks = jax.random.split(key, 6)
    return {
        "mlp_msg_Gs2c": init_gated(ks[0], 3 * h, 2 * h, h),   # src gs=2h, dst gc=h
        "mlp_reduce_Gs2c": init_linear(ks[1], 5 * h, h),
        "mlp_msg_Gcc": init_gated(ks[2], 2 * h, 2 * h, h),
        "mlp_reduce_Gcc": init_linear(ks[3], 5 * h, h),
        "lin_gc": init_linear(ks[4], h, h),
        "lin_gs": init_linear(ks[5], 2 * h, h),
    }


def init_model(key, n_gc, n_gs, h, n_out_c):
    ks = jax.random.split(key, 10)
    return {
        "aux_fgc0": init_linear(ks[0], n_gc, h),
        "em": init_embedding(ks[1], n_gc, n_gs, h),
        "gsdm1": init_gsd(ks[2], h),
        "gsdm2": init_gsd(ks[3], h),
        "gsdm3": init_gsd(ks[4], h),
        "gcum1": init_gcu(ks[5], h),
        "gcum2": init_gcu(ks[6], h),
        "gcum3": init_gcu(ks[7], h),
        "mlp_congestion": init_mlp2(ks[8], h, h, h),
        "lin_congestion": init_linear(ks[9], h, n_out_c),
    }


def build_edges(key, n_src, n_dst, n_extra):
    """Deterministic edge list, SORTED BY DST (required: indices_are_sorted=True),
    with precomputed in-degree per dst node."""
    ks, kd = jax.random.split(key)
    src = jnp.concatenate([jnp.arange(n_dst, dtype=jnp.int32) % n_src,
                           jax.random.randint(ks, (n_extra,), 0, n_src, jnp.int32)])
    dst = jnp.concatenate([jnp.arange(n_dst, dtype=jnp.int32),
                           jax.random.randint(kd, (n_extra,), 0, n_dst, jnp.int32)])
    order = jnp.argsort(dst)
    src, dst = src[order], dst[order]
    deg = jax.ops.segment_sum(jnp.ones((dst.shape[0], 1), jnp.float32), dst,
                              num_segments=n_dst, indices_are_sorted=True)
    return {"src": src, "dst": dst, "deg": deg}


# ----------------------------------- main ------------------------------------

if __name__ == "__main__":
    n_gc, n_gs, n_hid = 6, 5, 32
    n_out_congestion = 2
    N_gc, N_gs = 12, 10

    key = jax.random.PRNGKey(0)
    k_par, k_fc, k_fs, k_e1, k_e2, k_e3, k_e4 = jax.random.split(key, 7)

    params = init_model(k_par, n_gc, n_gs, n_hid, n_out_congestion)
    nf_gc = jax.random.normal(k_fc, (N_gc, n_gc), jnp.float32)
    nf_gs = jax.random.normal(k_fs, (N_gs, n_gs), jnp.float32)

    G = {
        "n_gc": N_gc,
        "n_gs": N_gs,
        "e_s2c": build_edges(k_e1, N_gs, N_gc, 20),   # gs -> gc
        "e_c2s": build_edges(k_e2, N_gc, N_gs, 20),   # gc -> gs
        "e_cc":  build_edges(k_e3, N_gc, N_gc, 20),   # gc -> gc
        "e_ss1": build_edges(k_e4, N_gs, N_gs, 20),   # gs -> gs
    }

    @jax.jit
    def run(P, fc, fs):
        return mymodel_forward(P, G, fc, fs, n_hid)

    congestion_out = run(params, nf_gc, nf_gs)
    jax.block_until_ready(congestion_out)

    assert congestion_out.shape == (N_gc, n_out_congestion)
    assert bool(jnp.all(jnp.isfinite(congestion_out)))
    print("KERNEL_OK")
</pallas_src>

<mosaic_0001>
module attributes {stable_mosaic.version = 11 : i64} {
  func.func @kernel(%arg0: i32, %arg1: memref<8x5xf32, #tpu.memory_space<vmem>>, %arg2: memref<5x32xbf16, #tpu.memory_space<vmem>>, %arg3: memref<1x32xf32, #tpu.memory_space<vmem>>, %arg4: memref<8x32xbf16, #tpu.memory_space<vmem>>) attributes {dimension_semantics = [#tpu.dimension_semantics<parallel>], iteration_bounds = array<i64: 2>, scalar_prefetch = 0 : i64, scratch_operands = 0 : i64, tpu.core_type = #tpu.core_type<tc>, window_params = [{transform_indices = @transform_0, window_bounds = array<i64: 8, 5>}, {pipeline_mode = #tpu.pipeline_mode<synchronous>, transform_indices = @transform_1, window_bounds = array<i64: 5, 32>}, {pipeline_mode = #tpu.pipeline_mode<synchronous>, transform_indices = @transform_2, window_bounds = array<i64: 1, 32>}, {transform_indices = @transform_3, window_bounds = array<i64: 8, 32>}]} {
    %c0 = arith.constant 0 : index
    %c0_0 = arith.constant 0 : index
    %0 = vector.load %arg2[%c0, %c0_0] : memref<5x32xbf16, #tpu.memory_space<vmem>>, vector<5x32xbf16>
    %c0_1 = arith.constant 0 : index
    %c0_2 = arith.constant 0 : index
    %1 = vector.load %arg1[%c0_1, %c0_2] : memref<8x5xf32, #tpu.memory_space<vmem>>, vector<8x5xf32>
    %2 = arith.truncf %1 : vector<8x5xf32> to vector<8x5xbf16>
    %cst = arith.constant dense<0.000000e+00> : vector<8x32xf32>
    %3 = tpu.matmul %2, %0, %cst {dimension_numbers = #tpu.dot_dimension_numbers<[1], [0], [0], [1], [0, 0, 1, 1], [], []>} : vector<8x5xbf16>, vector<5x32xbf16>, vector<8x32xf32> -> vector<8x32xf32>
    %c0_3 = arith.constant 0 : index
    %c0_4 = arith.constant 0 : index
    %4 = vector.load %arg3[%c0_3, %c0_4] : memref<1x32xf32, #tpu.memory_space<vmem>>, vector<1x32xf32>
    %5 = vector.broadcast %4 : vector<1x32xf32> to vector<8x32xf32>
    %6 = arith.addf %3, %5 : vector<8x32xf32>
    %7 = arith.truncf %6 : vector<8x32xf32> to vector<8x32xbf16>
    %c0_5 = arith.constant 0 : index
    %c0_6 = arith.constant 0 : index
    %8 = vector.load %arg4[%c0_5, %c0_6] : memref<8x32xbf16, #tpu.memory_space<vmem>>, vector<8x32xbf16>
    tpu.vector_store %arg4[%c0_5, %c0_6], %7 {strides = array<i32>} : memref<8x32xbf16, #tpu.memory_space<vmem>>, vector<8x32xbf16>,
    return
  }
  func.func @transform_0(%arg0: i32) -> (i32, i32) {
    %c0_i32 = arith.constant 0 : i32
    %c0_i32_0 = arith.constant 0 : i32
    return %arg0, %c0_i32 : i32, i32
  }
  func.func @transform_1(%arg0: i32) -> (i32, i32) {
    %c0_i32 = arith.constant 0 : i32
    %c0_i32_0 = arith.constant 0 : i32
    %c0_i32_1 = arith.constant 0 : i32
    return %c0_i32, %c0_i32_0 : i32, i32
  }
  func.func @transform_2(%arg0: i32) -> (i32, i32) {
    %c0_i32 = arith.constant 0 : i32
    %c0_i32_0 = arith.constant 0 : i32
    %c0_i32_1 = arith.constant 0 : i32
    return %c0_i32, %c0_i32_0 : i32, i32
  }
  func.func @transform_3(%arg0: i32) -> (i32, i32) {
    %c0_i32 = arith.constant 0 : i32
    %c0_i32_0 = arith.constant 0 : i32
    return %arg0, %c0_i32 : i32, i32
  }
}

module attributes {stable_mosaic.version = 11 : i64} {
  func.func @kernel(%arg0: i32, %arg1: memref<8x6xf32, #tpu.memory_space<vmem>>, %arg2: memref<6x32xbf16, #tpu.memory_space<vmem>>, %arg3: memref<1x32xf32, #tpu.memory_space<vmem>>, %arg4: memref<8x32xbf16, #tpu.memory_space<vmem>>) attributes {dimension_semantics = [#tpu.dimension_semantics<parallel>], iteration_bounds = array<i64: 2>, scalar_prefetch = 0 : i64, scratch_operands = 0 : i64, tpu.core_type = #tpu.core_type<tc>, window_params = [{transform_indices = @transform_0, window_bounds = array<i64: 8, 6>}, {pipeline_mode = #tpu.pipeline_mode<synchronous>, transform_indices = @transform_1, window_bounds = array<i64: 6, 32>}, {pipeline_mode = #tpu.pipeline_mode<synchronous>, transform_indices = @transform_2, window_bounds = array<i64: 1, 32>}, {transform_indices = @transform_3, window_bounds = array<i64: 8, 32>}]} {
    %c0 = arith.constant 0 : index
    %c0_0 = arith.constant 0 : index
    %0 = vector.load %arg2[%c0, %c0_0] : memref<6x32xbf16, #tpu.memory_space<vmem>>, vector<6x32xbf16>
    %c0_1 = arith.constant 0 : index
    %c0_2 = arith.constant 0 : index
    %1 = vector.load %arg1[%c0_1, %c0_2] : memref<8x6xf32, #tpu.memory_space<vmem>>, vector<8x6xf32>
    %2 = arith.truncf %1 : vector<8x6xf32> to vector<8x6xbf16>
    %cst = arith.constant dense<0.000000e+00> : vector<8x32xf32>
    %3 = tpu.matmul %2, %0, %cst {dimension_numbers = #tpu.dot_dimension_numbers<[1], [0], [0], [1], [0, 0, 1, 1], [], []>} : vector<8x6xbf16>, vector<6x32xbf16>, vector<8x32xf32> -> vector<8x32xf32>
    %c0_3 = arith.constant 0 : index
    %c0_4 = arith.constant 0 : index
    %4 = vector.load %arg3[%c0_3, %c0_4] : memref<1x32xf32, #tpu.memory_space<vmem>>, vector<1x32xf32>
    %5 = vector.broadcast %4 : vector<1x32xf32> to vector<8x32xf32>
    %6 = arith.addf %3, %5 : vector<8x32xf32>
    %7 = arith.truncf %6 : vector<8x32xf32> to vector<8x32xbf16>
    %c0_5 = arith.constant 0 : index
    %c0_6 = arith.constant 0 : index
    %8 = vector.load %arg4[%c0_5, %c0_6] : memref<8x32xbf16, #tpu.memory_space<vmem>>, vector<8x32xbf16>
    tpu.vector_store %arg4[%c0_5, %c0_6], %7 {strides = array<i32>} : memref<8x32xbf16, #tpu.memory_space<vmem>>, vector<8x32xbf16>,
    return
  }
  func.func @transform_0(%arg0: i32) -> (i32, i32) {
    %c0_i32 = arith.constant 0 : i32
    %c0_i32_0 = arith.constant 0 : i32
    return %arg0, %c0_i32 : i32, i32
  }
  func.func @transform_1(%arg0: i32) -> (i32, i32) {
    %c0_i32 = arith.constant 0 : i32
    %c0_i32_0 = arith.constant 0 : i32
    %c0_i32_1 = arith.constant 0 : i32
    return %c0_i32, %c0_i32_0 : i32, i32
  }
  func.func @transform_2(%arg0: i32) -> (i32, i32) {
    %c0_i32 = arith.constant 0 : i32
    %c0_i32_0 = arith.constant 0 : i32
    %c0_i32_1 = arith.constant 0 : i32
    return %c0_i32, %c0_i32_0 : i32, i32
  }
  func.func @transform_3(%arg0: i32) -> (i32, i32) {
    %c0_i32 = arith.constant 0 : i32
    %c0_i32_0 = arith.constant 0 : i32
    return %arg0, %c0_i32 : i32, i32
  }
}

module attributes {stable_mosaic.version = 11 : i64} {
  func.func @kernel(%arg0: i32, %arg1: memref<16x32xbf16, #tpu.memory_space<vmem>>, %arg2: memref<16x32xbf16, #tpu.memory_space<vmem>>, %arg3: memref<64x64xbf16, #tpu.memory_space<vmem>>, %arg4: memref<1x64xf32, #tpu.memory_space<vmem>>, %arg5: memref<64x128xbf16, #tpu.memory_space<vmem>>, %arg6: memref<1x128xf32, #tpu.memory_space<vmem>>, %arg7: memref<1x64xf32, #tpu.memory_space<vmem>>, %arg8: memref<1x1xf32, #tpu.memory_space<vmem>>, %arg9: memref<16x128xf32, #tpu.memory_space<vmem>>) attributes {dimension_semantics = [#tpu.dimension_semantics<parallel>], iteration_bounds = array<i64: 2>, scalar_prefetch = 0 : i64, scratch_operands = 0 : i64, tpu.core_type = #tpu.core_type<tc>, window_params = [{transform_indices = @transform_0, window_bounds = array<i64: 16, 32>}, {transform_indices = @transform_1, window_bounds = array<i64: 16, 32>}, {pipeline_mode = #tpu.pipeline_mode<synchronous>, transform_indices = @transform_2, window_bounds = array<i64: 64, 64>}, {pipeline_mode = #tpu.pipeline_mode<synchronous>, transform_indices = @transform_3, window_bounds = array<i64: 1, 64>}, {pipeline_mode = #tpu.pipeline_mode<synchronous>, transform_indices = @transform_4, window_bounds = array<i64: 64, 128>}, {pipeline_mode = #tpu.pipeline_mode<synchronous>, transform_indices = @transform_5, window_bounds = array<i64: 1, 128>}, {pipeline_mode = #tpu.pipeline_mode<synchronous>, transform_indices = @transform_6, window_bounds = array<i64: 1, 64>}, {pipeline_mode = #tpu.pipeline_mode<synchronous>, transform_indices = @transform_7, window_bounds = array<i64: 1, 1>}, {transform_indices = @transform_8, window_bounds = array<i64: 16, 128>}]} {
    %c0 = arith.constant 0 : index
    %c0_0 = arith.constant 0 : index
    %0 = vector.load %arg3[%c0, %c0_0] : memref<64x64xbf16, #tpu.memory_space<vmem>>, vector<64x64xbf16>
    %c0_1 = arith.constant 0 : index
    %c0_2 = arith.constant 0 : index
    %1 = vector.load %arg1[%c0_1, %c0_2] : memref<16x32xbf16, #tpu.memory_space<vmem>>, vector<16x32xbf16>
    %2 = vector.extract_strided_slice %0 {offsets = [0, 0], sizes = [32, 64], strides = [1, 1]} : vector<64x64xbf16> to vector<32x64xbf16>
    %cst = arith.constant dense<0.000000e+00> : vector<16x64xf32>
    %3 = tpu.matmul %1, %2, %cst {dimension_numbers = #tpu.dot_dimension_numbers<[1], [0], [0], [1], [0, 0, 1, 1], [], []>} : vector<16x32xbf16>, vector<32x64xbf16>, vector<16x64xf32> -> vector<16x64xf32>
    %c0_3 = arith.constant 0 : index
    %c0_4 = arith.constant 0 : index
    %4 = vector.load %arg2[%c0_3, %c0_4] : memref<16x32xbf16, #tpu.memory_space<vmem>>, vector<16x32xbf16>
    %5 = vector.extract_strided_slice %0 {offsets = [32, 0], sizes = [32, 64], strides = [1, 1]} : vector<64x64xbf16> to vector<32x64xbf16>
    %cst_5 = arith.constant dense<0.000000e+00> : vector<16x64xf32>
    %6 = tpu.matmul %4, %5, %cst_5 {dimension_numbers = #tpu.dot_dimension_numbers<[1], [0], [0], [1], [0, 0, 1, 1], [], []>} : vector<16x32xbf16>, vector<32x64xbf16>, vector<16x64xf32> -> vector<16x64xf32>
    %7 = arith.addf %3, %6 : vector<16x64xf32>
    %c0_6 = arith.constant 0 : index
    %c0_7 = arith.constant 0 : index
    %8 = vector.load %arg4[%c0_6, %c0_7] : memref<1x64xf32, #tpu.memory_space<vmem>>, vector<1x64xf32>
    %9 = vector.broadcast %8 : vector<1x64xf32> to vector<16x64xf32>
    %10 = arith.addf %7, %9 : vector<16x64xf32>
    %cst_8 = arith.constant 0.000000e+00 : f32
    %11 = vector.broadcast %cst_8 : f32 to vector<16x64xf32>
    %12 = arith.maximumf %10, %11 : vector<16x64xf32>
    %13 = arith.truncf %12 : vector<16x64xf32> to vector<16x64xbf16>
    %c0_9 = arith.constant 0 : index
    %c0_10 = arith.constant 0 : index
    %14 = vector.load %arg5[%c0_9, %c0_10] : memref<64x128xbf16, #tpu.memory_space<vmem>>, vector<64x128xbf16>
    %cst_11 = arith.constant dense<0.000000e+00> : vector<16x128xf32>
    %15 = tpu.matmul %13, %14, %cst_11 {dimension_numbers = #tpu.dot_dimension_numbers<[1], [0], [0], [1], [0, 0, 1, 1], [], []>} : vector<16x64xbf16>, vector<64x128xbf16>, vector<16x128xf32> -> vector<16x128xf32>
    %c0_12 = arith.constant 0 : index
    %c0_13 = arith.constant 0 : index
    %16 = vector.load %arg6[%c0_12, %c0_13] : memref<1x128xf32, #tpu.memory_space<vmem>>, vector<1x128xf32>
    %17 = vector.broadcast %16 : vector<1x128xf32> to vector<16x128xf32>
    %18 = arith.addf %15, %17 : vector<16x128xf32>
    %c0_14 = arith.constant 0 : index
    %c0_15 = arith.constant 0 : index
    %19 = vector.load %arg7[%c0_14, %c0_15] : memref<1x64xf32, #tpu.memory_space<vmem>>, vector<1x64xf32>
    %20 = vector.broadcast %19 : vector<1x64xf32> to vector<16x64xf32>
    %21 = arith.mulf %12, %20 : vector<16x64xf32>
    %cst_16 = arith.constant dense<0.000000e+00> : vector<16xf32>
    %22 = vector.multi_reduction <add>, %21, %cst_16 [1] : vector<16x64xf32> to vector<16xf32>
    %23 = vector.shape_cast %22 : vector<16xf32> to vector<16x1xf32>
    %c0_17 = arith.constant 0 : index
    %c0_18 = arith.constant 0 : index
    %24 = vector.load %arg8[%c0_17, %c0_18] : memref<1x1xf32, #tpu.memory_space<vmem>>, vector<1x1xf32>
    %25 = vector.broadcast %24 : vector<1x1xf32> to vector<16x1xf32>
    %26 = arith.addf %23, %25 : vector<16x1xf32>
    %27 = arith.negf %26 : vector<16x1xf32>
    %28 = math.exp %27 : vector<16x1xf32>
    %cst_19 = arith.constant 1.000000e+00 : f32
    %29 = vector.broadcast %cst_19 : f32 to vector<16x1xf32>
    %30 = arith.addf %29, %28 : vector<16x1xf32>
    %31 = arith.divf %29, %30 : vector<16x1xf32>
    %32 = vector.broadcast %31 : vector<16x1xf32> to vector<16x128xf32>
    %33 = arith.mulf %18, %32 : vector<16x128xf32>
    %c0_20 = arith.constant 0 : index
    %c0_21 = arith.constant 0 : index
    %34 = vector.load %arg9[%c0_20, %c0_21] : memref<16x128xf32, #tpu.memory_space<vmem>>, vector<16x128xf32>
    tpu.vector_store %arg9[%c0_20, %c0_21], %33 {strides = array<i32>} : memref<16x128xf32, #tpu.memory_space<vmem>>, vector<16x128xf32>,
    return
  }
  func.func @transform_0(%arg0: i32) -> (i32, i32) {
    %c0_i32 = arith.constant 0 : i32
    %c0_i32_0 = arith.constant 0 : i32
    return %arg0, %c0_i32 : i32, i32
  }
  func.func @transform_1(%arg0: i32) -> (i32, i32) {
    %c0_i32 = arith.constant 0 : i32
    %c0_i32_0 = arith.constant 0 : i32
    return %arg0, %c0_i32 : i32, i32
  }
  func.func @transform_2(%arg0: i32) -> (i32, i32) {
    %c0_i32 = arith.constant 0 : i32
    %c0_i32_0 = arith.constant 0 : i32
    %c0_i32_1 = arith.constant 0 : i32
    return %c0_i32, %c0_i32_0 : i32, i32
  }
  func.func @transform_3(%arg0: i32) -> (i32, i32) {
    %c0_i32 = arith.constant 0 : i32
    %c0_i32_0 = arith.constant 0 : i32
    %c0_i32_1 = arith.constant 0 : i32
    return %c0_i32, %c0_i32_0 : i32, i32
  }
  func.func @transform_4(%arg0: i32) -> (i32, i32) {
    %c0_i32 = arith.constant 0 : i32
    %c0_i32_0 = arith.constant 0 : i32
    %c0_i32_1 = arith.constant 0 : i32
    return %c0_i32, %c0_i32_0 : i32, i32
  }
  func.func @transform_5(%arg0: i32) -> (i32, i32) {
    %c0_i32 = arith.constant 0 : i32
    %c0_i32_0 = arith.constant 0 : i32
    %c0_i32_1 = arith.constant 0 : i32
    return %c0_i32, %c0_i32_0 : i32, i32
  }
  func.func @transform_6(%arg0: i32) -> (i32, i32) {
    %c0_i32 = arith.constant 0 : i32
    %c0_i32_0 = arith.constant 0 : i32
    %c0_i32_1 = arith.constant 0 : i32
    return %c0_i32, %c0_i32_0 : i32, i32
  }
  func.func @transform_7(%arg0: i32) -> (i32, i32) {
    %c0_i32 = arith.constant 0 : i32
    %c0_i32_0 = arith.constant 0 : i32
    %c0_i32_1 = arith.constant 0 : i32
    return %c0_i32, %c0_i32_0 : i32, i32
  }
  func.func @transform_8(%arg0: i32) -> (i32, i32) {
    %c0_i32 = arith.constant 0 : i32
    %c0_i32_0 = arith.constant 0 : i32
    return %arg0, %c0_i32 : i32, i32
  }
}

module attributes {stable_mosaic.version = 11 : i64} {
  func.func @kernel(%arg0: i32, %arg1: memref<8x32xbf16, #tpu.memory_space<vmem>>, %arg2: memref<8x64xf32, #tpu.memory_space<vmem>>, %arg3: memref<8x32xf32, #tpu.memory_space<vmem>>, %arg4: memref<8x32xf32, #tpu.memory_space<vmem>>, %arg5: memref<8x1xf32, #tpu.memory_space<vmem>>, %arg6: memref<160x32xbf16, #tpu.memory_space<vmem>>, %arg7: memref<1x32xf32, #tpu.memory_space<vmem>>, %arg8: memref<64x32xbf16, #tpu.memory_space<vmem>>, %arg9: memref<1x32xf32, #tpu.memory_space<vmem>>, %arg10: memref<32x32xbf16, #tpu.memory_space<vmem>>, %arg11: memref<1x32xf32, #tpu.memory_space<vmem>>, %arg12: memref<8x32xbf16, #tpu.memory_space<vmem>>) attributes {dimension_semantics = [#tpu.dimension_semantics<parallel>], iteration_bounds = array<i64: 2>, scalar_prefetch = 0 : i64, scratch_operands = 0 : i64, tpu.core_type = #tpu.core_type<tc>, window_params = [{transform_indices = @transform_0, window_bounds = array<i64: 8, 32>}, {transform_indices = @transform_1, window_bounds = array<i64: 8, 64>}, {transform_indices = @transform_2, window_bounds = array<i64: 8, 32>}, {transform_indices = @transform_3, window_bounds = array<i64: 8, 32>}, {transform_indices = @transform_4, window_bounds = array<i64: 8, 1>}, {pipeline_mode = #tpu.pipeline_mode<synchronous>, transform_indices = @transform_5, window_bounds = array<i64: 160, 32>}, {pipeline_mode = #tpu.pipeline_mode<synchronous>, transform_indices = @transform_6, window_bounds = array<i64: 1, 32>}, {pipeline_mode = #tpu.pipeline_mode<synchronous>, transform_indices = @transform_7, window_bounds = array<i64: 64, 32>}, {pipeline_mode = #tpu.pipeline_mode<synchronous>, transform_indices = @transform_8, window_bounds = array<i64: 1, 32>}, {pipeline_mode = #tpu.pipeline_mode<synchronous>, transform_indices = @transform_9, window_bounds = array<i64: 32, 32>}, {pipeline_mode = #tpu.pipeline_mode<synchronous>, transform_indices = @transform_10, window_bounds = array<i64: 1, 32>}, {transform_indices = @transform_11, window_bounds = array<i64: 8, 32>}]} {
    %c0 = arith.constant 0 : index
    %c0_0 = arith.constant 0 : index
    %0 = vector.load %arg1[%c0, %c0_0] : memref<8x32xbf16, #tpu.memory_space<vmem>>, vector<8x32xbf16>
    %c0_1 = arith.constant 0 : index
    %c0_2 = arith.constant 0 : index
    %1 = vector.load %arg2[%c0_1, %c0_2] : memref<8x64xf32, #tpu.memory_space<vmem>>, vector<8x64xf32>
    %c0_3 = arith.constant 0 : index
    %c0_4 = arith.constant 0 : index
    %2 = vector.load %arg3[%c0_3, %c0_4] : memref<8x32xf32, #tpu.memory_space<vmem>>, vector<8x32xf32>
    %c0_5 = arith.constant 0 : index
    %c0_6 = arith.constant 0 : index
    %3 = vector.load %arg4[%c0_5, %c0_6] : memref<8x32xf32, #tpu.memory_space<vmem>>, vector<8x32xf32>
    %c0_7 = arith.constant 0 : index
    %c0_8 = arith.constant 0 : index
    %4 = vector.load %arg5[%c0_7, %c0_8] : memref<8x1xf32, #tpu.memory_space<vmem>>, vector<8x1xf32>
    %c0_9 = arith.constant 0 : index
    %c0_10 = arith.constant 0 : index
    %5 = vector.load %arg6[%c0_9, %c0_10] : memref<160x32xbf16, #tpu.memory_space<vmem>>, vector<160x32xbf16>
    %c0_11 = arith.constant 0 : index
    %c0_12 = arith.constant 0 : index
    %6 = vector.load %arg7[%c0_11, %c0_12] : memref<1x32xf32, #tpu.memory_space<vmem>>, vector<1x32xf32>
    %cst = arith.constant 0.000000e+00 : f32
    %7 = vector.broadcast %cst : f32 to vector<8x1xf32>
    %8 = arith.cmpf ogt, %4, %7 : vector<8x1xf32>
    %9 = vector.extract_strided_slice %1 {offsets = [0, 0], sizes = [8, 32], strides = [1, 1]} : vector<8x64xf32> to vector<8x32xf32>
    %10 = vector.extract_strided_slice %1 {offsets = [0, 32], sizes = [8, 32], strides = [1, 1]} : vector<8x64xf32> to vector<8x32xf32>
    %cst_13 = arith.constant 0.000000e+00 : f32
    %11 = vector.shape_cast %8 : vector<8x1xi1> to vector<8x1xi1>
    %12 = vector.broadcast %11 : vector<8x1xi1> to vector<8x32xi1>
    %13 = vector.broadcast %cst_13 : f32 to vector<8x32xf32>
    %14 = arith.select %12, %2, %13 : vector<8x32xi1>, vector<8x32xf32>
    %cst_14 = arith.constant 0.000000e+00 : f32
    %15 = vector.shape_cast %8 : vector<8x1xi1> to vector<8x1xi1>
    %16 = vector.broadcast %15 : vector<8x1xi1> to vector<8x32xi1>
    %17 = vector.broadcast %cst_14 : f32 to vector<8x32xf32>
    %18 = arith.select %16, %3, %17 : vector<8x32xi1>, vector<8x32xf32>
    %19 = vector.extract_strided_slice %5 {offsets = [0, 0], sizes = [32, 32], strides = [1, 1]} : vector<160x32xbf16> to vector<32x32xbf16>
    %cst_15 = arith.constant dense<0.000000e+00> : vector<8x32xf32>
    %20 = tpu.matmul %0, %19, %cst_15 {dimension_numbers = #tpu.dot_dimension_numbers<[1], [0], [0], [1], [0, 0, 1, 1], [], []>} : vector<8x32xbf16>, vector<32x32xbf16>, vector<8x32xf32> -> vector<8x32xf32>
    %21 = arith.truncf %9 : vector<8x32xf32> to vector<8x32xbf16>
    %22 = vector.extract_strided_slice %5 {offsets = [32, 0], sizes = [32, 32], strides = [1, 1]} : vector<160x32xbf16> to vector<32x32xbf16>
    %cst_16 = arith.constant dense<0.000000e+00> : vector<8x32xf32>
    %23 = tpu.matmul %21, %22, %cst_16 {dimension_numbers = #tpu.dot_dimension_numbers<[1], [0], [0], [1], [0, 0, 1, 1], [], []>} : vector<8x32xbf16>, vector<32x32xbf16>, vector<8x32xf32> -> vector<8x32xf32>
    %24 = arith.addf %20, %23 : vector<8x32xf32>
    %25 = arith.truncf %14 : vector<8x32xf32> to vector<8x32xbf16>
    %26 = vector.extract_strided_slice %5 {offsets = [64, 0], sizes = [32, 32], strides = [1, 1]} : vector<160x32xbf16> to vector<32x32xbf16>
    %cst_17 = arith.constant dense<0.000000e+00> : vector<8x32xf32>
    %27 = tpu.matmul %25, %26, %cst_17 {dimension_numbers = #tpu.dot_dimension_numbers<[1], [0], [0], [1], [0, 0, 1, 1], [], []>} : vector<8x32xbf16>, vector<32x32xbf16>, vector<8x32xf32> -> vector<8x32xf32>
    %28 = arith.addf %24, %27 : vector<8x32xf32>
    %29 = arith.truncf %18 : vector<8x32xf32> to vector<8x32xbf16>
    %30 = vector.extract_strided_slice %5 {offsets = [96, 0], sizes = [32, 32], strides = [1, 1]} : vector<160x32xbf16> to vector<32x32xbf16>
    %cst_18 = arith.constant dense<0.000000e+00> : vector<8x32xf32>
    %31 = tpu.matmul %29, %30, %cst_18 {dimension_numbers = #tpu.dot_dimension_numbers<[1], [0], [0], [1], [0, 0, 1, 1], [], []>} : vector<8x32xbf16>, vector<32x32xbf16>, vector<8x32xf32> -> vector<8x32xf32>
    %32 = arith.addf %28, %31 : vector<8x32xf32>
    %33 = arith.truncf %10 : vector<8x32xf32> to vector<8x32xbf16>
    %34 = vector.extract_strided_slice %5 {offsets = [128, 0], sizes = [32, 32], strides = [1, 1]} : vector<160x32xbf16> to vector<32x32xbf16>
    %cst_19 = arith.constant dense<0.000000e+00> : vector<8x32xf32>
    %35 = tpu.matmul %33, %34, %cst_19 {dimension_numbers = #tpu.dot_dimension_numbers<[1], [0], [0], [1], [0, 0, 1, 1], [], []>} : vector<8x32xbf16>, vector<32x32xbf16>, vector<8x32xf32> -> vector<8x32xf32>
    %36 = arith.addf %32, %35 : vector<8x32xf32>
    %37 = vector.broadcast %6 : vector<1x32xf32> to vector<8x32xf32>
    %38 = arith.addf %36, %37 : vector<8x32xf32>
    %c0_20 = arith.constant 0 : index
    %c0_21 = arith.constant 0 : index
    %39 = vector.load %arg8[%c0_20, %c0_21] : memref<64x32xbf16, #tpu.memory_space<vmem>>, vector<64x32xbf16>
    %40 = vector.extract_strided_slice %39 {offsets = [0, 0], sizes = [32, 32], strides = [1, 1]} : vector<64x32xbf16> to vector<32x32xbf16>
    %cst_22 = arith.constant dense<0.000000e+00> : vector<8x32xf32>
    %41 = tpu.matmul %0, %40, %cst_22 {dimension_numbers = #tpu.dot_dimension_numbers<[1], [0], [0], [1], [0, 0, 1, 1], [], []>} : vector<8x32xbf16>, vector<32x32xbf16>, vector<8x32xf32> -> vector<8x32xf32>
    %42 = arith.truncf %38 : vector<8x32xf32> to vector<8x32xbf16>
    %43 = vector.extract_strided_slice %39 {offsets = [32, 0], sizes = [32, 32], strides = [1, 1]} : vector<64x32xbf16> to vector<32x32xbf16>
    %cst_23 = arith.constant dense<0.000000e+00> : vector<8x32xf32>
    %44 = tpu.matmul %42, %43, %cst_23 {dimension_numbers = #tpu.dot_dimension_numbers<[1], [0], [0], [1], [0, 0, 1, 1], [], []>} : vector<8x32xbf16>, vector<32x32xbf16>, vector<8x32xf32> -> vector<8x32xf32>
    %45 = arith.addf %41, %44 : vector<8x32xf32>
    %c0_24 = arith.constant 0 : index
    %c0_25 = arith.constant 0 : index
    %46 = vector.load %arg9[%c0_24, %c0_25] : memref<1x32xf32, #tpu.memory_space<vmem>>, vector<1x32xf32>
    %47 = vector.broadcast %46 : vector<1x32xf32> to vector<8x32xf32>
    %48 = arith.addf %45, %47 : vector<8x32xf32>
    %cst_26 = arith.constant 0.000000e+00 : f32
    %49 = vector.broadcast %cst_26 : f32 to vector<8x32xf32>
    %50 = arith.maximumf %48, %49 : vector<8x32xf32>
    %51 = arith.truncf %50 : vector<8x32xf32> to vector<8x32xbf16>
    %c0_27 = arith.constant 0 : index
    %c0_28 = arith.constant 0 : index
    %52 = vector.load %arg10[%c0_27, %c0_28] : memref<32x32xbf16, #tpu.memory_space<vmem>>, vector<32x32xbf16>
    %cst_29 = arith.constant dense<0.000000e+00> : vector<8x32xf32>
    %53 = tpu.matmul %51, %52, %cst_29 {dimension_numbers = #tpu.dot_dimension_numbers<[1], [0], [0], [1], [0, 0, 1, 1], [], []>} : vector<8x32xbf16>, vector<32x32xbf16>, vector<8x32xf32> -> vector<8x32xf32>
    %c0_30 = arith.constant 0 : index
    %c0_31 = arith.constant 0 : index
    %54 = vector.load %arg11[%c0_30, %c0_31] : memref<1x32xf32, #tpu.memory_space<vmem>>, vector<1x32xf32>
    %55 = vector.broadcast %54 : vector<1x32xf32> to vector<8x32xf32>
    %56 = arith.addf %53, %55 : vector<8x32xf32>
    %57 = arith.truncf %56 : vector<8x32xf32> to vector<8x32xbf16>
    %c0_32 = arith.constant 0 : index
    %c0_33 = arith.constant 0 : index
    %58 = vector.load %arg12[%c0_32, %c0_33] : memref<8x32xbf16, #tpu.memory_space<vmem>>, vector<8x32xbf16>
    tpu.vector_store %arg12[%c0_32, %c0_33], %57 {strides = array<i32>} : memref<8x32xbf16, #tpu.memory_space<vmem>>, vector<8x32xbf16>,
    return
  }
  func.func @transform_0(%arg0: i32) -> (i32, i32) {
    %c0_i32 = arith.constant 0 : i32
    %c0_i32_0 = arith.constant 0 : i32
    return %arg0, %c0_i32 : i32, i32
  }
  func.func @transform_1(%arg0: i32) -> (i32, i32) {
    %c0_i32 = arith.constant 0 : i32
    %c0_i32_0 = arith.constant 0 : i32
    return %arg0, %c0_i32 : i32, i32
  }
  func.func @transform_2(%arg0: i32) -> (i32, i32) {
    %c0_i32 = arith.constant 0 : i32
    %c0_i32_0 = arith.constant 0 : i32
    return %arg0, %c0_i32 : i32, i32
  }
  func.func @transform_3(%arg0: i32) -> (i32, i32) {
    %c0_i32 = arith.constant 0 : i32
    %c0_i32_0 = arith.constant 0 : i32
    return %arg0, %c0_i32 : i32, i32
  }
  func.func @transform_4(%arg0: i32) -> (i32, i32) {
    %c0_i32 = arith.constant 0 : i32
    %c0_i32_0 = arith.constant 0 : i32
    return %arg0, %c0_i32 : i32, i32
  }
  func.func @transform_5(%arg0: i32) -> (i32, i32) {
    %c0_i32 = arith.constant 0 : i32
    %c0_i32_0 = arith.constant 0 : i32
    %c0_i32_1 = arith.constant 0 : i32
    return %c0_i32, %c0_i32_0 : i32, i32
  }
  func.func @transform_6(%arg0: i32) -> (i32, i32) {
    %c0_i32 = arith.constant 0 : i32
    %c0_i32_0 = arith.constant 0 : i32
    %c0_i32_1 = arith.constant 0 : i32
    return %c0_i32, %c0_i32_0 : i32, i32
  }
  func.func @transform_7(%arg0: i32) -> (i32, i32) {
    %c0_i32 = arith.constant 0 : i32
    %c0_i32_0 = arith.constant 0 : i32
    %c0_i32_1 = arith.constant 0 : i32
    return %c0_i32, %c0_i32_0 : i32, i32
  }
  func.func @transform_8(%arg0: i32) -> (i32, i32) {
    %c0_i32 = arith.constant 0 : i32
    %c0_i32_0 = arith.constant 0 : i32
    %c0_i32_1 = arith.constant 0 : i32
    return %c0_i32, %c0_i32_0 : i32, i32
  }
  func.func @transform_9(%arg0: i32) -> (i32, i32) {
    %c0_i32 = arith.constant 0 : i32
    %c0_i32_0 = arith.constant 0 : i32
    %c0_i32_1 = arith.constant 0 : i32
    return %c0_i32, %c0_i32_0 : i32, i32
  }
  func.func @transform_10(%arg0: i32) -> (i32, i32) {
    %c0_i32 = arith.constant 0 : i32
    %c0_i32_0 = arith.constant 0 : i32
    %c0_i32_1 = arith.constant 0 : i32
    return %c0_i32, %c0_i32_0 : i32, i32
  }
  func.func @transform_11(%arg0: i32) -> (i32, i32) {
    %c0_i32 = arith.constant 0 : i32
    %c0_i32_0 = arith.constant 0 : i32
    return %arg0, %c0_i32 : i32, i32
  }
}

module attributes {stable_mosaic.version = 11 : i64} {
  func.func @kernel(%arg0: i32, %arg1: memref<8x32xbf16, #tpu.memory_space<vmem>>, %arg2: memref<8x64xf32, #tpu.memory_space<vmem>>, %arg3: memref<8x32xf32, #tpu.memory_space<vmem>>, %arg4: memref<8x32xf32, #tpu.memory_space<vmem>>, %arg5: memref<8x1xf32, #tpu.memory_space<vmem>>, %arg6: memref<160x32xbf16, #tpu.memory_space<vmem>>, %arg7: memref<1x32xf32, #tpu.memory_space<vmem>>, %arg8: memref<64x32xbf16, #tpu.memory_space<vmem>>, %arg9: memref<1x32xf32, #tpu.memory_space<vmem>>, %arg10: memref<32x32xbf16, #tpu.memory_space<vmem>>, %arg11: memref<1x32xf32, #tpu.memory_space<vmem>>, %arg12: memref<8x32xbf16, #tpu.memory_space<vmem>>) attributes {dimension_semantics = [#tpu.dimension_semantics<parallel>], iteration_bounds = array<i64: 2>, scalar_prefetch = 0 : i64, scratch_operands = 0 : i64, tpu.core_type = #tpu.core_type<tc>, window_params = [{transform_indices = @transform_0, window_bounds = array<i64: 8, 32>}, {transform_indices = @transform_1, window_bounds = array<i64: 8, 64>}, {transform_indices = @transform_2, window_bounds = array<i64: 8, 32>}, {transform_indices = @transform_3, window_bounds = array<i64: 8, 32>}, {transform_indices = @transform_4, window_bounds = array<i64: 8, 1>}, {pipeline_mode = #tpu.pipeline_mode<synchronous>, transform_indices = @transform_5, window_bounds = array<i64: 160, 32>}, {pipeline_mode = #tpu.pipeline_mode<synchronous>, transform_indices = @transform_6, window_bounds = array<i64: 1, 32>}, {pipeline_mode = #tpu.pipeline_mode<synchronous>, transform_indices = @transform_7, window_bounds = array<i64: 64, 32>}, {pipeline_mode = #tpu.pipeline_mode<synchronous>, transform_indices = @transform_8, window_bounds = array<i64: 1, 32>}, {pipeline_mode = #tpu.pipeline_mode<synchronous>, transform_indices = @transform_9, window_bounds = array<i64: 32, 32>}, {pipeline_mode = #tpu.pipeline_mode<synchronous>, transform_indices = @transform_10, window_bounds = array<i64: 1, 32>}, {transform_indices = @transform_11, window_bounds = array<i64: 8, 32>}]} {
    %c0 = arith.constant 0 : index
    %c0_0 = arith.constant 0 : index
    %0 = vector.load %arg1[%c0, %c0_0] : memref<8x32xbf16, #tpu.memory_space<vmem>>, vector<8x32xbf16>
    %c0_1 = arith.constant 0 : index
    %c0_2 = arith.constant 0 : index
    %1 = vector.load %arg2[%c0_1, %c0_2] : memref<8x64xf32, #tpu.memory_space<vmem>>, vector<8x64xf32>
    %c0_3 = arith.constant 0 : index
    %c0_4 = arith.constant 0 : index
    %2 = vector.load %arg3[%c0_3, %c0_4] : memref<8x32xf32, #tpu.memory_space<vmem>>, vector<8x32xf32>
    %c0_5 = arith.constant 0 : index
    %c0_6 = arith.constant 0 : index
    %3 = vector.load %arg4[%c0_5, %c0_6] : memref<8x32xf32, #tpu.memory_space<vmem>>, vector<8x32xf32>
    %c0_7 = arith.constant 0 : index
    %c0_8 = arith.constant 0 : index
    %4 = vector.load %arg5[%c0_7, %c0_8] : memref<8x1xf32, #tpu.memory_space<vmem>>, vector<8x1xf32>
    %c0_9 = arith.constant 0 : index
    %c0_10 = arith.constant 0 : index
    %5 = vector.load %arg6[%c0_9, %c0_10] : memref<160x32xbf16, #tpu.memory_space<vmem>>, vector<160x32xbf16>
    %c0_11 = arith.constant 0 : index
    %c0_12 = arith.constant 0 : index
    %6 = vector.load %arg7[%c0_11, %c0_12] : memref<1x32xf32, #tpu.memory_space<vmem>>, vector<1x32xf32>
    %cst = arith.constant 0.000000e+00 : f32
    %7 = vector.broadcast %cst : f32 to vector<8x1xf32>
    %8 = arith.cmpf ogt, %4, %7 : vector<8x1xf32>
    %9 = vector.extract_strided_slice %1 {offsets = [0, 0], sizes = [8, 32], strides = [1, 1]} : vector<8x64xf32> to vector<8x32xf32>
    %10 = vector.extract_strided_slice %1 {offsets = [0, 32], sizes = [8, 32], strides = [1, 1]} : vector<8x64xf32> to vector<8x32xf32>
    %cst_13 = arith.constant 0.000000e+00 : f32
    %11 = vector.shape_cast %8 : vector<8x1xi1> to vector<8x1xi1>
    %12 = vector.broadcast %11 : vector<8x1xi1> to vector<8x32xi1>
    %13 = vector.broadcast %cst_13 : f32 to vector<8x32xf32>
    %14 = arith.select %12, %2, %13 : vector<8x32xi1>, vector<8x32xf32>
    %cst_14 = arith.constant 0.000000e+00 : f32
    %15 = vector.shape_cast %8 : vector<8x1xi1> to vector<8x1xi1>
    %16 = vector.broadcast %15 : vector<8x1xi1> to vector<8x32xi1>
    %17 = vector.broadcast %cst_14 : f32 to vector<8x32xf32>
    %18 = arith.select %16, %3, %17 : vector<8x32xi1>, vector<8x32xf32>
    %19 = vector.extract_strided_slice %5 {offsets = [0, 0], sizes = [32, 32], strides = [1, 1]} : vector<160x32xbf16> to vector<32x32xbf16>
    %cst_15 = arith.constant dense<0.000000e+00> : vector<8x32xf32>
    %20 = tpu.matmul %0, %19, %cst_15 {dimension_numbers = #tpu.dot_dimension_numbers<[1], [0], [0], [1], [0, 0, 1, 1], [], []>} : vector<8x32xbf16>, vector<32x32xbf16>, vector<8x32xf32> -> vector<8x32xf32>
    %21 = arith.truncf %9 : vector<8x32xf32> to vector<8x32xbf16>
    %22 = vector.extract_strided_slice %5 {offsets = [32, 0], sizes = [32, 32], strides = [1, 1]} : vector<160x32xbf16> to vector<32x32xbf16>
    %cst_16 = arith.constant dense<0.000000e+00> : vector<8x32xf32>
    %23 = tpu.matmul %21, %22, %cst_16 {dimension_numbers = #tpu.dot_dimension_numbers<[1], [0], [0], [1], [0, 0, 1, 1], [], []>} : vector<8x32xbf16>, vector<32x32xbf16>, vector<8x32xf32> -> vector<8x32xf32>
    %24 = arith.addf %20, %23 : vector<8x32xf32>
    %25 = arith.truncf %14 : vector<8x32xf32> to vector<8x32xbf16>
    %26 = vector.extract_strided_slice %5 {offsets = [64, 0], sizes = [32, 32], strides = [1, 1]} : vector<160x32xbf16> to vector<32x32xbf16>
    %cst_17 = arith.constant dense<0.000000e+00> : vector<8x32xf32>
    %27 = tpu.matmul %25, %26, %cst_17 {dimension_numbers = #tpu.dot_dimension_numbers<[1], [0], [0], [1], [0, 0, 1, 1], [], []>} : vector<8x32xbf16>, vector<32x32xbf16>, vector<8x32xf32> -> vector<8x32xf32>
    %28 = arith.addf %24, %27 : vector<8x32xf32>
    %29 = arith.truncf %18 : vector<8x32xf32> to vector<8x32xbf16>
    %30 = vector.extract_strided_slice %5 {offsets = [96, 0], sizes = [32, 32], strides = [1, 1]} : vector<160x32xbf16> to vector<32x32xbf16>
    %cst_18 = arith.constant dense<0.000000e+00> : vector<8x32xf32>
    %31 = tpu.matmul %29, %30, %cst_18 {dimension_numbers = #tpu.dot_dimension_numbers<[1], [0], [0], [1], [0, 0, 1, 1], [], []>} : vector<8x32xbf16>, vector<32x32xbf16>, vector<8x32xf32> -> vector<8x32xf32>
    %32 = arith.addf %28, %31 : vector<8x32xf32>
    %33 = arith.truncf %10 : vector<8x32xf32> to vector<8x32xbf16>
    %34 = vector.extract_strided_slice %5 {offsets = [128, 0], sizes = [32, 32], strides = [1, 1]} : vector<160x32xbf16> to vector<32x32xbf16>
    %cst_19 = arith.constant dense<0.000000e+00> : vector<8x32xf32>
    %35 = tpu.matmul %33, %34, %cst_19 {dimension_numbers = #tpu.dot_dimension_numbers<[1], [0], [0], [1], [0, 0, 1, 1], [], []>} : vector<8x32xbf16>, vector<32x32xbf16>, vector<8x32xf32> -> vector<8x32xf32>
    %36 = arith.addf %32, %35 : vector<8x32xf32>
    %37 = vector.broadcast %6 : vector<1x32xf32> to vector<8x32xf32>
    %38 = arith.addf %36, %37 : vector<8x32xf32>
    %c0_20 = arith.constant 0 : index
    %c0_21 = arith.constant 0 : index
    %39 = vector.load %arg8[%c0_20, %c0_21] : memref<64x32xbf16, #tpu.memory_space<vmem>>, vector<64x32xbf16>
    %40 = vector.extract_strided_slice %39 {offsets = [0, 0], sizes = [32, 32], strides = [1, 1]} : vector<64x32xbf16> to vector<32x32xbf16>
    %cst_22 = arith.constant dense<0.000000e+00> : vector<8x32xf32>
    %41 = tpu.matmul %0, %40, %cst_22 {dimension_numbers = #tpu.dot_dimension_numbers<[1], [0], [0], [1], [0, 0, 1, 1], [], []>} : vector<8x32xbf16>, vector<32x32xbf16>, vector<8x32xf32> -> vector<8x32xf32>
    %42 = arith.truncf %38 : vector<8x32xf32> to vector<8x32xbf16>
    %43 = vector.extract_strided_slice %39 {offsets = [32, 0], sizes = [32, 32], strides = [1, 1]} : vector<64x32xbf16> to vector<32x32xbf16>
    %cst_23 = arith.constant dense<0.000000e+00> : vector<8x32xf32>
    %44 = tpu.matmul %42, %43, %cst_23 {dimension_numbers = #tpu.dot_dimension_numbers<[1], [0], [0], [1], [0, 0, 1, 1], [], []>} : vector<8x32xbf16>, vector<32x32xbf16>, vector<8x32xf32> -> vector<8x32xf32>
    %45 = arith.addf %41, %44 : vector<8x32xf32>
    %c0_24 = arith.constant 0 : index
    %c0_25 = arith.constant 0 : index
    %46 = vector.load %arg9[%c0_24, %c0_25] : memref<1x32xf32, #tpu.memory_space<vmem>>, vector<1x32xf32>
    %47 = vector.broadcast %46 : vector<1x32xf32> to vector<8x32xf32>
    %48 = arith.addf %45, %47 : vector<8x32xf32>
    %cst_26 = arith.constant 0.000000e+00 : f32
    %49 = vector.broadcast %cst_26 : f32 to vector<8x32xf32>
    %50 = arith.maximumf %48, %49 : vector<8x32xf32>
    %51 = arith.truncf %50 : vector<8x32xf32> to vector<8x32xbf16>
    %c0_27 = arith.constant 0 : index
    %c0_28 = arith.constant 0 : index
    %52 = vector.load %arg10[%c0_27, %c0_28] : memref<32x32xbf16, #tpu.memory_space<vmem>>, vector<32x32xbf16>
    %cst_29 = arith.constant dense<0.000000e+00> : vector<8x32xf32>
    %53 = tpu.matmul %51, %52, %cst_29 {dimension_numbers = #tpu.dot_dimension_numbers<[1], [0], [0], [1], [0, 0, 1, 1], [], []>} : vector<8x32xbf16>, vector<32x32xbf16>, vector<8x32xf32> -> vector<8x32xf32>
    %c0_30 = arith.constant 0 : index
    %c0_31 = arith.constant 0 : index
    %54 = vector.load %arg11[%c0_30, %c0_31] : memref<1x32xf32, #tpu.memory_space<vmem>>, vector<1x32xf32>
    %55 = vector.broadcast %54 : vector<1x32xf32> to vector<8x32xf32>
    %56 = arith.addf %53, %55 : vector<8x32xf32>
    %57 = arith.truncf %56 : vector<8x32xf32> to vector<8x32xbf16>
    %c0_32 = arith.constant 0 : index
    %c0_33 = arith.constant 0 : index
    %58 = vector.load %arg12[%c0_32, %c0_33] : memref<8x32xbf16, #tpu.memory_space<vmem>>, vector<8x32xbf16>
    tpu.vector_store %arg12[%c0_32, %c0_33], %57 {strides = array<i32>} : memref<8x32xbf16, #tpu.memory_space<vmem>>, vector<8x32xbf16>,
    return
  }
  func.func @transform_0(%arg0: i32) -> (i32, i32) {
    %c0_i32 = arith.constant 0 : i32
    %c0_i32_0 = arith.constant 0 : i32
    return %arg0, %c0_i32 : i32, i32
  }
  func.func @transform_1(%arg0: i32) -> (i32, i32) {
    %c0_i32 = arith.constant 0 : i32
    %c0_i32_0 = arith.constant 0 : i32
    return %arg0, %c0_i32 : i32, i32
  }
  func.func @transform_2(%arg0: i32) -> (i32, i32) {
    %c0_i32 = arith.constant 0 : i32
    %c0_i32_0 = arith.constant 0 : i32
    return %arg0, %c0_i32 : i32, i32
  }
  func.func @transform_3(%arg0: i32) -> (i32, i32) {
    %c0_i32 = arith.constant 0 : i32
    %c0_i32_0 = arith.constant 0 : i32
    return %arg0, %c0_i32 : i32, i32
  }
  func.func @transform_4(%arg0: i32) -> (i32, i32) {
    %c0_i32 = arith.constant 0 : i32
    %c0_i32_0 = arith.constant 0 : i32
    return %arg0, %c0_i32 : i32, i32
  }
  func.func @transform_5(%arg0: i32) -> (i32, i32) {
    %c0_i32 = arith.constant 0 : i32
    %c0_i32_0 = arith.constant 0 : i32
    %c0_i32_1 = arith.constant 0 : i32
    return %c0_i32, %c0_i32_0 : i32, i32
  }
  func.func @transform_6(%arg0: i32) -> (i32, i32) {
    %c0_i32 = arith.constant 0 : i32
    %c0_i32_0 = arith.constant 0 : i32
    %c0_i32_1 = arith.constant 0 : i32
    return %c0_i32, %c0_i32_0 : i32, i32
  }
  func.func @transform_7(%arg0: i32) -> (i32, i32) {
    %c0_i32 = arith.constant 0 : i32
    %c0_i32_0 = arith.constant 0 : i32
    %c0_i32_1 = arith.constant 0 : i32
    return %c0_i32, %c0_i32_0 : i32, i32
  }
  func.func @transform_8(%arg0: i32) -> (i32, i32) {
    %c0_i32 = arith.constant 0 : i32
    %c0_i32_0 = arith.constant 0 : i32
    %c0_i32_1 = arith.constant 0 : i32
    return %c0_i32, %c0_i32_0 : i32, i32
  }
  func.func @transform_9(%arg0: i32) -> (i32, i32) {
    %c0_i32 = arith.constant 0 : i32
    %c0_i32_0 = arith.constant 0 : i32
    %c0_i32_1 = arith.constant 0 : i32
    return %c0_i32, %c0_i32_0 : i32, i32
  }
  func.func @transform_10(%arg0: i32) -> (i32, i32) {
    %c0_i32 = arith.constant 0 : i32
    %c0_i32_0 = arith.constant 0 : i32
    %c0_i32_1 = arith.constant 0 : i32
    return %c0_i32, %c0_i32_0 : i32, i32
  }
  func.func @transform_11(%arg0: i32) -> (i32, i32) {
    %c0_i32 = arith.constant 0 : i32
    %c0_i32_0 = arith.constant 0 : i32
    return %arg0, %c0_i32 : i32, i32
  }
}

module attributes {stable_mosaic.version = 11 : i64} {
  func.func @kernel(%arg0: i32, %arg1: memref<16x32xbf16, #tpu.memory_space<vmem>>, %arg2: memref<16x32xbf16, #tpu.memory_space<vmem>>, %arg3: memref<64x64xbf16, #tpu.memory_space<vmem>>, %arg4: memref<1x64xf32, #tpu.memory_space<vmem>>, %arg5: memref<64x128xbf16, #tpu.memory_space<vmem>>, %arg6: memref<1x128xf32, #tpu.memory_space<vmem>>, %arg7: memref<1x64xf32, #tpu.memory_space<vmem>>, %arg8: memref<1x1xf32, #tpu.memory_space<vmem>>, %arg9: memref<16x128xf32, #tpu.memory_space<vmem>>) attributes {dimension_semantics = [#tpu.dimension_semantics<parallel>], iteration_bounds = array<i64: 2>, scalar_prefetch = 0 : i64, scratch_operands = 0 : i64, tpu.core_type = #tpu.core_type<tc>, window_params = [{transform_indices = @transform_0, window_bounds = array<i64: 16, 32>}, {transform_indices = @transform_1, window_bounds = array<i64: 16, 32>}, {pipeline_mode = #tpu.pipeline_mode<synchronous>, transform_indices = @transform_2, window_bounds = array<i64: 64, 64>}, {pipeline_mode = #tpu.pipeline_mode<synchronous>, transform_indices = @transform_3, window_bounds = array<i64: 1, 64>}, {pipeline_mode = #tpu.pipeline_mode<synchronous>, transform_indices = @transform_4, window_bounds = array<i64: 64, 128>}, {pipeline_mode = #tpu.pipeline_mode<synchronous>, transform_indices = @transform_5, window_bounds = array<i64: 1, 128>}, {pipeline_mode = #tpu.pipeline_mode<synchronous>, transform_indices = @transform_6, window_bounds = array<i64: 1, 64>}, {pipeline_mode = #tpu.pipeline_mode<synchronous>, transform_indices = @transform_7, window_bounds = array<i64: 1, 1>}, {transform_indices = @transform_8, window_bounds = array<i64: 16, 128>}]} {
    %c0 = arith.constant 0 : index
    %c0_0 = arith.constant 0 : index
    %0 = vector.load %arg3[%c0, %c0_0] : memref<64x64xbf16, #tpu.memory_space<vmem>>, vector<64x64xbf16>
    %c0_1 = arith.constant 0 : index
    %c0_2 = arith.constant 0 : index
    %1 = vector.load %arg1[%c0_1, %c0_2] : memref<16x32xbf16, #tpu.memory_space<vmem>>, vector<16x32xbf16>
    %2 = vector.extract_strided_slice %0 {offsets = [0, 0], sizes = [32, 64], strides = [1, 1]} : vector<64x64xbf16> to vector<32x64xbf16>
    %cst = arith.constant dense<0.000000e+00> : vector<16x64xf32>
    %3 = tpu.matmul %1, %2, %cst {dimension_numbers = #tpu.dot_dimension_numbers<[1], [0], [0], [1], [0, 0, 1, 1], [], []>} : vector<16x32xbf16>, vector<32x64xbf16>, vector<16x64xf32> -> vector<16x64xf32>
    %c0_3 = arith.constant 0 : index
    %c0_4 = arith.constant 0 : index
    %4 = vector.load %arg2[%c0_3, %c0_4] : memref<16x32xbf16, #tpu.memory_space<vmem>>, vector<16x32xbf16>
    %5 = vector.extract_strided_slice %0 {offsets = [32, 0], sizes = [32, 64], strides = [1, 1]} : vector<64x64xbf16> to vector<32x64xbf16>
    %cst_5 = arith.constant dense<0.000000e+00> : vector<16x64xf32>
    %6 = tpu.matmul %4, %5, %cst_5 {dimension_numbers = #tpu.dot_dimension_numbers<[1], [0], [0], [1], [0, 0, 1, 1], [], []>} : vector<16x32xbf16>, vector<32x64xbf16>, vector<16x64xf32> -> vector<16x64xf32>
    %7 = arith.addf %3, %6 : vector<16x64xf32>
    %c0_6 = arith.constant 0 : index
    %c0_7 = arith.constant 0 : index
    %8 = vector.load %arg4[%c0_6, %c0_7] : memref<1x64xf32, #tpu.memory_space<vmem>>, vector<1x64xf32>
    %9 = vector.broadcast %8 : vector<1x64xf32> to vector<16x64xf32>
    %10 = arith.addf %7, %9 : vector<16x64xf32>
    %cst_8 = arith.constant 0.000000e+00 : f32
    %11 = vector.broadcast %cst_8 : f32 to vector<16x64xf32>
    %12 = arith.maximumf %10, %11 : vector<16x64xf32>
    %13 = arith.truncf %12 : vector<16x64xf32> to vector<16x64xbf16>
    %c0_9 = arith.constant 0 : index
    %c0_10 = arith.constant 0 : index
    %14 = vector.load %arg5[%c0_9, %c0_10] : memref<64x128xbf16, #tpu.memory_space<vmem>>, vector<64x128xbf16>
    %cst_11 = arith.constant dense<0.000000e+00> : vector<16x128xf32>
    %15 = tpu.matmul %13, %14, %cst_11 {dimension_numbers = #tpu.dot_dimension_numbers<[1], [0], [0], [1], [0, 0, 1, 1], [], []>} : vector<16x64xbf16>, vector<64x128xbf16>, vector<16x128xf32> -> vector<16x128xf32>
    %c0_12 = arith.constant 0 : index
    %c0_13 = arith.constant 0 : index
    %16 = vector.load %arg6[%c0_12, %c0_13] : memref<1x128xf32, #tpu.memory_space<vmem>>, vector<1x128xf32>
    %17 = vector.broadcast %16 : vector<1x128xf32> to vector<16x128xf32>
    %18 = arith.addf %15, %17 : vector<16x128xf32>
    %c0_14 = arith.constant 0 : index
    %c0_15 = arith.constant 0 : index
    %19 = vector.load %arg7[%c0_14, %c0_15] : memref<1x64xf32, #tpu.memory_space<vmem>>, vector<1x64xf32>
    %20 = vector.broadcast %19 : vector<1x64xf32> to vector<16x64xf32>
    %21 = arith.mulf %12, %20 : vector<16x64xf32>
    %cst_16 = arith.constant dense<0.000000e+00> : vector<16xf32>
    %22 = vector.multi_reduction <add>, %21, %cst_16 [1] : vector<16x64xf32> to vector<16xf32>
    %23 = vector.shape_cast %22 : vector<16xf32> to vector<16x1xf32>
    %c0_17 = arith.constant 0 : index
    %c0_18 = arith.constant 0 : index
    %24 = vector.load %arg8[%c0_17, %c0_18] : memref<1x1xf32, #tpu.memory_space<vmem>>, vector<1x1xf32>
    %25 = vector.broadcast %24 : vector<1x1xf32> to vector<16x1xf32>
    %26 = arith.addf %23, %25 : vector<16x1xf32>
    %27 = arith.negf %26 : vector<16x1xf32>
    %28 = math.exp %27 : vector<16x1xf32>
    %cst_19 = arith.constant 1.000000e+00 : f32
    %29 = vector.broadcast %cst_19 : f32 to vector<16x1xf32>
    %30 = arith.addf %29, %28 : vector<16x1xf32>
    %31 = arith.divf %29, %30 : vector<16x1xf32>
    %32 = vector.broadcast %31 : vector<16x1xf32> to vector<16x128xf32>
    %33 = arith.mulf %18, %32 : vector<16x128xf32>
    %c0_20 = arith.constant 0 : index
    %c0_21 = arith.constant 0 : index
    %34 = vector.load %arg9[%c0_20, %c0_21] : memref<16x128xf32, #tpu.memory_space<vmem>>, vector<16x128xf32>
    tpu.vector_store %arg9[%c0_20, %c0_21], %33 {strides = array<i32>} : memref<16x128xf32, #tpu.memory_space<vmem>>, vector<16x128xf32>,
    return
  }
  func.func @transform_0(%arg0: i32) -> (i32, i32) {
    %c0_i32 = arith.constant 0 : i32
    %c0_i32_0 = arith.constant 0 : i32
    return %arg0, %c0_i32 : i32, i32
  }
  func.func @transform_1(%arg0: i32) -> (i32, i32) {
    %c0_i32 = arith.constant 0 : i32
    %c0_i32_0 = arith.constant 0 : i32
    return %arg0, %c0_i32 : i32, i32
  }
  func.func @transform_2(%arg0: i32) -> (i32, i32) {
    %c0_i32 = arith.constant 0 : i32
    %c0_i32_0 = arith.constant 0 : i32
    %c0_i32_1 = arith.constant 0 : i32
    return %c0_i32, %c0_i32_0 : i32, i32
  }
  func.func @transform_3(%arg0: i32) -> (i32, i32) {
    %c0_i32 = arith.constant 0 : i32
    %c0_i32_0 = arith.constant 0 : i32
    %c0_i32_1 = arith.constant 0 : i32
    return %c0_i32, %c0_i32_0 : i32, i32
  }
  func.func @transform_4(%arg0: i32) -> (i32, i32) {
    %c0_i32 = arith.constant 0 : i32
    %c0_i32_0 = arith.constant 0 : i32
    %c0_i32_1 = arith.constant 0 : i32
    return %c0_i32, %c0_i32_0 : i32, i32
  }
  func.func @transform_5(%arg0: i32) -> (i32, i32) {
    %c0_i32 = arith.constant 0 : i32
    %c0_i32_0 = arith.constant 0 : i32
    %c0_i32_1 = arith.constant 0 : i32
    return %c0_i32, %c0_i32_0 : i32, i32
  }
  func.func @transform_6(%arg0: i32) -> (i32, i32) {
    %c0_i32 = arith.constant 0 : i32
    %c0_i32_0 = arith.constant 0 : i32
    %c0_i32_1 = arith.constant 0 : i32
    return %c0_i32, %c0_i32_0 : i32, i32
  }
  func.func @transform_7(%arg0: i32) -> (i32, i32) {
    %c0_i32 = arith.constant 0 : i32
    %c0_i32_0 = arith.constant 0 : i32
    %c0_i32_1 = arith.constant 0 : i32
    return %c0_i32, %c0_i32_0 : i32, i32
  }
  func.func @transform_8(%arg0: i32) -> (i32, i32) {
    %c0_i32 = arith.constant 0 : i32
    %c0_i32_0 = arith.constant 0 : i32
    return %arg0, %c0_i32 : i32, i32
  }
}

module attributes {stable_mosaic.version = 11 : i64} {
  func.func @kernel(%arg0: i32, %arg1: memref<16x32xbf16, #tpu.memory_space<vmem>>, %arg2: memref<16x32xbf16, #tpu.memory_space<vmem>>, %arg3: memref<16x32xbf16, #tpu.memory_space<vmem>>, %arg4: memref<96x64xbf16, #tpu.memory_space<vmem>>, %arg5: memref<1x64xf32, #tpu.memory_space<vmem>>, %arg6: memref<64x128xbf16, #tpu.memory_space<vmem>>, %arg7: memref<1x128xf32, #tpu.memory_space<vmem>>, %arg8: memref<1x64xf32, #tpu.memory_space<vmem>>, %arg9: memref<1x1xf32, #tpu.memory_space<vmem>>, %arg10: memref<16x128xf32, #tpu.memory_space<vmem>>) attributes {dimension_semantics = [#tpu.dimension_semantics<parallel>], iteration_bounds = array<i64: 2>, scalar_prefetch = 0 : i64, scratch_operands = 0 : i64, tpu.core_type = #tpu.core_type<tc>, window_params = [{transform_indices = @transform_0, window_bounds = array<i64: 16, 32>}, {transform_indices = @transform_1, window_bounds = array<i64: 16, 32>}, {transform_indices = @transform_2, window_bounds = array<i64: 16, 32>}, {pipeline_mode = #tpu.pipeline_mode<synchronous>, transform_indices = @transform_3, window_bounds = array<i64: 96, 64>}, {pipeline_mode = #tpu.pipeline_mode<synchronous>, transform_indices = @transform_4, window_bounds = array<i64: 1, 64>}, {pipeline_mode = #tpu.pipeline_mode<synchronous>, transform_indices = @transform_5, window_bounds = array<i64: 64, 128>}, {pipeline_mode = #tpu.pipeline_mode<synchronous>, transform_indices = @transform_6, window_bounds = array<i64: 1, 128>}, {pipeline_mode = #tpu.pipeline_mode<synchronous>, transform_indices = @transform_7, window_bounds = array<i64: 1, 64>}, {pipeline_mode = #tpu.pipeline_mode<synchronous>, transform_indices = @transform_8, window_bounds = array<i64: 1, 1>}, {transform_indices = @transform_9, window_bounds = array<i64: 16, 128>}]} {
    %c0 = arith.constant 0 : index
    %c0_0 = arith.constant 0 : index
    %0 = vector.load %arg4[%c0, %c0_0] : memref<96x64xbf16, #tpu.memory_space<vmem>>, vector<96x64xbf16>
    %c0_1 = arith.constant 0 : index
    %c0_2 = arith.constant 0 : index
    %1 = vector.load %arg1[%c0_1, %c0_2] : memref<16x32xbf16, #tpu.memory_space<vmem>>, vector<16x32xbf16>
    %2 = vector.extract_strided_slice %0 {offsets = [0, 0], sizes = [32, 64], strides = [1, 1]} : vector<96x64xbf16> to vector<32x64xbf16>
    %cst = arith.constant dense<0.000000e+00> : vector<16x64xf32>
    %3 = tpu.matmul %1, %2, %cst {dimension_numbers = #tpu.dot_dimension_numbers<[1], [0], [0], [1], [0, 0, 1, 1], [], []>} : vector<16x32xbf16>, vector<32x64xbf16>, vector<16x64xf32> -> vector<16x64xf32>
    %c0_3 = arith.constant 0 : index
    %c0_4 = arith.constant 0 : index
    %4 = vector.load %arg2[%c0_3, %c0_4] : memref<16x32xbf16, #tpu.memory_space<vmem>>, vector<16x32xbf16>
    %5 = vector.extract_strided_slice %0 {offsets = [32, 0], sizes = [32, 64], strides = [1, 1]} : vector<96x64xbf16> to vector<32x64xbf16>
    %cst_5 = arith.constant dense<0.000000e+00> : vector<16x64xf32>
    %6 = tpu.matmul %4, %5, %cst_5 {dimension_numbers = #tpu.dot_dimension_numbers<[1], [0], [0], [1], [0, 0, 1, 1], [], []>} : vector<16x32xbf16>, vector<32x64xbf16>, vector<16x64xf32> -> vector<16x64xf32>
    %7 = arith.addf %3, %6 : vector<16x64xf32>
    %c0_6 = arith.constant 0 : index
    %c0_7 = arith.constant 0 : index
    %8 = vector.load %arg3[%c0_6, %c0_7] : memref<16x32xbf16, #tpu.memory_space<vmem>>, vector<16x32xbf16>
    %9 = vector.extract_strided_slice %0 {offsets = [64, 0], sizes = [32, 64], strides = [1, 1]} : vector<96x64xbf16> to vector<32x64xbf16>
    %cst_8 = arith.constant dense<0.000000e+00> : vector<16x64xf32>
    %10 = tpu.matmul %8, %9, %cst_8 {dimension_numbers = #tpu.dot_dimension_numbers<[1], [0], [0], [1], [0, 0, 1, 1], [], []>} : vector<16x32xbf16>, vector<32x64xbf16>, vector<16x64xf32> -> vector<16x64xf32>
    %11 = arith.addf %7, %10 : vector<16x64xf32>
    %c0_9 = arith.constant 0 : index
    %c0_10 = arith.constant 0 : index
    %12 = vector.load %arg5[%c0_9, %c0_10] : memref<1x64xf32, #tpu.memory_space<vmem>>, vector<1x64xf32>
    %13 = vector.broadcast %12 : vector<1x64xf32> to vector<16x64xf32>
    %14 = arith.addf %11, %13 : vector<16x64xf32>
    %cst_11 = arith.constant 0.000000e+00 : f32
    %15 = vector.broadcast %cst_11 : f32 to vector<16x64xf32>
    %16 = arith.maximumf %14, %15 : vector<16x64xf32>
    %17 = arith.truncf %16 : vector<16x64xf32> to vector<16x64xbf16>
    %c0_12 = arith.constant 0 : index
    %c0_13 = arith.constant 0 : index
    %18 = vector.load %arg6[%c0_12, %c0_13] : memref<64x128xbf16, #tpu.memory_space<vmem>>, vector<64x128xbf16>
    %cst_14 = arith.constant dense<0.000000e+00> : vector<16x128xf32>
    %19 = tpu.matmul %17, %18, %cst_14 {dimension_numbers = #tpu.dot_dimension_numbers<[1], [0], [0], [1], [0, 0, 1, 1], [], []>} : vector<16x64xbf16>, vector<64x128xbf16>, vector<16x128xf32> -> vector<16x128xf32>
    %c0_15 = arith.constant 0 : index
    %c0_16 = arith.constant 0 : index
    %20 = vector.load %arg7[%c0_15, %c0_16] : memref<1x128xf32, #tpu.memory_space<vmem>>, vector<1x128xf32>
    %21 = vector.broadcast %20 : vector<1x128xf32> to vector<16x128xf32>
    %22 = arith.addf %19, %21 : vector<16x128xf32>
    %c0_17 = arith.constant 0 : index
    %c0_18 = arith.constant 0 : index
    %23 = vector.load %arg8[%c0_17, %c0_18] : memref<1x64xf32, #tpu.memory_space<vmem>>, vector<1x64xf32>
    %24 = vector.broadcast %23 : vector<1x64xf32> to vector<16x64xf32>
    %25 = arith.mulf %16, %24 : vector<16x64xf32>
    %cst_19 = arith.constant dense<0.000000e+00> : vector<16xf32>
    %26 = vector.multi_reduction <add>, %25, %cst_19 [1] : vector<16x64xf32> to vector<16xf32>
    %27 = vector.shape_cast %26 : vector<16xf32> to vector<16x1xf32>
    %c0_20 = arith.constant 0 : index
    %c0_21 = arith.constant 0 : index
    %28 = vector.load %arg9[%c0_20, %c0_21] : memref<1x1xf32, #tpu.memory_space<vmem>>, vector<1x1xf32>
    %29 = vector.broadcast %28 : vector<1x1xf32> to vector<16x1xf32>
    %30 = arith.addf %27, %29 : vector<16x1xf32>
    %31 = arith.negf %30 : vector<16x1xf32>
    %32 = math.exp %31 : vector<16x1xf32>
    %cst_22 = arith.constant 1.000000e+00 : f32
    %33 = vector.broadcast %cst_22 : f32 to vector<16x1xf32>
    %34 = arith.addf %33, %32 : vector<16x1xf32>
    %35 = arith.divf %33, %34 : vector<16x1xf32>
    %36 = vector.broadcast %35 : vector<16x1xf32> to vector<16x128xf32>
    %37 = arith.mulf %22, %36 : vector<16x128xf32>
    %c0_23 = arith.constant 0 : index
    %c0_24 = arith.constant 0 : index
    %38 = vector.load %arg10[%c0_23, %c0_24] : memref<16x128xf32, #tpu.memory_space<vmem>>, vector<16x128xf32>
    tpu.vector_store %arg10[%c0_23, %c0_24], %37 {strides = array<i32>} : memref<16x128xf32, #tpu.memory_space<vmem>>, vector<16x128xf32>,
    return
  }
  func.func @transform_0(%arg0: i32) -> (i32, i32) {
    %c0_i32 = arith.constant 0 : i32
    %c0_i32_0 = arith.constant 0 : i32
    return %arg0, %c0_i32 : i32, i32
  }
  func.func @transform_1(%arg0: i32) -> (i32, i32) {
    %c0_i32 = arith.constant 0 : i32
    %c0_i32_0 = arith.constant 0 : i32
    return %arg0, %c0_i32 : i32, i32
  }
  func.func @transform_2(%arg0: i32) -> (i32, i32) {
    %c0_i32 = arith.constant 0 : i32
    %c0_i32_0 = arith.constant 0 : i32
    return %arg0, %c0_i32 : i32, i32
  }
  func.func @transform_3(%arg0: i32) -> (i32, i32) {
    %c0_i32 = arith.constant 0 : i32
    %c0_i32_0 = arith.constant 0 : i32
    %c0_i32_1 = arith.constant 0 : i32
    return %c0_i32, %c0_i32_0 : i32, i32
  }
  func.func @transform_4(%arg0: i32) -> (i32, i32) {
    %c0_i32 = arith.constant 0 : i32
    %c0_i32_0 = arith.constant 0 : i32
    %c0_i32_1 = arith.constant 0 : i32
    return %c0_i32, %c0_i32_0 : i32, i32
  }
  func.func @transform_5(%arg0: i32) -> (i32, i32) {
    %c0_i32 = arith.constant 0 : i32
    %c0_i32_0 = arith.constant 0 : i32
    %c0_i32_1 = arith.constant 0 : i32
    return %c0_i32, %c0_i32_0 : i32, i32
  }
  func.func @transform_6(%arg0: i32) -> (i32, i32) {
    %c0_i32 = arith.constant 0 : i32
    %c0_i32_0 = arith.constant 0 : i32
    %c0_i32_1 = arith.constant 0 : i32
    return %c0_i32, %c0_i32_0 : i32, i32
  }
  func.func @transform_7(%arg0: i32) -> (i32, i32) {
    %c0_i32 = arith.constant 0 : i32
    %c0_i32_0 = arith.constant 0 : i32
    %c0_i32_1 = arith.constant 0 : i32
    return %c0_i32, %c0_i32_0 : i32, i32
  }
  func.func @transform_8(%arg0: i32) -> (i32, i32) {
    %c0_i32 = arith.constant 0 : i32
    %c0_i32_0 = arith.constant 0 : i32
    %c0_i32_1 = arith.constant 0 : i32
    return %c0_i32, %c0_i32_0 : i32, i32
  }
  func.func @transform_9(%arg0: i32) -> (i32, i32) {
    %c0_i32 = arith.constant 0 : i32
    %c0_i32_0 = arith.constant 0 : i32
    return %arg0, %c0_i32 : i32, i32
  }
}

module attributes {stable_mosaic.version = 11 : i64} {
  func.func @kernel(%arg0: i32, %arg1: memref<8x32xbf16, #tpu.memory_space<vmem>>, %arg2: memref<8x32xbf16, #tpu.memory_space<vmem>>, %arg3: memref<64x32xbf16, #tpu.memory_space<vmem>>, %arg4: memref<1x32xf32, #tpu.memory_space<vmem>>, %arg5: memref<8x32xbf16, #tpu.memory_space<vmem>>) attributes {dimension_semantics = [#tpu.dimension_semantics<parallel>], iteration_bounds = array<i64: 2>, scalar_prefetch = 0 : i64, scratch_operands = 0 : i64, tpu.core_type = #tpu.core_type<tc>, window_params = [{transform_indices = @transform_0, window_bounds = array<i64: 8, 32>}, {transform_indices = @transform_1, window_bounds = array<i64: 8, 32>}, {pipeline_mode = #tpu.pipeline_mode<synchronous>, transform_indices = @transform_2, window_bounds = array<i64: 64, 32>}, {pipeline_mode = #tpu.pipeline_mode<synchronous>, transform_indices = @transform_3, window_bounds = array<i64: 1, 32>}, {transform_indices = @transform_4, window_bounds = array<i64: 8, 32>}]} {
    %c0 = arith.constant 0 : index
    %c0_0 = arith.constant 0 : index
    %0 = vector.load %arg3[%c0, %c0_0] : memref<64x32xbf16, #tpu.memory_space<vmem>>, vector<64x32xbf16>
    %c0_1 = arith.constant 0 : index
    %c0_2 = arith.constant 0 : index
    %1 = vector.load %arg1[%c0_1, %c0_2] : memref<8x32xbf16, #tpu.memory_space<vmem>>, vector<8x32xbf16>
    %2 = vector.extract_strided_slice %0 {offsets = [0, 0], sizes = [32, 32], strides = [1, 1]} : vector<64x32xbf16> to vector<32x32xbf16>
    %cst = arith.constant dense<0.000000e+00> : vector<8x32xf32>
    %3 = tpu.matmul %1, %2, %cst {dimension_numbers = #tpu.dot_dimension_numbers<[1], [0], [0], [1], [0, 0, 1, 1], [], []>} : vector<8x32xbf16>, vector<32x32xbf16>, vector<8x32xf32> -> vector<8x32xf32>
    %c0_3 = arith.constant 0 : index
    %c0_4 = arith.constant 0 : index
    %4 = vector.load %arg2[%c0_3, %c0_4] : memref<8x32xbf16, #tpu.memory_space<vmem>>, vector<8x32xbf16>
    %5 = vector.extract_strided_slice %0 {offsets = [32, 0], sizes = [32, 32], strides = [1, 1]} : vector<64x32xbf16> to vector<32x32xbf16>
    %cst_5 = arith.constant dense<0.000000e+00> : vector<8x32xf32>
    %6 = tpu.matmul %4, %5, %cst_5 {dimension_numbers = #tpu.dot_dimension_numbers<[1], [0], [0], [1], [0, 0, 1, 1], [], []>} : vector<8x32xbf16>, vector<32x32xbf16>, vector<8x32xf32> -> vector<8x32xf32>
    %7 = arith.addf %3, %6 : vector<8x32xf32>
    %c0_6 = arith.constant 0 : index
    %c0_7 = arith.constant 0 : index
    %8 = vector.load %arg4[%c0_6, %c0_7] : memref<1x32xf32, #tpu.memory_space<vmem>>, vector<1x32xf32>
    %9 = vector.broadcast %8 : vector<1x32xf32> to vector<8x32xf32>
    %10 = arith.addf %7, %9 : vector<8x32xf32>
    %11 = arith.truncf %10 : vector<8x32xf32> to vector<8x32xbf16>
    %c0_8 = arith.constant 0 : index
    %c0_9 = arith.constant 0 : index
    %12 = vector.load %arg5[%c0_8, %c0_9] : memref<8x32xbf16, #tpu.memory_space<vmem>>, vector<8x32xbf16>
    tpu.vector_store %arg5[%c0_8, %c0_9], %11 {strides = array<i32>} : memref<8x32xbf16, #tpu.memory_space<vmem>>, vector<8x32xbf16>,
    return
  }
  func.func @transform_0(%arg0: i32) -> (i32, i32) {
    %c0_i32 = arith.constant 0 : i32
    %c0_i32_0 = arith.constant 0 : i32
    return %arg0, %c0_i32 : i32, i32
  }
  func.func @transform_1(%arg0: i32) -> (i32, i32) {
    %c0_i32 = arith.constant 0 : i32
    %c0_i32_0 = arith.constant 0 : i32
    return %arg0, %c0_i32 : i32, i32
  }
  func.func @transform_2(%arg0: i32) -> (i32, i32) {
    %c0_i32 = arith.constant 0 : i32
    %c0_i32_0 = arith.constant 0 : i32
    %c0_i32_1 = arith.constant 0 : i32
    return %c0_i32, %c0_i32_0 : i32, i32
  }
  func.func @transform_3(%arg0: i32) -> (i32, i32) {
    %c0_i32 = arith.constant 0 : i32
    %c0_i32_0 = arith.constant 0 : i32
    %c0_i32_1 = arith.constant 0 : i32
    return %c0_i32, %c0_i32_0 : i32, i32
  }
  func.func @transform_4(%arg0: i32) -> (i32, i32) {
    %c0_i32 = arith.constant 0 : i32
    %c0_i32_0 = arith.constant 0 : i32
    return %arg0, %c0_i32 : i32, i32
  }
}

module attributes {stable_mosaic.version = 11 : i64} {
  func.func @kernel(%arg0: i32, %arg1: memref<8x32xbf16, #tpu.memory_space<vmem>>, %arg2: memref<8x32xbf16, #tpu.memory_space<vmem>>, %arg3: memref<64x32xbf16, #tpu.memory_space<vmem>>, %arg4: memref<1x32xf32, #tpu.memory_space<vmem>>, %arg5: memref<8x32xbf16, #tpu.memory_space<vmem>>) attributes {dimension_semantics = [#tpu.dimension_semantics<parallel>], iteration_bounds = array<i64: 2>, scalar_prefetch = 0 : i64, scratch_operands = 0 : i64, tpu.core_type = #tpu.core_type<tc>, window_params = [{transform_indices = @transform_0, window_bounds = array<i64: 8, 32>}, {transform_indices = @transform_1, window_bounds = array<i64: 8, 32>}, {pipeline_mode = #tpu.pipeline_mode<synchronous>, transform_indices = @transform_2, window_bounds = array<i64: 64, 32>}, {pipeline_mode = #tpu.pipeline_mode<synchronous>, transform_indices = @transform_3, window_bounds = array<i64: 1, 32>}, {transform_indices = @transform_4, window_bounds = array<i64: 8, 32>}]} {
    %c0 = arith.constant 0 : index
    %c0_0 = arith.constant 0 : index
    %0 = vector.load %arg3[%c0, %c0_0] : memref<64x32xbf16, #tpu.memory_space<vmem>>, vector<64x32xbf16>
    %c0_1 = arith.constant 0 : index
    %c0_2 = arith.constant 0 : index
    %1 = vector.load %arg1[%c0_1, %c0_2] : memref<8x32xbf16, #tpu.memory_space<vmem>>, vector<8x32xbf16>
    %2 = vector.extract_strided_slice %0 {offsets = [0, 0], sizes = [32, 32], strides = [1, 1]} : vector<64x32xbf16> to vector<32x32xbf16>
    %cst = arith.constant dense<0.000000e+00> : vector<8x32xf32>
    %3 = tpu.matmul %1, %2, %cst {dimension_numbers = #tpu.dot_dimension_numbers<[1], [0], [0], [1], [0, 0, 1, 1], [], []>} : vector<8x32xbf16>, vector<32x32xbf16>, vector<8x32xf32> -> vector<8x32xf32>
    %c0_3 = arith.constant 0 : index
    %c0_4 = arith.constant 0 : index
    %4 = vector.load %arg2[%c0_3, %c0_4] : memref<8x32xbf16, #tpu.memory_space<vmem>>, vector<8x32xbf16>
    %5 = vector.extract_strided_slice %0 {offsets = [32, 0], sizes = [32, 32], strides = [1, 1]} : vector<64x32xbf16> to vector<32x32xbf16>
    %cst_5 = arith.constant dense<0.000000e+00> : vector<8x32xf32>
    %6 = tpu.matmul %4, %5, %cst_5 {dimension_numbers = #tpu.dot_dimension_numbers<[1], [0], [0], [1], [0, 0, 1, 1], [], []>} : vector<8x32xbf16>, vector<32x32xbf16>, vector<8x32xf32> -> vector<8x32xf32>
    %7 = arith.addf %3, %6 : vector<8x32xf32>
    %c0_6 = arith.constant 0 : index
    %c0_7 = arith.constant 0 : index
    %8 = vector.load %arg4[%c0_6, %c0_7] : memref<1x32xf32, #tpu.memory_space<vmem>>, vector<1x32xf32>
    %9 = vector.broadcast %8 : vector<1x32xf32> to vector<8x32xf32>
    %10 = arith.addf %7, %9 : vector<8x32xf32>
    %11 = arith.truncf %10 : vector<8x32xf32> to vector<8x32xbf16>
    %c0_8 = arith.constant 0 : index
    %c0_9 = arith.constant 0 : index
    %12 = vector.load %arg5[%c0_8, %c0_9] : memref<8x32xbf16, #tpu.memory_space<vmem>>, vector<8x32xbf16>
    tpu.vector_store %arg5[%c0_8, %c0_9], %11 {strides = array<i32>} : memref<8x32xbf16, #tpu.memory_space<vmem>>, vector<8x32xbf16>,
    return
  }
  func.func @transform_0(%arg0: i32) -> (i32, i32) {
    %c0_i32 = arith.constant 0 : i32
    %c0_i32_0 = arith.constant 0 : i32
    return %arg0, %c0_i32 : i32, i32
  }
  func.func @transform_1(%arg0: i32) -> (i32, i32) {
    %c0_i32 = arith.constant 0 : i32
    %c0_i32_0 = arith.constant 0 : i32
    return %arg0, %c0_i32 : i32, i32
  }
  func.func @transform_2(%arg0: i32) -> (i32, i32) {
    %c0_i32 = arith.constant 0 : i32
    %c0_i32_0 = arith.constant 0 : i32
    %c0_i32_1 = arith.constant 0 : i32
    return %c0_i32, %c0_i32_0 : i32, i32
  }
  func.func @transform_3(%arg0: i32) -> (i32, i32) {
    %c0_i32 = arith.constant 0 : i32
    %c0_i32_0 = arith.constant 0 : i32
    %c0_i32_1 = arith.constant 0 : i32
    return %c0_i32, %c0_i32_0 : i32, i32
  }
  func.func @transform_4(%arg0: i32) -> (i32, i32) {
    %c0_i32 = arith.constant 0 : i32
    %c0_i32_0 = arith.constant 0 : i32
    return %arg0, %c0_i32 : i32, i32
  }
}

module attributes {stable_mosaic.version = 11 : i64} {
  func.func @kernel(%arg0: i32, %arg1: memref<8x32xbf16, #tpu.memory_space<vmem>>, %arg2: memref<8x64xf32, #tpu.memory_space<vmem>>, %arg3: memref<8x32xf32, #tpu.memory_space<vmem>>, %arg4: memref<8x32xf32, #tpu.memory_space<vmem>>, %arg5: memref<8x1xf32, #tpu.memory_space<vmem>>, %arg6: memref<8x64xf32, #tpu.memory_space<vmem>>, %arg7: memref<8x32xf32, #tpu.memory_space<vmem>>, %arg8: memref<8x32xf32, #tpu.memory_space<vmem>>, %arg9: memref<8x1xf32, #tpu.memory_space<vmem>>, %arg10: memref<160x32xbf16, #tpu.memory_space<vmem>>, %arg11: memref<1x32xf32, #tpu.memory_space<vmem>>, %arg12: memref<160x32xbf16, #tpu.memory_space<vmem>>, %arg13: memref<1x32xf32, #tpu.memory_space<vmem>>, %arg14: memref<32x32xbf16, #tpu.memory_space<vmem>>, %arg15: memref<1x32xf32, #tpu.memory_space<vmem>>, %arg16: memref<8x32xbf16, #tpu.memory_space<vmem>>) attributes {dimension_semantics = [#tpu.dimension_semantics<parallel>], iteration_bounds = array<i64: 2>, scalar_prefetch = 0 : i64, scratch_operands = 0 : i64, tpu.core_type = #tpu.core_type<tc>, window_params = [{transform_indices = @transform_0, window_bounds = array<i64: 8, 32>}, {transform_indices = @transform_1, window_bounds = array<i64: 8, 64>}, {transform_indices = @transform_2, window_bounds = array<i64: 8, 32>}, {transform_indices = @transform_3, window_bounds = array<i64: 8, 32>}, {transform_indices = @transform_4, window_bounds = array<i64: 8, 1>}, {transform_indices = @transform_5, window_bounds = array<i64: 8, 64>}, {transform_indices = @transform_6, window_bounds = array<i64: 8, 32>}, {transform_indices = @transform_7, window_bounds = array<i64: 8, 32>}, {transform_indices = @transform_8, window_bounds = array<i64: 8, 1>}, {pipeline_mode = #tpu.pipeline_mode<synchronous>, transform_indices = @transform_9, window_bounds = array<i64: 160, 32>}, {pipeline_mode = #tpu.pipeline_mode<synchronous>, transform_indices = @transform_10, window_bounds = array<i64: 1, 32>}, {pipeline_mode = #tpu.pipeline_mode<synchronous>, transform_indices = @transform_11, window_bounds = array<i64: 160, 32>}, {pipeline_mode = #tpu.pipeline_mode<synchronous>, transform_indices = @transform_12, window_bounds = array<i64: 1, 32>}, {pipeline_mode = #tpu.pipeline_mode<synchronous>, transform_indices = @transform_13, window_bounds = array<i64: 32, 32>}, {pipeline_mode = #tpu.pipeline_mode<synchronous>, transform_indices = @transform_14, window_bounds = array<i64: 1, 32>}, {transform_indices = @transform_15, window_bounds = array<i64: 8, 32>}]} {
    %c0 = arith.constant 0 : index
    %c0_0 = arith.constant 0 : index
    %0 = vector.load %arg1[%c0, %c0_0] : memref<8x32xbf16, #tpu.memory_space<vmem>>, vector<8x32xbf16>
    %c0_1 = arith.constant 0 : index
    %c0_2 = arith.constant 0 : index
    %1 = vector.load %arg2[%c0_1, %c0_2] : memref<8x64xf32, #tpu.memory_space<vmem>>, vector<8x64xf32>
    %c0_3 = arith.constant 0 : index
    %c0_4 = arith.constant 0 : index
    %2 = vector.load %arg3[%c0_3, %c0_4] : memref<8x32xf32, #tpu.memory_space<vmem>>, vector<8x32xf32>
    %c0_5 = arith.constant 0 : index
    %c0_6 = arith.constant 0 : index
    %3 = vector.load %arg4[%c0_5, %c0_6] : memref<8x32xf32, #tpu.memory_space<vmem>>, vector<8x32xf32>
    %c0_7 = arith.constant 0 : index
    %c0_8 = arith.constant 0 : index
    %4 = vector.load %arg5[%c0_7, %c0_8] : memref<8x1xf32, #tpu.memory_space<vmem>>, vector<8x1xf32>
    %c0_9 = arith.constant 0 : index
    %c0_10 = arith.constant 0 : index
    %5 = vector.load %arg10[%c0_9, %c0_10] : memref<160x32xbf16, #tpu.memory_space<vmem>>, vector<160x32xbf16>
    %c0_11 = arith.constant 0 : index
    %c0_12 = arith.constant 0 : index
    %6 = vector.load %arg11[%c0_11, %c0_12] : memref<1x32xf32, #tpu.memory_space<vmem>>, vector<1x32xf32>
    %cst = arith.constant 0.000000e+00 : f32
    %7 = vector.broadcast %cst : f32 to vector<8x1xf32>
    %8 = arith.cmpf ogt, %4, %7 : vector<8x1xf32>
    %9 = vector.extract_strided_slice %1 {offsets = [0, 0], sizes = [8, 32], strides = [1, 1]} : vector<8x64xf32> to vector<8x32xf32>
    %10 = vector.extract_strided_slice %1 {offsets = [0, 32], sizes = [8, 32], strides = [1, 1]} : vector<8x64xf32> to vector<8x32xf32>
    %cst_13 = arith.constant 0.000000e+00 : f32
    %11 = vector.shape_cast %8 : vector<8x1xi1> to vector<8x1xi1>
    %12 = vector.broadcast %11 : vector<8x1xi1> to vector<8x32xi1>
    %13 = vector.broadcast %cst_13 : f32 to vector<8x32xf32>
    %14 = arith.select %12, %2, %13 : vector<8x32xi1>, vector<8x32xf32>
    %cst_14 = arith.constant 0.000000e+00 : f32
    %15 = vector.shape_cast %8 : vector<8x1xi1> to vector<8x1xi1>
    %16 = vector.broadcast %15 : vector<8x1xi1> to vector<8x32xi1>
    %17 = vector.broadcast %cst_14 : f32 to vector<8x32xf32>
    %18 = arith.select %16, %3, %17 : vector<8x32xi1>, vector<8x32xf32>
    %cst_15 = arith.constant 1.000000e+00 : f32
    %19 = vector.broadcast %cst_15 : f32 to vector<8x1xf32>
    %20 = arith.maximumf %4, %19 : vector<8x1xf32>
    %21 = vector.broadcast %20 : vector<8x1xf32> to vector<8x32xf32>
    %22 = arith.divf %10, %21 : vector<8x32xf32>
    %23 = vector.extract_strided_slice %5 {offsets = [0, 0], sizes = [32, 32], strides = [1, 1]} : vector<160x32xbf16> to vector<32x32xbf16>
    %cst_16 = arith.constant dense<0.000000e+00> : vector<8x32xf32>
    %24 = tpu.matmul %0, %23, %cst_16 {dimension_numbers = #tpu.dot_dimension_numbers<[1], [0], [0], [1], [0, 0, 1, 1], [], []>} : vector<8x32xbf16>, vector<32x32xbf16>, vector<8x32xf32> -> vector<8x32xf32>
    %25 = arith.truncf %9 : vector<8x32xf32> to vector<8x32xbf16>
    %26 = vector.extract_strided_slice %5 {offsets = [32, 0], sizes = [32, 32], strides = [1, 1]} : vector<160x32xbf16> to vector<32x32xbf16>
    %cst_17 = arith.constant dense<0.000000e+00> : vector<8x32xf32>
    %27 = tpu.matmul %25, %26, %cst_17 {dimension_numbers = #tpu.dot_dimension_numbers<[1], [0], [0], [1], [0, 0, 1, 1], [], []>} : vector<8x32xbf16>, vector<32x32xbf16>, vector<8x32xf32> -> vector<8x32xf32>
    %28 = arith.addf %24, %27 : vector<8x32xf32>
    %29 = arith.truncf %14 : vector<8x32xf32> to vector<8x32xbf16>
    %30 = vector.extract_strided_slice %5 {offsets = [64, 0], sizes = [32, 32], strides = [1, 1]} : vector<160x32xbf16> to vector<32x32xbf16>
    %cst_18 = arith.constant dense<0.000000e+00> : vector<8x32xf32>
    %31 = tpu.matmul %29, %30, %cst_18 {dimension_numbers = #tpu.dot_dimension_numbers<[1], [0], [0], [1], [0, 0, 1, 1], [], []>} : vector<8x32xbf16>, vector<32x32xbf16>, vector<8x32xf32> -> vector<8x32xf32>
    %32 = arith.addf %28, %31 : vector<8x32xf32>
    %33 = arith.truncf %18 : vector<8x32xf32> to vector<8x32xbf16>
    %34 = vector.extract_strided_slice %5 {offsets = [96, 0], sizes = [32, 32], strides = [1, 1]} : vector<160x32xbf16> to vector<32x32xbf16>
    %cst_19 = arith.constant dense<0.000000e+00> : vector<8x32xf32>
    %35 = tpu.matmul %33, %34, %cst_19 {dimension_numbers = #tpu.dot_dimension_numbers<[1], [0], [0], [1], [0, 0, 1, 1], [], []>} : vector<8x32xbf16>, vector<32x32xbf16>, vector<8x32xf32> -> vector<8x32xf32>
    %36 = arith.addf %32, %35 : vector<8x32xf32>
    %37 = arith.truncf %22 : vector<8x32xf32> to vector<8x32xbf16>
    %38 = vector.extract_strided_slice %5 {offsets = [128, 0], sizes = [32, 32], strides = [1, 1]} : vector<160x32xbf16> to vector<32x32xbf16>
    %cst_20 = arith.constant dense<0.000000e+00> : vector<8x32xf32>
    %39 = tpu.matmul %37, %38, %cst_20 {dimension_numbers = #tpu.dot_dimension_numbers<[1], [0], [0], [1], [0, 0, 1, 1], [], []>} : vector<8x32xbf16>, vector<32x32xbf16>, vector<8x32xf32> -> vector<8x32xf32>
    %40 = arith.addf %36, %39 : vector<8x32xf32>
    %41 = vector.broadcast %6 : vector<1x32xf32> to vector<8x32xf32>
    %42 = arith.addf %40, %41 : vector<8x32xf32>
    %c0_21 = arith.constant 0 : index
    %c0_22 = arith.constant 0 : index
    %43 = vector.load %arg6[%c0_21, %c0_22] : memref<8x64xf32, #tpu.memory_space<vmem>>, vector<8x64xf32>
    %c0_23 = arith.constant 0 : index
    %c0_24 = arith.constant 0 : index
    %44 = vector.load %arg7[%c0_23, %c0_24] : memref<8x32xf32, #tpu.memory_space<vmem>>, vector<8x32xf32>
    %c0_25 = arith.constant 0 : index
    %c0_26 = arith.constant 0 : index
    %45 = vector.load %arg8[%c0_25, %c0_26] : memref<8x32xf32, #tpu.memory_space<vmem>>, vector<8x32xf32>
    %c0_27 = arith.constant 0 : index
    %c0_28 = arith.constant 0 : index
    %46 = vector.load %arg9[%c0_27, %c0_28] : memref<8x1xf32, #tpu.memory_space<vmem>>, vector<8x1xf32>
    %c0_29 = arith.constant 0 : index
    %c0_30 = arith.constant 0 : index
    %47 = vector.load %arg12[%c0_29, %c0_30] : memref<160x32xbf16, #tpu.memory_space<vmem>>, vector<160x32xbf16>
    %c0_31 = arith.constant 0 : index
    %c0_32 = arith.constant 0 : index
    %48 = vector.load %arg13[%c0_31, %c0_32] : memref<1x32xf32, #tpu.memory_space<vmem>>, vector<1x32xf32>
    %cst_33 = arith.constant 0.000000e+00 : f32
    %49 = vector.broadcast %cst_33 : f32 to vector<8x1xf32>
    %50 = arith.cmpf ogt, %46, %49 : vector<8x1xf32>
    %51 = vector.extract_strided_slice %43 {offsets = [0, 0], sizes = [8, 32], strides = [1, 1]} : vector<8x64xf32> to vector<8x32xf32>
    %52 = vector.extract_strided_slice %43 {offsets = [0, 32], sizes = [8, 32], strides = [1, 1]} : vector<8x64xf32> to vector<8x32xf32>
    %cst_34 = arith.constant 0.000000e+00 : f32
    %53 = vector.shape_cast %50 : vector<8x1xi1> to vector<8x1xi1>
    %54 = vector.broadcast %53 : vector<8x1xi1> to vector<8x32xi1>
    %55 = vector.broadcast %cst_34 : f32 to vector<8x32xf32>
    %56 = arith.select %54, %44, %55 : vector<8x32xi1>, vector<8x32xf32>
    %cst_35 = arith.constant 0.000000e+00 : f32
    %57 = vector.shape_cast %50 : vector<8x1xi1> to vector<8x1xi1>
    %58 = vector.broadcast %57 : vector<8x1xi1> to vector<8x32xi1>
    %59 = vector.broadcast %cst_35 : f32 to vector<8x32xf32>
    %60 = arith.select %58, %45, %59 : vector<8x32xi1>, vector<8x32xf32>
    %cst_36 = arith.constant 1.000000e+00 : f32
    %61 = vector.broadcast %cst_36 : f32 to vector<8x1xf32>
    %62 = arith.maximumf %46, %61 : vector<8x1xf32>
    %63 = vector.broadcast %62 : vector<8x1xf32> to vector<8x32xf32>
    %64 = arith.divf %52, %63 : vector<8x32xf32>
    %65 = vector.extract_strided_slice %47 {offsets = [0, 0], sizes = [32, 32], strides = [1, 1]} : vector<160x32xbf16> to vector<32x32xbf16>
    %cst_37 = arith.constant dense<0.000000e+00> : vector<8x32xf32>
    %66 = tpu.matmul %0, %65, %cst_37 {dimension_numbers = #tpu.dot_dimension_numbers<[1], [0], [0], [1], [0, 0, 1, 1], [], []>} : vector<8x32xbf16>, vector<32x32xbf16>, vector<8x32xf32> -> vector<8x32xf32>
    %67 = arith.truncf %51 : vector<8x32xf32> to vector<8x32xbf16>
    %68 = vector.extract_strided_slice %47 {offsets = [32, 0], sizes = [32, 32], strides = [1, 1]} : vector<160x32xbf16> to vector<32x32xbf16>
    %cst_38 = arith.constant dense<0.000000e+00> : vector<8x32xf32>
    %69 = tpu.matmul %67, %68, %cst_38 {dimension_numbers = #tpu.dot_dimension_numbers<[1], [0], [0], [1], [0, 0, 1, 1], [], []>} : vector<8x32xbf16>, vector<32x32xbf16>, vector<8x32xf32> -> vector<8x32xf32>
    %70 = arith.addf %66, %69 : vector<8x32xf32>
    %71 = arith.truncf %56 : vector<8x32xf32> to vector<8x32xbf16>
    %72 = vector.extract_strided_slice %47 {offsets = [64, 0], sizes = [32, 32], strides = [1, 1]} : vector<160x32xbf16> to vector<32x32xbf16>
    %cst_39 = arith.constant dense<0.000000e+00> : vector<8x32xf32>
    %73 = tpu.matmul %71, %72, %cst_39 {dimension_numbers = #tpu.dot_dimension_numbers<[1], [0], [0], [1], [0, 0, 1, 1], [], []>} : vector<8x32xbf16>, vector<32x32xbf16>, vector<8x32xf32> -> vector<8x32xf32>
    %74 = arith.addf %70, %73 : vector<8x32xf32>
    %75 = arith.truncf %60 : vector<8x32xf32> to vector<8x32xbf16>
    %76 = vector.extract_strided_slice %47 {offsets = [96, 0], sizes = [32, 32], strides = [1, 1]} : vector<160x32xbf16> to vector<32x32xbf16>
    %cst_40 = arith.constant dense<0.000000e+00> : vector<8x32xf32>
    %77 = tpu.matmul %75, %76, %cst_40 {dimension_numbers = #tpu.dot_dimension_numbers<[1], [0], [0], [1], [0, 0, 1, 1], [], []>} : vector<8x32xbf16>, vector<32x32xbf16>, vector<8x32xf32> -> vector<8x32xf32>
    %78 = arith.addf %74, %77 : vector<8x32xf32>
    %79 = arith.truncf %64 : vector<8x32xf32> to vector<8x32xbf16>
    %80 = vector.extract_strided_slice %47 {offsets = [128, 0], sizes = [32, 32], strides = [1, 1]} : vector<160x32xbf16> to vector<32x32xbf16>
    %cst_41 = arith.constant dense<0.000000e+00> : vector<8x32xf32>
    %81 = tpu.matmul %79, %80, %cst_41 {dimension_numbers = #tpu.dot_dimension_numbers<[1], [0], [0], [1], [0, 0, 1, 1], [], []>} : vector<8x32xbf16>, vector<32x32xbf16>, vector<8x32xf32> -> vector<8x32xf32>
    %82 = arith.addf %78, %81 : vector<8x32xf32>
    %83 = vector.broadcast %48 : vector<1x32xf32> to vector<8x32xf32>
    %84 = arith.addf %82, %83 : vector<8x32xf32>
    %85 = arith.addf %42, %84 : vector<8x32xf32>
    %86 = arith.truncf %85 : vector<8x32xf32> to vector<8x32xbf16>
    %c0_42 = arith.constant 0 : index
    %c0_43 = arith.constant 0 : index
    %87 = vector.load %arg14[%c0_42, %c0_43] : memref<32x32xbf16, #tpu.memory_space<vmem>>, vector<32x32xbf16>
    %cst_44 = arith.constant dense<0.000000e+00> : vector<8x32xf32>
    %88 = tpu.matmul %86, %87, %cst_44 {dimension_numbers = #tpu.dot_dimension_numbers<[1], [0], [0], [1], [0, 0, 1, 1], [], []>} : vector<8x32xbf16>, vector<32x32xbf16>, vector<8x32xf32> -> vector<8x32xf32>
    %c0_45 = arith.constant 0 : index
    %c0_46 = arith.constant 0 : index
    %89 = vector.load %arg15[%c0_45, %c0_46] : memref<1x32xf32, #tpu.memory_space<vmem>>, vector<1x32xf32>
    %90 = vector.broadcast %89 : vector<1x32xf32> to vector<8x32xf32>
    %91 = arith.addf %88, %90 : vector<8x32xf32>
    %92 = arith.truncf %91 : vector<8x32xf32> to vector<8x32xbf16>
    %c0_47 = arith.constant 0 : index
    %c0_48 = arith.constant 0 : index
    %93 = vector.load %arg16[%c0_47, %c0_48] : memref<8x32xbf16, #tpu.memory_space<vmem>>, vector<8x32xbf16>
    tpu.vector_store %arg16[%c0_47, %c0_48], %92 {strides = array<i32>} : memref<8x32xbf16, #tpu.memory_space<vmem>>, vector<8x32xbf16>,
    return
  }
  func.func @transform_0(%arg0: i32) -> (i32, i32) {
    %c0_i32 = arith.constant 0 : i32
    %c0_i32_0 = arith.constant 0 : i32
    return %arg0, %c0_i32 : i32, i32
  }
  func.func @transform_1(%arg0: i32) -> (i32, i32) {
    %c0_i32 = arith.constant 0 : i32
    %c0_i32_0 = arith.constant 0 : i32
    return %arg0, %c0_i32 : i32, i32
  }
  func.func @transform_2(%arg0: i32) -> (i32, i32) {
    %c0_i32 = arith.constant 0 : i32
    %c0_i32_0 = arith.constant 0 : i32
    return %arg0, %c0_i32 : i32, i32
  }
  func.func @transform_3(%arg0: i32) -> (i32, i32) {
    %c0_i32 = arith.constant 0 : i32
    %c0_i32_0 = arith.constant 0 : i32
    return %arg0, %c0_i32 : i32, i32
  }
  func.func @transform_4(%arg0: i32) -> (i32, i32) {
    %c0_i32 = arith.constant 0 : i32
    %c0_i32_0 = arith.constant 0 : i32
    return %arg0, %c0_i32 : i32, i32
  }
  func.func @transform_5(%arg0: i32) -> (i32, i32) {
    %c0_i32 = arith.constant 0 : i32
    %c0_i32_0 = arith.constant 0 : i32
    return %arg0, %c0_i32 : i32, i32
  }
  func.func @transform_6(%arg0: i32) -> (i32, i32) {
    %c0_i32 = arith.constant 0 : i32
    %c0_i32_0 = arith.constant 0 : i32
    return %arg0, %c0_i32 : i32, i32
  }
  func.func @transform_7(%arg0: i32) -> (i32, i32) {
    %c0_i32 = arith.constant 0 : i32
    %c0_i32_0 = arith.constant 0 : i32
    return %arg0, %c0_i32 : i32, i32
  }
  func.func @transform_8(%arg0: i32) -> (i32, i32) {
    %c0_i32 = arith.constant 0 : i32
    %c0_i32_0 = arith.constant 0 : i32
    return %arg0, %c0_i32 : i32, i32
  }
  func.func @transform_9(%arg0: i32) -> (i32, i32) {
    %c0_i32 = arith.constant 0 : i32
    %c0_i32_0 = arith.constant 0 : i32
    %c0_i32_1 = arith.constant 0 : i32
    return %c0_i32, %c0_i32_0 : i32, i32
  }
  func.func @transform_10(%arg0: i32) -> (i32, i32) {
    %c0_i32 = arith.constant 0 : i32
    %c0_i32_0 = arith.constant 0 : i32
    %c0_i32_1 = arith.constant 0 : i32
    return %c0_i32, %c0_i32_0 : i32, i32
  }
  func.func @transform_11(%arg0: i32) -> (i32, i32) {
    %c0_i32 = arith.constant 0 : i32
    %c0_i32_0 = arith.constant 0 : i32
    %c0_i32_1 = arith.constant 0 : i32
    return %c0_i32, %c0_i32_0 : i32, i32
  }
  func.func @transform_12(%arg0: i32) -> (i32, i32) {
    %c0_i32 = arith.constant 0 : i32
    %c0_i32_0 = arith.constant 0 : i32
    %c0_i32_1 = arith.constant 0 : i32
    return %c0_i32, %c0_i32_0 : i32, i32
  }
  func.func @transform_13(%arg0: i32) -> (i32, i32) {
    %c0_i32 = arith.constant 0 : i32
    %c0_i32_0 = arith.constant 0 : i32
    %c0_i32_1 = arith.constant 0 : i32
    return %c0_i32, %c0_i32_0 : i32, i32
  }
  func.func @transform_14(%arg0: i32) -> (i32, i32) {
    %c0_i32 = arith.constant 0 : i32
    %c0_i32_0 = arith.constant 0 : i32
    %c0_i32_1 = arith.constant 0 : i32
    return %c0_i32, %c0_i32_0 : i32, i32
  }
  func.func @transform_15(%arg0: i32) -> (i32, i32) {
    %c0_i32 = arith.constant 0 : i32
    %c0_i32_0 = arith.constant 0 : i32
    return %arg0, %c0_i32 : i32, i32
  }
}

module attributes {stable_mosaic.version = 11 : i64} {
  func.func @kernel(%arg0: i32, %arg1: memref<16x32xbf16, #tpu.memory_space<vmem>>, %arg2: memref<16x32xbf16, #tpu.memory_space<vmem>>, %arg3: memref<16x32xbf16, #tpu.memory_space<vmem>>, %arg4: memref<96x64xbf16, #tpu.memory_space<vmem>>, %arg5: memref<1x64xf32, #tpu.memory_space<vmem>>, %arg6: memref<64x128xbf16, #tpu.memory_space<vmem>>, %arg7: memref<1x128xf32, #tpu.memory_space<vmem>>, %arg8: memref<1x64xf32, #tpu.memory_space<vmem>>, %arg9: memref<1x1xf32, #tpu.memory_space<vmem>>, %arg10: memref<16x128xf32, #tpu.memory_space<vmem>>) attributes {dimension_semantics = [#tpu.dimension_semantics<parallel>], iteration_bounds = array<i64: 2>, scalar_prefetch = 0 : i64, scratch_operands = 0 : i64, tpu.core_type = #tpu.core_type<tc>, window_params = [{transform_indices = @transform_0, window_bounds = array<i64: 16, 32>}, {transform_indices = @transform_1, window_bounds = array<i64: 16, 32>}, {transform_indices = @transform_2, window_bounds = array<i64: 16, 32>}, {pipeline_mode = #tpu.pipeline_mode<synchronous>, transform_indices = @transform_3, window_bounds = array<i64: 96, 64>}, {pipeline_mode = #tpu.pipeline_mode<synchronous>, transform_indices = @transform_4, window_bounds = array<i64: 1, 64>}, {pipeline_mode = #tpu.pipeline_mode<synchronous>, transform_indices = @transform_5, window_bounds = array<i64: 64, 128>}, {pipeline_mode = #tpu.pipeline_mode<synchronous>, transform_indices = @transform_6, window_bounds = array<i64: 1, 128>}, {pipeline_mode = #tpu.pipeline_mode<synchronous>, transform_indices = @transform_7, window_bounds = array<i64: 1, 64>}, {pipeline_mode = #tpu.pipeline_mode<synchronous>, transform_indices = @transform_8, window_bounds = array<i64: 1, 1>}, {transform_indices = @transform_9, window_bounds = array<i64: 16, 128>}]} {
    %c0 = arith.constant 0 : index
    %c0_0 = arith.constant 0 : index
    %0 = vector.load %arg4[%c0, %c0_0] : memref<96x64xbf16, #tpu.memory_space<vmem>>, vector<96x64xbf16>
    %c0_1 = arith.constant 0 : index
    %c0_2 = arith.constant 0 : index
    %1 = vector.load %arg1[%c0_1, %c0_2] : memref<16x32xbf16, #tpu.memory_space<vmem>>, vector<16x32xbf16>
    %2 = vector.extract_strided_slice %0 {offsets = [0, 0], sizes = [32, 64], strides = [1, 1]} : vector<96x64xbf16> to vector<32x64xbf16>
    %cst = arith.constant dense<0.000000e+00> : vector<16x64xf32>
    %3 = tpu.matmul %1, %2, %cst {dimension_numbers = #tpu.dot_dimension_numbers<[1], [0], [0], [1], [0, 0, 1, 1], [], []>} : vector<16x32xbf16>, vector<32x64xbf16>, vector<16x64xf32> -> vector<16x64xf32>
    %c0_3 = arith.constant 0 : index
    %c0_4 = arith.constant 0 : index
    %4 = vector.load %arg2[%c0_3, %c0_4] : memref<16x32xbf16, #tpu.memory_space<vmem>>, vector<16x32xbf16>
    %5 = vector.extract_strided_slice %0 {offsets = [32, 0], sizes = [32, 64], strides = [1, 1]} : vector<96x64xbf16> to vector<32x64xbf16>
    %cst_5 = arith.constant dense<0.000000e+00> : vector<16x64xf32>
    %6 = tpu.matmul %4, %5, %cst_5 {dimension_numbers = #tpu.dot_dimension_numbers<[1], [0], [0], [1], [0, 0, 1, 1], [], []>} : vector<16x32xbf16>, vector<32x64xbf16>, vector<16x64xf32> -> vector<16x64xf32>
    %7 = arith.addf %3, %6 : vector<16x64xf32>
    %c0_6 = arith.constant 0 : index
    %c0_7 = arith.constant 0 : index
    %8 = vector.load %arg3[%c0_6, %c0_7] : memref<16x32xbf16, #tpu.memory_space<vmem>>, vector<16x32xbf16>
    %9 = vector.extract_strided_slice %0 {offsets = [64, 0], sizes = [32, 64], strides = [1, 1]} : vector<96x64xbf16> to vector<32x64xbf16>
    %cst_8 = arith.constant dense<0.000000e+00> : vector<16x64xf32>
    %10 = tpu.matmul %8, %9, %cst_8 {dimension_numbers = #tpu.dot_dimension_numbers<[1], [0], [0], [1], [0, 0, 1, 1], [], []>} : vector<16x32xbf16>, vector<32x64xbf16>, vector<16x64xf32> -> vector<16x64xf32>
    %11 = arith.addf %7, %10 : vector<16x64xf32>
    %c0_9 = arith.constant 0 : index
    %c0_10 = arith.constant 0 : index
    %12 = vector.load %arg5[%c0_9, %c0_10] : memref<1x64xf32, #tpu.memory_space<vmem>>, vector<1x64xf32>
    %13 = vector.broadcast %12 : vector<1x64xf32> to vector<16x64xf32>
    %14 = arith.addf %11, %13 : vector<16x64xf32>
    %cst_11 = arith.constant 0.000000e+00 : f32
    %15 = vector.broadcast %cst_11 : f32 to vector<16x64xf32>
    %16 = arith.maximumf %14, %15 : vector<16x64xf32>
    %17 = arith.truncf %16 : vector<16x64xf32> to vector<16x64xbf16>
    %c0_12 = arith.constant 0 : index
    %c0_13 = arith.constant 0 : index
    %18 = vector.load %arg6[%c0_12, %c0_13] : memref<64x128xbf16, #tpu.memory_space<vmem>>, vector<64x128xbf16>
    %cst_14 = arith.constant dense<0.000000e+00> : vector<16x128xf32>
    %19 = tpu.matmul %17, %18, %cst_14 {dimension_numbers = #tpu.dot_dimension_numbers<[1], [0], [0], [1], [0, 0, 1, 1], [], []>} : vector<16x64xbf16>, vector<64x128xbf16>, vector<16x128xf32> -> vector<16x128xf32>
    %c0_15 = arith.constant 0 : index
    %c0_16 = arith.constant 0 : index
    %20 = vector.load %arg7[%c0_15, %c0_16] : memref<1x128xf32, #tpu.memory_space<vmem>>, vector<1x128xf32>
    %21 = vector.broadcast %20 : vector<1x128xf32> to vector<16x128xf32>
    %22 = arith.addf %19, %21 : vector<16x128xf32>
    %c0_17 = arith.constant 0 : index
    %c0_18 = arith.constant 0 : index
    %23 = vector.load %arg8[%c0_17, %c0_18] : memref<1x64xf32, #tpu.memory_space<vmem>>, vector<1x64xf32>
    %24 = vector.broadcast %23 : vector<1x64xf32> to vector<16x64xf32>
    %25 = arith.mulf %16, %24 : vector<16x64xf32>
    %cst_19 = arith.constant dense<0.000000e+00> : vector<16xf32>
    %26 = vector.multi_reduction <add>, %25, %cst_19 [1] : vector<16x64xf32> to vector<16xf32>
    %27 = vector.shape_cast %26 : vector<16xf32> to vector<16x1xf32>
    %c0_20 = arith.constant 0 : index
    %c0_21 = arith.constant 0 : index
    %28 = vector.load %arg9[%c0_20, %c0_21] : memref<1x1xf32, #tpu.memory_space<vmem>>, vector<1x1xf32>
    %29 = vector.broadcast %28 : vector<1x1xf32> to vector<16x1xf32>
    %30 = arith.addf %27, %29 : vector<16x1xf32>
    %31 = arith.negf %30 : vector<16x1xf32>
    %32 = math.exp %31 : vector<16x1xf32>
    %cst_22 = arith.constant 1.000000e+00 : f32
    %33 = vector.broadcast %cst_22 : f32 to vector<16x1xf32>
    %34 = arith.addf %33, %32 : vector<16x1xf32>
    %35 = arith.divf %33, %34 : vector<16x1xf32>
    %36 = vector.broadcast %35 : vector<16x1xf32> to vector<16x128xf32>
    %37 = arith.mulf %22, %36 : vector<16x128xf32>
    %c0_23 = arith.constant 0 : index
    %c0_24 = arith.constant 0 : index
    %38 = vector.load %arg10[%c0_23, %c0_24] : memref<16x128xf32, #tpu.memory_space<vmem>>, vector<16x128xf32>
    tpu.vector_store %arg10[%c0_23, %c0_24], %37 {strides = array<i32>} : memref<16x128xf32, #tpu.memory_space<vmem>>, vector<16x128xf32>,
    return
  }
  func.func @transform_0(%arg0: i32) -> (i32, i32) {
    %c0_i32 = arith.constant 0 : i32
    %c0_i32_0 = arith.constant 0 : i32
    return %arg0, %c0_i32 : i32, i32
  }
  func.func @transform_1(%arg0: i32) -> (i32, i32) {
    %c0_i32 = arith.constant 0 : i32
    %c0_i32_0 = arith.constant 0 : i32
    return %arg0, %c0_i32 : i32, i32
  }
  func.func @transform_2(%arg0: i32) -> (i32, i32) {
    %c0_i32 = arith.constant 0 : i32
    %c0_i32_0 = arith.constant 0 : i32
    return %arg0, %c0_i32 : i32, i32
  }
  func.func @transform_3(%arg0: i32) -> (i32, i32) {
    %c0_i32 = arith.constant 0 : i32
    %c0_i32_0 = arith.constant 0 : i32
    %c0_i32_1 = arith.constant 0 : i32
    return %c0_i32, %c0_i32_0 : i32, i32
  }
  func.func @transform_4(%arg0: i32) -> (i32, i32) {
    %c0_i32 = arith.constant 0 : i32
    %c0_i32_0 = arith.constant 0 : i32
    %c0_i32_1 = arith.constant 0 : i32
    return %c0_i32, %c0_i32_0 : i32, i32
  }
  func.func @transform_5(%arg0: i32) -> (i32, i32) {
    %c0_i32 = arith.constant 0 : i32
    %c0_i32_0 = arith.constant 0 : i32
    %c0_i32_1 = arith.constant 0 : i32
    return %c0_i32, %c0_i32_0 : i32, i32
  }
  func.func @transform_6(%arg0: i32) -> (i32, i32) {
    %c0_i32 = arith.constant 0 : i32
    %c0_i32_0 = arith.constant 0 : i32
    %c0_i32_1 = arith.constant 0 : i32
    return %c0_i32, %c0_i32_0 : i32, i32
  }
  func.func @transform_7(%arg0: i32) -> (i32, i32) {
    %c0_i32 = arith.constant 0 : i32
    %c0_i32_0 = arith.constant 0 : i32
    %c0_i32_1 = arith.constant 0 : i32
    return %c0_i32, %c0_i32_0 : i32, i32
  }
  func.func @transform_8(%arg0: i32) -> (i32, i32) {
    %c0_i32 = arith.constant 0 : i32
    %c0_i32_0 = arith.constant 0 : i32
    %c0_i32_1 = arith.constant 0 : i32
    return %c0_i32, %c0_i32_0 : i32, i32
  }
  func.func @transform_9(%arg0: i32) -> (i32, i32) {
    %c0_i32 = arith.constant 0 : i32
    %c0_i32_0 = arith.constant 0 : i32
    return %arg0, %c0_i32 : i32, i32
  }
}

module attributes {stable_mosaic.version = 11 : i64} {
  func.func @kernel(%arg0: i32, %arg1: memref<8x32xbf16, #tpu.memory_space<vmem>>, %arg2: memref<8x64xf32, #tpu.memory_space<vmem>>, %arg3: memref<8x32xf32, #tpu.memory_space<vmem>>, %arg4: memref<8x32xf32, #tpu.memory_space<vmem>>, %arg5: memref<8x1xf32, #tpu.memory_space<vmem>>, %arg6: memref<8x64xf32, #tpu.memory_space<vmem>>, %arg7: memref<8x32xf32, #tpu.memory_space<vmem>>, %arg8: memref<8x32xf32, #tpu.memory_space<vmem>>, %arg9: memref<8x1xf32, #tpu.memory_space<vmem>>, %arg10: memref<160x32xbf16, #tpu.memory_space<vmem>>, %arg11: memref<1x32xf32, #tpu.memory_space<vmem>>, %arg12: memref<160x32xbf16, #tpu.memory_space<vmem>>, %arg13: memref<1x32xf32, #tpu.memory_space<vmem>>, %arg14: memref<32x32xbf16, #tpu.memory_space<vmem>>, %arg15: memref<1x32xf32, #tpu.memory_space<vmem>>, %arg16: memref<8x32xbf16, #tpu.memory_space<vmem>>) attributes {dimension_semantics = [#tpu.dimension_semantics<parallel>], iteration_bounds = array<i64: 2>, scalar_prefetch = 0 : i64, scratch_operands = 0 : i64, tpu.core_type = #tpu.core_type<tc>, window_params = [{transform_indices = @transform_0, window_bounds = array<i64: 8, 32>}, {transform_indices = @transform_1, window_bounds = array<i64: 8, 64>}, {transform_indices = @transform_2, window_bounds = array<i64: 8, 32>}, {transform_indices = @transform_3, window_bounds = array<i64: 8, 32>}, {transform_indices = @transform_4, window_bounds = array<i64: 8, 1>}, {transform_indices = @transform_5, window_bounds = array<i64: 8, 64>}, {transform_indices = @transform_6, window_bounds = array<i64: 8, 32>}, {transform_indices = @transform_7, window_bounds = array<i64: 8, 32>}, {transform_indices = @transform_8, window_bounds = array<i64: 8, 1>}, {pipeline_mode = #tpu.pipeline_mode<synchronous>, transform_indices = @transform_9, window_bounds = array<i64: 160, 32>}, {pipeline_mode = #tpu.pipeline_mode<synchronous>, transform_indices = @transform_10, window_bounds = array<i64: 1, 32>}, {pipeline_mode = #tpu.pipeline_mode<synchronous>, transform_indices = @transform_11, window_bounds = array<i64: 160, 32>}, {pipeline_mode = #tpu.pipeline_mode<synchronous>, transform_indices = @transform_12, window_bounds = array<i64: 1, 32>}, {pipeline_mode = #tpu.pipeline_mode<synchronous>, transform_indices = @transform_13, window_bounds = array<i64: 32, 32>}, {pipeline_mode = #tpu.pipeline_mode<synchronous>, transform_indices = @transform_14, window_bounds = array<i64: 1, 32>}, {transform_indices = @transform_15, window_bounds = array<i64: 8, 32>}]} {
    %c0 = arith.constant 0 : index
    %c0_0 = arith.constant 0 : index
    %0 = vector.load %arg1[%c0, %c0_0] : memref<8x32xbf16, #tpu.memory_space<vmem>>, vector<8x32xbf16>
    %c0_1 = arith.constant 0 : index
    %c0_2 = arith.constant 0 : index
    %1 = vector.load %arg2[%c0_1, %c0_2] : memref<8x64xf32, #tpu.memory_space<vmem>>, vector<8x64xf32>
    %c0_3 = arith.constant 0 : index
    %c0_4 = arith.constant 0 : index
    %2 = vector.load %arg3[%c0_3, %c0_4] : memref<8x32xf32, #tpu.memory_space<vmem>>, vector<8x32xf32>
    %c0_5 = arith.constant 0 : index
    %c0_6 = arith.constant 0 : index
    %3 = vector.load %arg4[%c0_5, %c0_6] : memref<8x32xf32, #tpu.memory_space<vmem>>, vector<8x32xf32>
    %c0_7 = arith.constant 0 : index
    %c0_8 = arith.constant 0 : index
    %4 = vector.load %arg5[%c0_7, %c0_8] : memref<8x1xf32, #tpu.memory_space<vmem>>, vector<8x1xf32>
    %c0_9 = arith.constant 0 : index
    %c0_10 = arith.constant 0 : index
    %5 = vector.load %arg10[%c0_9, %c0_10] : memref<160x32xbf16, #tpu.memory_space<vmem>>, vector<160x32xbf16>
    %c0_11 = arith.constant 0 : index
    %c0_12 = arith.constant 0 : index
    %6 = vector.load %arg11[%c0_11, %c0_12] : memref<1x32xf32, #tpu.memory_space<vmem>>, vector<1x32xf32>
    %cst = arith.constant 0.000000e+00 : f32
    %7 = vector.broadcast %cst : f32 to vector<8x1xf32>
    %8 = arith.cmpf ogt, %4, %7 : vector<8x1xf32>
    %9 = vector.extract_strided_slice %1 {offsets = [0, 0], sizes = [8, 32], strides = [1, 1]} : vector<8x64xf32> to vector<8x32xf32>
    %10 = vector.extract_strided_slice %1 {offsets = [0, 32], sizes = [8, 32], strides = [1, 1]} : vector<8x64xf32> to vector<8x32xf32>
    %cst_13 = arith.constant 0.000000e+00 : f32
    %11 = vector.shape_cast %8 : vector<8x1xi1> to vector<8x1xi1>
    %12 = vector.broadcast %11 : vector<8x1xi1> to vector<8x32xi1>
    %13 = vector.broadcast %cst_13 : f32 to vector<8x32xf32>
    %14 = arith.select %12, %2, %13 : vector<8x32xi1>, vector<8x32xf32>
    %cst_14 = arith.constant 0.000000e+00 : f32
    %15 = vector.shape_cast %8 : vector<8x1xi1> to vector<8x1xi1>
    %16 = vector.broadcast %15 : vector<8x1xi1> to vector<8x32xi1>
    %17 = vector.broadcast %cst_14 : f32 to vector<8x32xf32>
    %18 = arith.select %16, %3, %17 : vector<8x32xi1>, vector<8x32xf32>
    %cst_15 = arith.constant 1.000000e+00 : f32
    %19 = vector.broadcast %cst_15 : f32 to vector<8x1xf32>
    %20 = arith.maximumf %4, %19 : vector<8x1xf32>
    %21 = vector.broadcast %20 : vector<8x1xf32> to vector<8x32xf32>
    %22 = arith.divf %10, %21 : vector<8x32xf32>
    %23 = vector.extract_strided_slice %5 {offsets = [0, 0], sizes = [32, 32], strides = [1, 1]} : vector<160x32xbf16> to vector<32x32xbf16>
    %cst_16 = arith.constant dense<0.000000e+00> : vector<8x32xf32>
    %24 = tpu.matmul %0, %23, %cst_16 {dimension_numbers = #tpu.dot_dimension_numbers<[1], [0], [0], [1], [0, 0, 1, 1], [], []>} : vector<8x32xbf16>, vector<32x32xbf16>, vector<8x32xf32> -> vector<8x32xf32>
    %25 = arith.truncf %9 : vector<8x32xf32> to vector<8x32xbf16>
    %26 = vector.extract_strided_slice %5 {offsets = [32, 0], sizes = [32, 32], strides = [1, 1]} : vector<160x32xbf16> to vector<32x32xbf16>
    %cst_17 = arith.constant dense<0.000000e+00> : vector<8x32xf32>
    %27 = tpu.matmul %25, %26, %cst_17 {dimension_numbers = #tpu.dot_dimension_numbers<[1], [0], [0], [1], [0, 0, 1, 1], [], []>} : vector<8x32xbf16>, vector<32x32xbf16>, vector<8x32xf32> -> vector<8x32xf32>
    %28 = arith.addf %24, %27 : vector<8x32xf32>
    %29 = arith.truncf %14 : vector<8x32xf32> to vector<8x32xbf16>
    %30 = vector.extract_strided_slice %5 {offsets = [64, 0], sizes = [32, 32], strides = [1, 1]} : vector<160x32xbf16> to vector<32x32xbf16>
    %cst_18 = arith.constant dense<0.000000e+00> : vector<8x32xf32>
    %31 = tpu.matmul %29, %30, %cst_18 {dimension_numbers = #tpu.dot_dimension_numbers<[1], [0], [0], [1], [0, 0, 1, 1], [], []>} : vector<8x32xbf16>, vector<32x32xbf16>, vector<8x32xf32> -> vector<8x32xf32>
    %32 = arith.addf %28, %31 : vector<8x32xf32>
    %33 = arith.truncf %18 : vector<8x32xf32> to vector<8x32xbf16>
    %34 = vector.extract_strided_slice %5 {offsets = [96, 0], sizes = [32, 32], strides = [1, 1]} : vector<160x32xbf16> to vector<32x32xbf16>
    %cst_19 = arith.constant dense<0.000000e+00> : vector<8x32xf32>
    %35 = tpu.matmul %33, %34, %cst_19 {dimension_numbers = #tpu.dot_dimension_numbers<[1], [0], [0], [1], [0, 0, 1, 1], [], []>} : vector<8x32xbf16>, vector<32x32xbf16>, vector<8x32xf32> -> vector<8x32xf32>
    %36 = arith.addf %32, %35 : vector<8x32xf32>
    %37 = arith.truncf %22 : vector<8x32xf32> to vector<8x32xbf16>
    %38 = vector.extract_strided_slice %5 {offsets = [128, 0], sizes = [32, 32], strides = [1, 1]} : vector<160x32xbf16> to vector<32x32xbf16>
    %cst_20 = arith.constant dense<0.000000e+00> : vector<8x32xf32>
    %39 = tpu.matmul %37, %38, %cst_20 {dimension_numbers = #tpu.dot_dimension_numbers<[1], [0], [0], [1], [0, 0, 1, 1], [], []>} : vector<8x32xbf16>, vector<32x32xbf16>, vector<8x32xf32> -> vector<8x32xf32>
    %40 = arith.addf %36, %39 : vector<8x32xf32>
    %41 = vector.broadcast %6 : vector<1x32xf32> to vector<8x32xf32>
    %42 = arith.addf %40, %41 : vector<8x32xf32>
    %c0_21 = arith.constant 0 : index
    %c0_22 = arith.constant 0 : index
    %43 = vector.load %arg6[%c0_21, %c0_22] : memref<8x64xf32, #tpu.memory_space<vmem>>, vector<8x64xf32>
    %c0_23 = arith.constant 0 : index
    %c0_24 = arith.constant 0 : index
    %44 = vector.load %arg7[%c0_23, %c0_24] : memref<8x32xf32, #tpu.memory_space<vmem>>, vector<8x32xf32>
    %c0_25 = arith.constant 0 : index
    %c0_26 = arith.constant 0 : index
    %45 = vector.load %arg8[%c0_25, %c0_26] : memref<8x32xf32, #tpu.memory_space<vmem>>, vector<8x32xf32>
    %c0_27 = arith.constant 0 : index
    %c0_28 = arith.constant 0 : index
    %46 = vector.load %arg9[%c0_27, %c0_28] : memref<8x1xf32, #tpu.memory_space<vmem>>, vector<8x1xf32>
    %c0_29 = arith.constant 0 : index
    %c0_30 = arith.constant 0 : index
    %47 = vector.load %arg12[%c0_29, %c0_30] : memref<160x32xbf16, #tpu.memory_space<vmem>>, vector<160x32xbf16>
    %c0_31 = arith.constant 0 : index
    %c0_32 = arith.constant 0 : index
    %48 = vector.load %arg13[%c0_31, %c0_32] : memref<1x32xf32, #tpu.memory_space<vmem>>, vector<1x32xf32>
    %cst_33 = arith.constant 0.000000e+00 : f32
    %49 = vector.broadcast %cst_33 : f32 to vector<8x1xf32>
    %50 = arith.cmpf ogt, %46, %49 : vector<8x1xf32>
    %51 = vector.extract_strided_slice %43 {offsets = [0, 0], sizes = [8, 32], strides = [1, 1]} : vector<8x64xf32> to vector<8x32xf32>
    %52 = vector.extract_strided_slice %43 {offsets = [0, 32], sizes = [8, 32], strides = [1, 1]} : vector<8x64xf32> to vector<8x32xf32>
    %cst_34 = arith.constant 0.000000e+00 : f32
    %53 = vector.shape_cast %50 : vector<8x1xi1> to vector<8x1xi1>
    %54 = vector.broadcast %53 : vector<8x1xi1> to vector<8x32xi1>
    %55 = vector.broadcast %cst_34 : f32 to vector<8x32xf32>
    %56 = arith.select %54, %44, %55 : vector<8x32xi1>, vector<8x32xf32>
    %cst_35 = arith.constant 0.000000e+00 : f32
    %57 = vector.shape_cast %50 : vector<8x1xi1> to vector<8x1xi1>
    %58 = vector.broadcast %57 : vector<8x1xi1> to vector<8x32xi1>
    %59 = vector.broadcast %cst_35 : f32 to vector<8x32xf32>
    %60 = arith.select %58, %45, %59 : vector<8x32xi1>, vector<8x32xf32>
    %cst_36 = arith.constant 1.000000e+00 : f32
    %61 = vector.broadcast %cst_36 : f32 to vector<8x1xf32>
    %62 = arith.maximumf %46, %61 : vector<8x1xf32>
    %63 = vector.broadcast %62 : vector<8x1xf32> to vector<8x32xf32>
    %64 = arith.divf %52, %63 : vector<8x32xf32>
    %65 = vector.extract_strided_slice %47 {offsets = [0, 0], sizes = [32, 32], strides = [1, 1]} : vector<160x32xbf16> to vector<32x32xbf16>
    %cst_37 = arith.constant dense<0.000000e+00> : vector<8x32xf32>
    %66 = tpu.matmul %0, %65, %cst_37 {dimension_numbers = #tpu.dot_dimension_numbers<[1], [0], [0], [1], [0, 0, 1, 1], [], []>} : vector<8x32xbf16>, vector<32x32xbf16>, vector<8x32xf32> -> vector<8x32xf32>
    %67 = arith.truncf %51 : vector<8x32xf32> to vector<8x32xbf16>
    %68 = vector.extract_strided_slice %47 {offsets = [32, 0], sizes = [32, 32], strides = [1, 1]} : vector<160x32xbf16> to vector<32x32xbf16>
    %cst_38 = arith.constant dense<0.000000e+00> : vector<8x32xf32>
    %69 = tpu.matmul %67, %68, %cst_38 {dimension_numbers = #tpu.dot_dimension_numbers<[1], [0], [0], [1], [0, 0, 1, 1], [], []>} : vector<8x32xbf16>, vector<32x32xbf16>, vector<8x32xf32> -> vector<8x32xf32>
    %70 = arith.addf %66, %69 : vector<8x32xf32>
    %71 = arith.truncf %56 : vector<8x32xf32> to vector<8x32xbf16>
    %72 = vector.extract_strided_slice %47 {offsets = [64, 0], sizes = [32, 32], strides = [1, 1]} : vector<160x32xbf16> to vector<32x32xbf16>
    %cst_39 = arith.constant dense<0.000000e+00> : vector<8x32xf32>
    %73 = tpu.matmul %71, %72, %cst_39 {dimension_numbers = #tpu.dot_dimension_numbers<[1], [0], [0], [1], [0, 0, 1, 1], [], []>} : vector<8x32xbf16>, vector<32x32xbf16>, vector<8x32xf32> -> vector<8x32xf32>
    %74 = arith.addf %70, %73 : vector<8x32xf32>
    %75 = arith.truncf %60 : vector<8x32xf32> to vector<8x32xbf16>
    %76 = vector.extract_strided_slice %47 {offsets = [96, 0], sizes = [32, 32], strides = [1, 1]} : vector<160x32xbf16> to vector<32x32xbf16>
    %cst_40 = arith.constant dense<0.000000e+00> : vector<8x32xf32>
    %77 = tpu.matmul %75, %76, %cst_40 {dimension_numbers = #tpu.dot_dimension_numbers<[1], [0], [0], [1], [0, 0, 1, 1], [], []>} : vector<8x32xbf16>, vector<32x32xbf16>, vector<8x32xf32> -> vector<8x32xf32>
    %78 = arith.addf %74, %77 : vector<8x32xf32>
    %79 = arith.truncf %64 : vector<8x32xf32> to vector<8x32xbf16>
    %80 = vector.extract_strided_slice %47 {offsets = [128, 0], sizes = [32, 32], strides = [1, 1]} : vector<160x32xbf16> to vector<32x32xbf16>
    %cst_41 = arith.constant dense<0.000000e+00> : vector<8x32xf32>
    %81 = tpu.matmul %79, %80, %cst_41 {dimension_numbers = #tpu.dot_dimension_numbers<[1], [0], [0], [1], [0, 0, 1, 1], [], []>} : vector<8x32xbf16>, vector<32x32xbf16>, vector<8x32xf32> -> vector<8x32xf32>
    %82 = arith.addf %78, %81 : vector<8x32xf32>
    %83 = vector.broadcast %48 : vector<1x32xf32> to vector<8x32xf32>
    %84 = arith.addf %82, %83 : vector<8x32xf32>
    %85 = arith.addf %42, %84 : vector<8x32xf32>
    %86 = arith.truncf %85 : vector<8x32xf32> to vector<8x32xbf16>
    %c0_42 = arith.constant 0 : index
    %c0_43 = arith.constant 0 : index
    %87 = vector.load %arg14[%c0_42, %c0_43] : memref<32x32xbf16, #tpu.memory_space<vmem>>, vector<32x32xbf16>
    %cst_44 = arith.constant dense<0.000000e+00> : vector<8x32xf32>
    %88 = tpu.matmul %86, %87, %cst_44 {dimension_numbers = #tpu.dot_dimension_numbers<[1], [0], [0], [1], [0, 0, 1, 1], [], []>} : vector<8x32xbf16>, vector<32x32xbf16>, vector<8x32xf32> -> vector<8x32xf32>
    %c0_45 = arith.constant 0 : index
    %c0_46 = arith.constant 0 : index
    %89 = vector.load %arg15[%c0_45, %c0_46] : memref<1x32xf32, #tpu.memory_space<vmem>>, vector<1x32xf32>
    %90 = vector.broadcast %89 : vector<1x32xf32> to vector<8x32xf32>
    %91 = arith.addf %88, %90 : vector<8x32xf32>
    %92 = arith.truncf %91 : vector<8x32xf32> to vector<8x32xbf16>
    %c0_47 = arith.constant 0 : index
    %c0_48 = arith.constant 0 : index
    %93 = vector.load %arg16[%c0_47, %c0_48] : memref<8x32xbf16, #tpu.memory_space<vmem>>, vector<8x32xbf16>
    tpu.vector_store %arg16[%c0_47, %c0_48], %92 {strides = array<i32>} : memref<8x32xbf16, #tpu.memory_space<vmem>>, vector<8x32xbf16>,
    return
  }
  func.func @transform_0(%arg0: i32) -> (i32, i32) {
    %c0_i32 = arith.constant 0 : i32
    %c0_i32_0 = arith.constant 0 : i32
    return %arg0, %c0_i32 : i32, i32
  }
  func.func @transform_1(%arg0: i32) -> (i32, i32) {
    %c0_i32 = arith.constant 0 : i32
    %c0_i32_0 = arith.constant 0 : i32
    return %arg0, %c0_i32 : i32, i32
  }
  func.func @transform_2(%arg0: i32) -> (i32, i32) {
    %c0_i32 = arith.constant 0 : i32
    %c0_i32_0 = arith.constant 0 : i32
    return %arg0, %c0_i32 : i32, i32
  }
  func.func @transform_3(%arg0: i32) -> (i32, i32) {
    %c0_i32 = arith.constant 0 : i32
    %c0_i32_0 = arith.constant 0 : i32
    return %arg0, %c0_i32 : i32, i32
  }
  func.func @transform_4(%arg0: i32) -> (i32, i32) {
    %c0_i32 = arith.constant 0 : i32
    %c0_i32_0 = arith.constant 0 : i32
    return %arg0, %c0_i32 : i32, i32
  }
  func.func @transform_5(%arg0: i32) -> (i32, i32) {
    %c0_i32 = arith.constant 0 : i32
    %c0_i32_0 = arith.constant 0 : i32
    return %arg0, %c0_i32 : i32, i32
  }
  func.func @transform_6(%arg0: i32) -> (i32, i32) {
    %c0_i32 = arith.constant 0 : i32
    %c0_i32_0 = arith.constant 0 : i32
    return %arg0, %c0_i32 : i32, i32
  }
  func.func @transform_7(%arg0: i32) -> (i32, i32) {
    %c0_i32 = arith.constant 0 : i32
    %c0_i32_0 = arith.constant 0 : i32
    return %arg0, %c0_i32 : i32, i32
  }
  func.func @transform_8(%arg0: i32) -> (i32, i32) {
    %c0_i32 = arith.constant 0 : i32
    %c0_i32_0 = arith.constant 0 : i32
    return %arg0, %c0_i32 : i32, i32
  }
  func.func @transform_9(%arg0: i32) -> (i32, i32) {
    %c0_i32 = arith.constant 0 : i32
    %c0_i32_0 = arith.constant 0 : i32
    %c0_i32_1 = arith.constant 0 : i32
    return %c0_i32, %c0_i32_0 : i32, i32
  }
  func.func @transform_10(%arg0: i32) -> (i32, i32) {
    %c0_i32 = arith.constant 0 : i32
    %c0_i32_0 = arith.constant 0 : i32
    %c0_i32_1 = arith.constant 0 : i32
    return %c0_i32, %c0_i32_0 : i32, i32
  }
  func.func @transform_11(%arg0: i32) -> (i32, i32) {
    %c0_i32 = arith.constant 0 : i32
    %c0_i32_0 = arith.constant 0 : i32
    %c0_i32_1 = arith.constant 0 : i32
    return %c0_i32, %c0_i32_0 : i32, i32
  }
  func.func @transform_12(%arg0: i32) -> (i32, i32) {
    %c0_i32 = arith.constant 0 : i32
    %c0_i32_0 = arith.constant 0 : i32
    %c0_i32_1 = arith.constant 0 : i32
    return %c0_i32, %c0_i32_0 : i32, i32
  }
  func.func @transform_13(%arg0: i32) -> (i32, i32) {
    %c0_i32 = arith.constant 0 : i32
    %c0_i32_0 = arith.constant 0 : i32
    %c0_i32_1 = arith.constant 0 : i32
    return %c0_i32, %c0_i32_0 : i32, i32
  }
  func.func @transform_14(%arg0: i32) -> (i32, i32) {
    %c0_i32 = arith.constant 0 : i32
    %c0_i32_0 = arith.constant 0 : i32
    %c0_i32_1 = arith.constant 0 : i32
    return %c0_i32, %c0_i32_0 : i32, i32
  }
  func.func @transform_15(%arg0: i32) -> (i32, i32) {
    %c0_i32 = arith.constant 0 : i32
    %c0_i32_0 = arith.constant 0 : i32
    return %arg0, %c0_i32 : i32, i32
  }
}

module attributes {stable_mosaic.version = 11 : i64} {
  func.func @_head3_kernel(%arg0: i32, %arg1: memref<8x32xbf16, #tpu.memory_space<vmem>>, %arg2: memref<32x32xbf16, #tpu.memory_space<vmem>>, %arg3: memref<1x32xf32, #tpu.memory_space<vmem>>, %arg4: memref<32x32xbf16, #tpu.memory_space<vmem>>, %arg5: memref<1x32xf32, #tpu.memory_space<vmem>>, %arg6: memref<32x2xbf16, #tpu.memory_space<vmem>>, %arg7: memref<1x2xf32, #tpu.memory_space<vmem>>, %arg8: memref<8x2xf32, #tpu.memory_space<vmem>>) attributes {dimension_semantics = [#tpu.dimension_semantics<parallel>], iteration_bounds = array<i64: 2>, scalar_prefetch = 0 : i64, scratch_operands = 0 : i64, tpu.core_type = #tpu.core_type<tc>, window_params = [{transform_indices = @transform_0, window_bounds = array<i64: 8, 32>}, {pipeline_mode = #tpu.pipeline_mode<synchronous>, transform_indices = @transform_1, window_bounds = array<i64: 32, 32>}, {pipeline_mode = #tpu.pipeline_mode<synchronous>, transform_indices = @transform_2, window_bounds = array<i64: 1, 32>}, {pipeline_mode = #tpu.pipeline_mode<synchronous>, transform_indices = @transform_3, window_bounds = array<i64: 32, 32>}, {pipeline_mode = #tpu.pipeline_mode<synchronous>, transform_indices = @transform_4, window_bounds = array<i64: 1, 32>}, {pipeline_mode = #tpu.pipeline_mode<synchronous>, transform_indices = @transform_5, window_bounds = array<i64: 32, 2>}, {pipeline_mode = #tpu.pipeline_mode<synchronous>, transform_indices = @transform_6, window_bounds = array<i64: 1, 2>}, {transform_indices = @transform_7, window_bounds = array<i64: 8, 2>}]} {
    %c0 = arith.constant 0 : index
    %c0_0 = arith.constant 0 : index
    %0 = vector.load %arg1[%c0, %c0_0] : memref<8x32xbf16, #tpu.memory_space<vmem>>, vector<8x32xbf16>
    %c0_1 = arith.constant 0 : index
    %c0_2 = arith.constant 0 : index
    %1 = vector.load %arg2[%c0_1, %c0_2] : memref<32x32xbf16, #tpu.memory_space<vmem>>, vector<32x32xbf16>
    %cst = arith.constant dense<0.000000e+00> : vector<8x32xf32>
    %2 = tpu.matmul %0, %1, %cst {dimension_numbers = #tpu.dot_dimension_numbers<[1], [0], [0], [1], [0, 0, 1, 1], [], []>} : vector<8x32xbf16>, vector<32x32xbf16>, vector<8x32xf32> -> vector<8x32xf32>
    %c0_3 = arith.constant 0 : index
    %c0_4 = arith.constant 0 : index
    %3 = vector.load %arg3[%c0_3, %c0_4] : memref<1x32xf32, #tpu.memory_space<vmem>>, vector<1x32xf32>
    %4 = vector.broadcast %3 : vector<1x32xf32> to vector<8x32xf32>
    %5 = arith.addf %2, %4 : vector<8x32xf32>
    %cst_5 = arith.constant 0.000000e+00 : f32
    %6 = vector.broadcast %cst_5 : f32 to vector<8x32xf32>
    %7 = arith.maximumf %5, %6 : vector<8x32xf32>
    %8 = arith.truncf %7 : vector<8x32xf32> to vector<8x32xbf16>
    %c0_6 = arith.constant 0 : index
    %c0_7 = arith.constant 0 : index
    %9 = vector.load %arg4[%c0_6, %c0_7] : memref<32x32xbf16, #tpu.memory_space<vmem>>, vector<32x32xbf16>
    %cst_8 = arith.constant dense<0.000000e+00> : vector<8x32xf32>
    %10 = tpu.matmul %8, %9, %cst_8 {dimension_numbers = #tpu.dot_dimension_numbers<[1], [0], [0], [1], [0, 0, 1, 1], [], []>} : vector<8x32xbf16>, vector<32x32xbf16>, vector<8x32xf32> -> vector<8x32xf32>
    %c0_9 = arith.constant 0 : index
    %c0_10 = arith.constant 0 : index
    %11 = vector.load %arg5[%c0_9, %c0_10] : memref<1x32xf32, #tpu.memory_space<vmem>>, vector<1x32xf32>
    %12 = vector.broadcast %11 : vector<1x32xf32> to vector<8x32xf32>
    %13 = arith.addf %10, %12 : vector<8x32xf32>
    %14 = arith.truncf %13 : vector<8x32xf32> to vector<8x32xbf16>
    %c0_11 = arith.constant 0 : index
    %c0_12 = arith.constant 0 : index
    %15 = vector.load %arg6[%c0_11, %c0_12] : memref<32x2xbf16, #tpu.memory_space<vmem>>, vector<32x2xbf16>
    %cst_13 = arith.constant dense<0.000000e+00> : vector<8x2xf32>
    %16 = tpu.matmul %14, %15, %cst_13 {dimension_numbers = #tpu.dot_dimension_numbers<[1], [0], [0], [1], [0, 0, 1, 1], [], []>} : vector<8x32xbf16>, vector<32x2xbf16>, vector<8x2xf32> -> vector<8x2xf32>
    %c0_14 = arith.constant 0 : index
    %c0_15 = arith.constant 0 : index
    %17 = vector.load %arg7[%c0_14, %c0_15] : memref<1x2xf32, #tpu.memory_space<vmem>>, vector<1x2xf32>
    %18 = vector.broadcast %17 : vector<1x2xf32> to vector<8x2xf32>
    %19 = arith.addf %16, %18 : vector<8x2xf32>
    %c0_16 = arith.constant 0 : index
    %c0_17 = arith.constant 0 : index
    %20 = vector.load %arg8[%c0_16, %c0_17] : memref<8x2xf32, #tpu.memory_space<vmem>>, vector<8x2xf32>
    tpu.vector_store %arg8[%c0_16, %c0_17], %19 {strides = array<i32>} : memref<8x2xf32, #tpu.memory_space<vmem>>, vector<8x2xf32>,
    return
  }
  func.func @transform_0(%arg0: i32) -> (i32, i32) {
    %c0_i32 = arith.constant 0 : i32
    %c0_i32_0 = arith.constant 0 : i32
    return %arg0, %c0_i32 : i32, i32
  }
  func.func @transform_1(%arg0: i32) -> (i32, i32) {
    %c0_i32 = arith.constant 0 : i32
    %c0_i32_0 = arith.constant 0 : i32
    %c0_i32_1 = arith.constant 0 : i32
    return %c0_i32, %c0_i32_0 : i32, i32
  }
  func.func @transform_2(%arg0: i32) -> (i32, i32) {
    %c0_i32 = arith.constant 0 : i32
    %c0_i32_0 = arith.constant 0 : i32
    %c0_i32_1 = arith.constant 0 : i32
    return %c0_i32, %c0_i32_0 : i32, i32
  }
  func.func @transform_3(%arg0: i32) -> (i32, i32) {
    %c0_i32 = arith.constant 0 : i32
    %c0_i32_0 = arith.constant 0 : i32
    %c0_i32_1 = arith.constant 0 : i32
    return %c0_i32, %c0_i32_0 : i32, i32
  }
  func.func @transform_4(%arg0: i32) -> (i32, i32) {
    %c0_i32 = arith.constant 0 : i32
    %c0_i32_0 = arith.constant 0 : i32
    %c0_i32_1 = arith.constant 0 : i32
    return %c0_i32, %c0_i32_0 : i32, i32
  }
  func.func @transform_5(%arg0: i32) -> (i32, i32) {
    %c0_i32 = arith.constant 0 : i32
    %c0_i32_0 = arith.constant 0 : i32
    %c0_i32_1 = arith.constant 0 : i32
    return %c0_i32, %c0_i32_0 : i32, i32
  }
  func.func @transform_6(%arg0: i32) -> (i32, i32) {
    %c0_i32 = arith.constant 0 : i32
    %c0_i32_0 = arith.constant 0 : i32
    %c0_i32_1 = arith.constant 0 : i32
    return %c0_i32, %c0_i32_0 : i32, i32
  }
  func.func @transform_7(%arg0: i32) -> (i32, i32) {
    %c0_i32 = arith.constant 0 : i32
    %c0_i32_0 = arith.constant 0 : i32
    return %arg0, %c0_i32 : i32, i32
  }
}

</mosaic_0001>

<bundles_post_ra>
// kernel: run.33
= control target key start
LH: loop header
LB: loop body
LE: loop exit
PB: predicated region body
PF: predicated region fallthrough
CT: control target
= control target key end

     0   :  { %s345_s12 = smov 0   ;;  %s368_s0 = inlined_call_operand.vmem [shape: f32[10,5], index: 0, kind: input, shape index: {}]   ;;  %s369_s1 = inlined_call_operand.vmem [shape: bf16[5,32], index: 1, kind: input, shape index: {}]   ;;  %s370_s2 = inlined_call_operand.vmem [shape: f32[1,32], index: 2, kind: input, shape index: {}]   ;;  %s371_s3 = inlined_call_operand.vmem [shape: bf16[10,32], index: 3, kind: output, shape index: {}]  }
   0x1 LB: > { %s284_s13 = sadd.s32 4294967295, %s320_s12   ;;  %p288_p0 = scmp.ge.s32.totalorder %s320_s12, 1  ;;  %s320_s12 = sphi %s345_s12, %s13_s12  }
   0x2   : > { %p136_p1 = scmp.lt.s32.totalorder %s320_s12, 3 }
   0x4   : > { %p137_p2 = pnand %p288_p0, %p136_p1 }
   0x5   : > { %v167_v0 = vld [vmem:[%s369_s1] sm:$0x7] (!%p137_p2)  ;;  %vm181_vm0 = vcmask (!%p137_p2), 1041408   ;;  %vm182_vm1 = vcmask (!%p137_p2), 1042432   ;;  %v322_v1 = vmov (!%p137_p2), 0.0   ;;  %v323_v2 = vmov (!%p137_p2), 65535  }
   0x6   : > { %140 = sbr.rel (%p137_p2) target bundleno = 236 (0xec), region = 32  ;;  %297 = vmatprep.subr.bf16.mxu0 (!%p137_p2), %v322_v1  ;;  %v183_v3 = vsel (!%p137_p2), %vm181_vm0, 4294967295, %v323_v2  ;;  %p158_p3 = scmp.lt.s32.totalorder (!%p137_p2), %s284_s13, 1  ;;  %vm324_vm2 = vmmov (!%p137_p2), 0   ;;  %vm177_vm3 = vcmask (!%p137_p2), 39936   ;;  %vm229_vm4 = vcmask (!%p137_p2), 257024  }
   0x7   : > { %v184_v4 = vsel (!%p137_p2), %vm182_vm1, %v183_v3, 0  ;;  %299 = vmatprep.mubr.msk.bf16.mxu0 (!%p137_p2), %vm324_vm2, %v322_v1  ;;  %v291_v8 = vld [vmem:[%s370_s2] ss:$0 sm:$0xff] (!%p137_p2) }
   0x8   : > { %v186_v5 = vand.u32 (!%p137_p2), %v184_v4, %v167_v0 }
   0xa   : > { %298 = vmatpush3.bf16.msra.mxu0 (!%p137_p2), %v186_v5 }
   0xd   : > { %s373_s13 = smov (!%p158_p3, %s284_s13), 1 }
   0xe   : > { %s289_s16 = sshll.u32 %s373_s13, 3  ;;  %s290_s22 = sshll.u32 %s373_s13, 2 }
   0xf   : > { %s161_s19 = scalar_lea.vmem %s368_s0, %s289_s16  ;;  %s165_s25 = scalar_lea.vmem %s371_s3, %s290_s22 }
  0x10   : > { %v168_v6 = vld [vmem:[%s161_s19] sm:$0xff] }
  0x11   : > { %v169_v7 = vpack.c.bf16 %v168_v6, %v168_v6 }
  0x13   : > { %300 = vmatmul.mubr.msk.bf16.vlgmr.msra.gmra.mrb[0].mxu0 %vm177_vm3, %v169_v7 }
  0xe6   : > { %v222_v9 = vpop.f32.mrb[0].mxu0 }
  0xe7   : > { %v223_v10 = vadd.f32 %v291_v8, %v222_v9  ;;  %v301_v11 = vpop.f32.mrb[1].mxu0 }
  0xe8   : > { %v225_v12 = vpop.f32.mrb[2].mxu0 }
  0xe9   : > { %v228_v13 = vpack.c.bf16 %v223_v10, %v223_v10  ;;  %v302_v14 = vpop.f32.mrb[3].mxu0 }
  0xeb   : > { %230 = vst.msk [vmem:[%s165_s25] sm:$0xf] %vm229_vm4, %v228_v13 }
  0xec PF: > { %s13_s12 = sadd.s32 1, %s320_s12  }
  0xed   : > { %p10_p4 = scmp.ge.s32.totalorder %s13_s12, 4  }
  0xef   :  { %12 = sbr.rel (!%p10_p4) target bundleno = 1 (0x1), region = 62 }

// kernel: run.32
= control target key start
LH: loop header
LB: loop body
LE: loop exit
PB: predicated region body
PF: predicated region fallthrough
CT: control target
= control target key end

     0   :  { %s340_s12 = smov 0   ;;  %s363_s0 = inlined_call_operand.vmem [shape: f32[12,6], index: 0, kind: input, shape index: {}]   ;;  %s364_s1 = inlined_call_operand.vmem [shape: bf16[6,32], index: 1, kind: input, shape index: {}]   ;;  %s365_s2 = inlined_call_operand.vmem [shape: f32[1,32], index: 2, kind: input, shape index: {}]   ;;  %s366_s3 = inlined_call_operand.vmem [shape: bf16[12,32], index: 3, kind: output, shape index: {}]  }
   0x1 LB: > { %s281_s13 = sadd.s32 4294967295, %s316_s12   ;;  %p285_p0 = scmp.ge.s32.totalorder %s316_s12, 1  ;;  %s316_s12 = sphi %s340_s12, %s13_s12  }
   0x2   : > { %p136_p1 = scmp.lt.s32.totalorder %s316_s12, 3 }
   0x4   : > { %p137_p2 = pnand %p285_p0, %p136_p1 }
   0x5   : > { %v167_v0 = vld [vmem:[%s364_s1] sm:$0x7] (!%p137_p2)  ;;  %vm181_vm0 = vcmask (!%p137_p2), 1042432   ;;  %p158_p3 = scmp.lt.s32.totalorder (!%p137_p2), %s281_s13, 1  ;;  %v318_v1 = vmov (!%p137_p2), 0.0   ;;  %vm319_vm1 = vmmov (!%p137_p2), 0  }
   0x6   : > { %140 = sbr.rel (%p137_p2) target bundleno = 236 (0xec), region = 32  ;;  %294 = vmatprep.subr.bf16.mxu0 (!%p137_p2), %v318_v1  ;;  %v183_v2 = vsel (!%p137_p2), %vm181_vm0, %v167_v0, 0  ;;  %296 = vmatprep.mubr.msk.bf16.mxu0 (!%p137_p2), %vm319_vm1, %v318_v1  ;;  %vm177_vm2 = vcmask (!%p137_p2), 48128   ;;  %v288_v5 = vld [vmem:[%s365_s2] ss:$0 sm:$0xff] (!%p137_p2)  ;;  %vm226_vm3 = vcmask (!%p137_p2), 257024  }
   0x7   : > { %295 = vmatpush3.bf16.msra.mxu0 (!%p137_p2), %v183_v2 }
   0xd   : > { %s368_s13 = smov (!%p158_p3, %s281_s13), 1 }
   0xe   : > { %s286_s16 = sshll.u32 %s368_s13, 3  ;;  %s287_s22 = sshll.u32 %s368_s13, 2 }
   0xf   : > { %s161_s19 = scalar_lea.vmem %s363_s0, %s286_s16  ;;  %s165_s25 = scalar_lea.vmem %s366_s3, %s287_s22 }
  0x10   : > { %v168_v3 = vld [vmem:[%s161_s19] sm:$0xff] }
  0x11   : > { %v169_v4 = vpack.c.bf16 %v168_v3, %v168_v3 }
  0x13   : > { %297 = vmatmul.mubr.msk.bf16.vlgmr.msra.gmra.mrb[0].mxu0 %vm177_vm2, %v169_v4 }
  0xe6   : > { %v219_v6 = vpop.f32.mrb[0].mxu0 }
  0xe7   : > { %v220_v7 = vadd.f32 %v288_v5, %v219_v6  ;;  %v298_v8 = vpop.f32.mrb[1].mxu0 }
  0xe8   : > { %v222_v9 = vpop.f32.mrb[2].mxu0 }
  0xe9   : > { %v225_v10 = vpack.c.bf16 %v220_v7, %v220_v7  ;;  %v299_v11 = vpop.f32.mrb[3].mxu0 }
  0xeb   : > { %227 = vst.msk [vmem:[%s165_s25] sm:$0xf] %vm226_vm3, %v225_v10 }
  0xec PF: > { %s13_s12 = sadd.s32 1, %s316_s12  }
  0xed   : > { %p10_p4 = scmp.ge.s32.totalorder %s13_s12, 4  }
  0xef   :  { %12 = sbr.rel (!%p10_p4) target bundleno = 1 (0x1), region = 62 }

// kernel: run.34
= control target key start
LH: loop header
LB: loop body
LE: loop exit
PB: predicated region body
PF: predicated region fallthrough
CT: control target
= control target key end

     0   :  { %s844_s29 = smov 0   ;;  %s904_s0 = inlined_call_operand.vmem [shape: bf16[32,32], index: 0, kind: input, shape index: {}]   ;;  %s905_s1 = inlined_call_operand.vmem [shape: bf16[32,32], index: 1, kind: input, shape index: {}]   ;;  %s906_s2 = inlined_call_operand.vmem [shape: bf16[64,64], index: 2, kind: input, shape index: {}]   ;;  %s907_s3 = inlined_call_operand.vmem [shape: f32[1,64], index: 3, kind: input, shape index: {}]   ;;  %s908_s4 = inlined_call_operand.vmem [shape: bf16[64,128], index: 4, kind: input, shape index: {}]   ;;  %s909_s5 = inlined_call_operand.vmem [shape: f32[1,128], index: 5, kind: input, shape index: {}]   ;;  %s910_s6 = inlined_call_operand.vmem [shape: f32[1,64], index: 6, kind: input, shape index: {}]   ;;  %s911_s7 = inlined_call_operand.<no memory space> [shape: f32[1,1], index: 7, kind: input, shape index: {}]   ;;  %s912_s8 = inlined_call_operand.vmem [shape: f32[32,128], index: 8, kind: output, shape index: {}]  }
   0x1   :  { %v13_v0 = vstv %s911_s7 }
   0x2   :  { %14 = vst [vmem:[#allocation2] sm:$0x1] %v13_v0 }
   0x3 LB: > { %s683_s30 = sadd.s32 4294967295, %s791_s29   ;;  %p687_p0 = scmp.ge.s32.totalorder %s791_s29, 1  ;;  %s791_s29 = sphi %s844_s29, %s20_s29  }
   0x4   : > { %p276_p1 = scmp.lt.s32.totalorder %s791_s29, 3 }
   0x6   : > { %p277_p2 = pnand %p687_p0, %p276_p1 }
   0x7   : > { %v767_v1 = vld [vmem:[%s906_s2 + $0x10] sm:$0xff] (!%p277_p2)   ;;  %v793_v2 = vmov (!%p277_p2), 0.0   ;;  %v768_v3 = vld [vmem:[%s906_s2 + $0x18] sm:$0xff] (!%p277_p2)   ;;  %vm794_vm0 = vmmov (!%p277_p2), 0   ;;  %s688_s12 = sshll.u32 (!%p277_p2), %s683_s30, 1  ;;  %vm363_vm1 = vcmask (!%p277_p2), 261120  }
   0x8   : > { %280 = sbr.rel (%p277_p2) target bundleno = 553 (0x229), region = 52  ;;  %726 = vmatprep.subr.bf16.mxu1 (!%p277_p2), %v793_v2  ;;  %742 = vmatprep.subr.bf16.mxu0 (!%p277_p2), %v793_v2  ;;  %p316_p3 = scmp.lt.s32.totalorder (!%p277_p2), %s688_s12, 3  ;;  %v770_v4 = vld [vmem:[%s906_s2] sm:$0xff] (!%p277_p2)   ;;  %v771_v6 = vld [vmem:[%s906_s2 + $0x8] sm:$0xff] (!%p277_p2)   ;;  %v775_v10 = vld [vmem:[%s908_s4 + $0x10] sm:$0xff] (!%p277_p2)   ;;  %vm520_vm2 = vcmask (!%p277_p2), 523264  }
   0x9   : > { %727 = vmatpush3.bf16.msra.mxu1 (!%p277_p2), %v767_v1  ;;  %730 = vmatprep.mubr.msk.bf16.mxu1 (!%p277_p2), %vm794_vm0, %v793_v2  ;;  %v773_v8 = vld [vmem:[%s908_s4] sm:$0xff] (!%p277_p2)   ;;  %v774_v9 = vld [vmem:[%s908_s4 + $0x8] sm:$0xff] (!%p277_p2)   ;;  %v776_v11 = vld [vmem:[%s908_s4 + $0x18] sm:$0xff] (!%p277_p2)   ;;  %v795_v33 = vmov (!%p277_p2), 0  }
   0xa   : > { %728 = vmatprep.subr.bf16.mxu1 (!%p277_p2), %v793_v2  ;;  %750 = vmatprep.mubr.msk.bf16.mxu0 (!%p277_p2), %vm794_vm0, %v793_v2  ;;  %v702_v17 = vld [vmem:[%s907_s3] ss:$0 sm:$0xff] (!%p277_p2) }
   0xb   : > { %743 = vmatpush3.bf16.msra.mxu0 (!%p277_p2), %v773_v8  ;;  %v709_v24 = vld [vmem:[%s910_s6] ss:$0 sm:$0xff] (!%p277_p2)  ;;  %765 = vset.pattern.permute.xlu1 (!%p277_p2), %v795_v33 }
   0xc   : > { %744 = vmatprep.subr.bf16.mxu0 (!%p277_p2), %v793_v2  ;;  %766 = vset.pattern.permute.xlu0 (!%p277_p2), %v795_v33  ;;  %v710_v34 = vld [vmem:[#allocation2] ss:$0 sm:$0xff] (!%p277_p2) }
   0xd   : > { %729 = vmatpush3.bf16.msra.mxu1 (!%p277_p2), %v768_v3  ;;  %v703_v51 = vld [vmem:[%s909_s5] ss:$0 sm:$0xff] (!%p277_p2) }
   0xe   : > { %734 = vmatprep.subr.bf16.mxu1 (!%p277_p2), %v793_v2 }
   0xf   : > { %s914_s12 = smov (!%p316_p3, %s688_s12), 3  ;;  %745 = vmatpush3.bf16.msra.mxu0 %v774_v9 }
  0x10   : > { %s689_s13 = sshll.u32 %s914_s12, 2  ;;  %746 = vmatprep.subr.bf16.mxu0 %v793_v2  ;;  %s693_s17 = sshll.u32 %s914_s12, 3 }
  0x11   : > { %s319_s16 = scalar_lea.vmem %s904_s0, %s689_s13  ;;  %s325_s19 = scalar_lea.vmem %s905_s1, %s689_s13 }
  0x12   : > { %v769_v5 = vld [vmem:[%s325_s19] sm:$0xff]   ;;  %s331_s20 = scalar_lea.vmem %s912_s8, %s693_s17 }
  0x13   : > { %731 = vmatmul.mubr.msk.bf16.vlgmr.msra.gmra.mrb[0].mxu1 %vm363_vm1, %v769_v5  ;;  %v772_v7 = vld [vmem:[%s319_s16] sm:$0xff]   ;;  %747 = vmatpush3.bf16.msra.mxu0 %v775_v10 }
  0x14   : > { %735 = vmatpush3.bf16.msra.mxu1 %v770_v4  ;;  %738 = vmatprep.mubr.msk.bf16.mxu1 %vm794_vm0, %v793_v2 }
  0x15   : > { %736 = vmatprep.subr.bf16.mxu1 %v793_v2  ;;  %748 = vmatprep.subr.bf16.mxu0 %v793_v2 }
  0x17   : > { %749 = vmatpush3.bf16.msra.mxu0 %v776_v11 }
  0x18   : > { %737 = vmatpush3.bf16.msra.mxu1 %v771_v6 }
  0x1b   : > { %739 = vmatmul.mubr.msk.bf16.vlgmr.msra.gmra.mrb[4].mxu1 %vm363_vm1, %v772_v7 }
  0xe6   : > { %v401_v12 = vpop.f32.mrb[0].mxu1 }
  0xe7   : > { %v732_v13 = vpop.f32.mrb[1].mxu1 }
  0xe8   : > { %v404_v14 = vpop.f32.mrb[2].mxu1 }
  0xe9   : > { %v733_v15 = vpop.f32.mrb[3].mxu1 }
  0xee   : > { %v462_v16 = vpop.f32.mrb[4].mxu1 }
  0xef   : > { %v463_v18 = vadd.f32 %v462_v16, %v401_v12  ;;  %v740_v19 = vpop.f32.mrb[5].mxu1 }
  0xf0   : > { %v465_v20 = vpop.f32.mrb[6].mxu1 }
  0xf1   : > { %v476_v21 = vadd.f32 %v702_v17, %v463_v18  ;;  %v466_v22 = vadd.f32 %v465_v20, %v404_v14  ;;  %v741_v23 = vpop.f32.mrb[7].mxu1 }
  0xf3   : > { %v478_v25 = vmax.f32 %v476_v21, 0.0  ;;  %v477_v26 = vadd.f32 %v702_v17, %v466_v22 }
  0xf5   : > { %v479_v27 = vmax.f32 %v477_v26, 0.0  ;;  %v572_v28 = vmul.f32 %v709_v24, %v478_v25 }
  0xf7   : > { %v480_v29 = vpack.c.bf16 %v479_v27, %v478_v25  ;;  %v574_v30 = vsel %vm520_vm2, %v572_v28, 0.0  ;;  %v573_v31 = vmul.f32 %v709_v24, %v479_v27 }
  0xf8   : > { %575 = vadd.xlane.f32.xlu0 %v574_v30 }
  0xf9   : > { %751 = vmatmul.mubr.msk.bf16.vlgmr.msra.gmra.mrb[0].mxu0 %vm520_vm2, %v480_v29  ;;  %v577_v32 = vsel %vm520_vm2, %v573_v31, 0.0 }
  0xfc   : > { %578 = vadd.xlane.f32.xlu0 %v577_v32 }
 0x185   : > { %v576_v35 = vpop.xlane.xlu0 %575 }
 0x186   : > { %v587_v36 = vadd.f32 %v710_v34, %v576_v35 }
 0x188   : > { %v711_v37 = vmul.f32 -1.442695, %v587_v36 }
 0x189   : > { %v579_v38 = vpop.xlane.xlu0 %578 }
 0x18a   : > { %777 = vpow2.f32 %v711_v37  ;;  %v588_v39 = vadd.f32 %v710_v34, %v579_v38 }
 0x18c   : > { %v712_v40 = vmul.f32 -1.442695, %v588_v39 }
 0x18e   : > { %779 = vpow2.f32 %v712_v40 }
 0x194   : > { %v778_v41 = vpop.eup %777 }
 0x195   : > { %v595_v42 = vadd.f32 1.0, %v778_v41 }
 0x197   : > { %781 = vrcp.f32 %v595_v42 }
 0x198   : > { %v780_v43 = vpop.eup %779 }
 0x199   : > { %v596_v44 = vadd.f32 1.0, %v780_v43 }
 0x19b   : > { %783 = vrcp.f32 %v596_v44 }
 0x1a1   : > { %v782_v45 = vpop.eup %781 }
 0x1a2   : > { %603 = vperm.xlu1 %765, %v782_v45  }
 0x1a5   : > { %v784_v46 = vpop.eup %783 }
 0x1a6   : > { %608 = vperm.xlu1 %765, %v784_v46  }
 0x1cc   : > { %v558_v47 = vpop.f32.mrb[0].mxu0 }
 0x1cd   : > { %v752_v48 = vpop.f32.mrb[1].mxu0  ;;  %v559_v52 = vadd.f32 %v703_v51, %v558_v47 }
 0x1ce   : > { %v561_v49 = vpop.f32.mrb[2].mxu0 }
 0x1cf   : > { %v753_v50 = vpop.f32.mrb[3].mxu0  ;;  %v562_v55 = vadd.f32 %v703_v51, %v561_v49 }
 0x221   : > { %v604_v53 = vpop.permute.xlu1 %603 }
 0x222   : > { %v611_v54 = vmul.f32 %v604_v53, %v559_v52 }
 0x224   : > { %613 = vst [vmem:[%s331_s20] sm:$0xff] %v611_v54 }
 0x225   : > { %v609_v56 = vpop.permute.xlu1 %608 }
 0x226   : > { %v612_v57 = vmul.f32 %v609_v56, %v562_v55 }
 0x228   : > { %614 = vst [vmem:[%s331_s20 + $0x8] sm:$0xff] %v612_v57 }
 0x229 PF: > { %s20_s29 = sadd.s32 1, %s791_s29  }
 0x22a   : > { %p17_p4 = scmp.ge.s32.totalorder %s20_s29, 4  }
 0x22c   :  { %19 = sbr.rel (!%p17_p4) target bundleno = 3 (0x3), region = 85 }

// kernel: run.35
= control target key start
LH: loop header
LB: loop body
LE: loop exit
PB: predicated region body
PF: predicated region fallthrough
CT: control target
= control target key end

     0   :  { %s1302_s17 = smov 0   ;;  %s1446_s0 = inlined_call_operand.vmem [shape: bf16[12,32], index: 0, kind: input, shape index: {}]   ;;  %s1447_s1 = inlined_call_operand.vmem [shape: f32[12,64], index: 1, kind: input, shape index: {}]   ;;  %s1448_s2 = inlined_call_operand.vmem [shape: f32[12,32], index: 2, kind: input, shape index: {}]   ;;  %s1449_s3 = inlined_call_operand.vmem [shape: f32[12,32], index: 3, kind: input, shape index: {}]   ;;  %s1450_s4 = inlined_call_operand.vmem [shape: f32[12,1], index: 4, kind: input, shape index: {}]   ;;  %s1451_s5 = inlined_call_operand.vmem [shape: bf16[160,32], index: 5, kind: input, shape index: {}]   ;;  %s1452_s6 = inlined_call_operand.vmem [shape: f32[1,32], index: 6, kind: input, shape index: {}]   ;;  %s1453_s7 = inlined_call_operand.vmem [shape: bf16[64,32], index: 7, kind: input, shape index: {}]   ;;  %s1454_s8 = inlined_call_operand.vmem [shape: f32[1,32], index: 8, kind: input, shape index: {}]   ;;  %s1455_s9 = inlined_call_operand.vmem [shape: bf16[32,32], index: 9, kind: input, shape index: {}]   ;;  %s1456_s10 = inlined_call_operand.vmem [shape: f32[1,32], index: 10, kind: input, shape index: {}]   ;;  %s1457_s11 = inlined_call_operand.vmem [shape: bf16[12,32], index: 11, kind: output, shape index: {}]  }
   0x1 LB: > { %s1073_s18 = sadd.s32 4294967295, %s1236_s17   ;;  %p1077_p0 = scmp.ge.s32.totalorder %s1236_s17, 1  ;;  %s1236_s17 = sphi %s1302_s17, %s21_s17  }
   0x2   : > { %p372_p1 = scmp.lt.s32.totalorder %s1236_s17, 3 }
   0x4   : > { %p373_p2 = pnand %p1077_p0, %p372_p1 }
   0x5   : > { %p426_p3 = scmp.lt.s32.totalorder (!%p373_p2), %s1073_s18, 1  ;;  %v1238_v0 = vmov (!%p373_p2), 0   ;;  %v1239_v1 = vmov (!%p373_p2), 0.0   ;;  %v1214_v2 = vld [vmem:[%s1451_s5 + $0x10] sm:$0xff] (!%p373_p2)   ;;  %v1215_v3 = vld [vmem:[%s1451_s5] sm:$0xff] (!%p373_p2)   ;;  %vm1240_vm0 = vmmov (!%p373_p2), 0  }
   0x6   : > { %376 = sbr.rel (%p373_p2) target bundleno = 814 (0x32e), region = 64  ;;  %1213 = vset.pattern.permute.xlu0 (!%p373_p2), %v1238_v0  ;;  %1137 = vmatprep.subr.bf16.mxu0 (!%p373_p2), %v1239_v1  ;;  %v1216_v4 = vld [vmem:[%s1451_s5 + $0x18] sm:$0xff] (!%p373_p2)   ;;  %v1217_v5 = vld [vmem:[%s1451_s5 + $0x8] sm:$0xff] (!%p373_p2)   ;;  %vm498_vm1 = vcmask (!%p373_p2), 261120   ;;  %v1218_v9 = vld [vmem:[%s1451_s5 + $0x20] sm:$0xff] (!%p373_p2)   ;;  %vm970_vm4 = vcmask (!%p373_p2), 257024  }
   0x7   : > { %1145 = vmatprep.subr.bf16.mxu1 (!%p373_p2), %v1239_v1  ;;  %1141 = vmatprep.mubr.msk.bf16.mxu0 (!%p373_p2), %vm1240_vm0, %v1239_v1  ;;  %v1219_v12 = vld [vmem:[%s1451_s5 + $0x30] sm:$0xff] (!%p373_p2)   ;;  %v1220_v13 = vld [vmem:[%s1451_s5 + $0x28] sm:$0xff] (!%p373_p2)   ;;  %v1221_v14 = vld [vmem:[%s1451_s5 + $0x38] sm:$0xff] (!%p373_p2)  }
   0x8   : > { %1138 = vmatpush3.bf16.msra.mxu0 (!%p373_p2), %v1214_v2  ;;  %1149 = vmatprep.mubr.msk.bf16.mxu1 (!%p373_p2), %vm1240_vm0, %v1239_v1  ;;  %v1222_v20 = vld [vmem:[%s1451_s5 + $0x40] sm:$0xff] (!%p373_p2)   ;;  %v1223_v23 = vld [vmem:[%s1451_s5 + $0x48] sm:$0xff] (!%p373_p2)   ;;  %v1225_v35 = vld [vmem:[%s1453_s7 + $0x10] sm:$0xff] (!%p373_p2)  }
   0x9   : > { %1139 = vmatprep.subr.bf16.mxu0 (!%p373_p2), %v1239_v1  ;;  %1146 = vmatpush3.bf16.msra.mxu1 (!%p373_p2), %v1215_v3  ;;  %v1224_v34 = vld [vmem:[%s1453_s7] sm:$0xff] (!%p373_p2)   ;;  %v1226_v36 = vld [vmem:[%s1453_s7 + $0x8] sm:$0xff] (!%p373_p2)   ;;  %v1227_v37 = vld [vmem:[%s1453_s7 + $0x18] sm:$0xff] (!%p373_p2)  }
   0xa   : > { %1147 = vmatprep.subr.bf16.mxu1 (!%p373_p2), %v1239_v1  ;;  %v1099_v48 = vld [vmem:[%s1452_s6] ss:$0 sm:$0xff] (!%p373_p2)  ;;  %v1229_v61 = vld [vmem:[%s1455_s9 + $0x8] sm:$0xff] (!%p373_p2)  }
   0xb   : > { %v1228_v60 = vld [vmem:[%s1455_s9] sm:$0xff] (!%p373_p2)  }
   0xc   : > { %1140 = vmatpush3.bf16.msra.mxu0 (!%p373_p2), %v1216_v4  ;;  %v1106_v63 = vld [vmem:[%s1454_s8] ss:$0 sm:$0xff] (!%p373_p2) }
   0xd   : > { %s1459_s18 = smov (!%p426_p3, %s1073_s18), 1  ;;  %1148 = vmatpush3.bf16.msra.mxu1 %v1217_v5  ;;  %1153 = vmatprep.subr.bf16.mxu0 %v1239_v1 }
   0xe   : > { %s1328_s25 = sshll.u32 %s1459_s18, 3  ;;  %s1078_s28 = sshll.u32 %s1459_s18, 2  ;;  %1161 = vmatprep.subr.bf16.mxu1 %v1239_v1 }
   0xf   : > { %s445_s12 = scalar_lea.vmem %s1450_s4, %s1328_s25  ;;  %s433_s15 = scalar_lea.vmem %s1447_s1, %s1328_s25 }
  0x10   : > { %v455_v6 = vld [vmem:[%s445_s12] sm:$0xff]  ;;  %s429_s20 = scalar_lea.vmem %s1446_s0, %s1078_s28  ;;  %s1241_s12 = smov 96  }
  0x11   : > { %v452_v7 = vld [vmem:[%s433_s15] sm:$0xff]  ;;  %vm477_vm2 = vcmp.gt.f32.partialorder %v455_v6, 0.0  ;;  %s437_s15 = scalar_lea.vmem %s1448_s2, %s1328_s25  ;;  %s449_s30 = scalar_lea.vmem %s1457_s11, %s1078_s28 }
  0x12   : > { %v1349_v8 = vld [vmem:[%s429_s20] sm:$0xf]  ;;  %v478_v10 = vsel %vm477_vm2, 1, %v1238_v0  ;;  %v485_v11 = vpack.c.bf16 %v452_v7, %v452_v7  ;;  %s441_s20 = scalar_lea.vmem %s1449_s3, %s1328_s25 }
  0x13   : > { %480 = vperm.xlu0 %1213, %v478_v10   ;;  %1150 = vmatmul.mubr.msk.bf16.vlgmr.msra.gmra.mrb[0].mxu1 %vm498_vm1, %v1349_v8  ;;  %v453_v15 = vld [vmem:[%s437_s15] sm:$0xff] }
  0x14   : > { %1142 = vmatmul.mubr.msk.bf16.vlgmr.msra.gmra.mrb[0].mxu0 %vm498_vm1, %v485_v11  ;;  %1162 = vmatpush3.bf16.msra.mxu1 %v1219_v12  ;;  %v454_v16 = vld [vmem:[%s441_s20] sm:$0xff] }
  0x15   : > { %1154 = vmatpush3.bf16.msra.mxu0 %v1218_v9  ;;  %1163 = vmatprep.subr.bf16.mxu1 %v1239_v1 }
  0x16   : > { %1155 = vmatprep.subr.bf16.mxu0 %v1239_v1  ;;  %1157 = vmatprep.mubr.msk.bf16.mxu0 %vm1240_vm0, %v1239_v1 }
  0x17   : > { %712 = vrot.lane.b32.xlu0 %v485_v11, %s1241_s12  ;;  %1165 = vmatprep.mubr.msk.bf16.mxu1 %vm1240_vm0, %v1239_v1 }
  0x18   : > { %1164 = vmatpush3.bf16.msra.mxu1 %v1221_v14 }
  0x19   : > { %1156 = vmatpush3.bf16.msra.mxu0 %v1220_v13  ;;  %1177 = vmatprep.subr.bf16.mxu1 %v1239_v1 }
  0x1a   : > { %1169 = vmatprep.subr.bf16.mxu0 %v1239_v1 }
  0x92   : > { %v481_v17 = vpop.permute.xlu0 %480 }
  0x93   : > { %vm482_vm3 = vcmp.eq.s32.totalorder %v481_v17, 1 }
  0x94   : > { %v483_v18 = vsel %vm482_vm3, %v453_v15, 0.0  ;;  %v484_v19 = vsel %vm482_vm3, %v454_v16, 0.0 }
  0x95   : > { %v597_v21 = vpack.c.bf16 %v483_v18, %v483_v18  ;;  %v654_v22 = vpack.c.bf16 %v484_v19, %v484_v19 }
  0x96   : > { %v713_v24 = vpop.permute.xlu0 %712 }
  0x97   : > { %1158 = vmatmul.mubr.msk.bf16.vlgmr.msra.gmra.mrb[4].mxu0 %vm498_vm1, %v597_v21  ;;  %1166 = vmatmul.mubr.msk.bf16.vlgmr.msra.gmra.mrb[4].mxu1 %vm498_vm1, %v654_v22 }
  0x98   : > { %1170 = vmatpush3.bf16.msra.mxu0 %v1222_v20  ;;  %1173 = vmatprep.mubr.msk.bf16.mxu0 %vm1240_vm0, %v1239_v1 }
  0x99   : > { %1171 = vmatprep.subr.bf16.mxu0 %v1239_v1  ;;  %1181 = vmatprep.mubr.msk.bf16.mxu1 %vm1240_vm0, %v1239_v1 }
  0x9a   : > { %1178 = vmatpush3.bf16.msra.mxu1 %v1225_v35 }
  0x9b   : > { %1179 = vmatprep.subr.bf16.mxu1 %v1239_v1 }
  0x9c   : > { %1172 = vmatpush3.bf16.msra.mxu0 %v1223_v23 }
  0x9d   : > { %1185 = vmatprep.subr.bf16.mxu0 %v1239_v1 }
  0x9e   : > { %1180 = vmatpush3.bf16.msra.mxu1 %v1227_v37 }
  0x9f   : > { %1174 = vmatmul.mubr.msk.bf16.vlgmr.msra.gmra.mrb[8].mxu0 %vm498_vm1, %v713_v24  ;;  %1193 = vmatprep.subr.bf16.mxu1 %v1239_v1 }
  0xa0   : > { %1189 = vmatprep.mubr.msk.bf16.mxu0 %vm1240_vm0, %v1239_v1  ;;  %1186 = vmatpush3.bf16.msra.mxu0 %v1224_v34 }
  0xa1   : > { %1187 = vmatprep.subr.bf16.mxu0 %v1239_v1 }
  0xa4   : > { %1188 = vmatpush3.bf16.msra.mxu0 %v1226_v36 }
  0xa7   : > { %1190 = vmatmul.mubr.msk.bf16.vlgmr.msra.gmra.mrb[12].mxu0 %vm498_vm1, %v1349_v8 }
  0xe6   : > { %v591_v27 = vpop.f32.mrb[0].mxu1 }
  0xe7   : > { %v536_v25 = vpop.f32.mrb[0].mxu0  ;;  %v1151_v30 = vpop.f32.mrb[1].mxu1 }
  0xe8   : > { %v1143_v26 = vpop.f32.mrb[1].mxu0  ;;  %v592_v29 = vadd.f32 %v591_v27, %v536_v25  ;;  %v594_v32 = vpop.f32.mrb[2].mxu1 }
  0xe9   : > { %v539_v28 = vpop.f32.mrb[2].mxu0  ;;  %v1152_v33 = vpop.f32.mrb[3].mxu1 }
  0xea   : > { %v1144_v31 = vpop.f32.mrb[3].mxu0 }
 0x16a   : > { %v647_v38 = vpop.f32.mrb[4].mxu0  ;;  %v704_v39 = vpop.f32.mrb[4].mxu1 }
 0x16b   : > { %v653_v40 = vadd.f32 %v647_v38, %v592_v29  ;;  %v1159_v41 = vpop.f32.mrb[5].mxu0  ;;  %v1167_v42 = vpop.f32.mrb[5].mxu1 }
 0x16c   : > { %v650_v43 = vpop.f32.mrb[6].mxu0  ;;  %v707_v44 = vpop.f32.mrb[6].mxu1 }
 0x16d   : > { %v710_v45 = vadd.f32 %v704_v39, %v653_v40  ;;  %v1160_v46 = vpop.f32.mrb[7].mxu0  ;;  %v1168_v47 = vpop.f32.mrb[7].mxu1 }
 0x172   : > { %v763_v49 = vpop.f32.mrb[8].mxu0 }
 0x173   : > { %v769_v50 = vadd.f32 %v763_v49, %v710_v45  ;;  %v1175_v51 = vpop.f32.mrb[9].mxu0 }
 0x174   : > { %v766_v52 = vpop.f32.mrb[10].mxu0 }
 0x175   : > { %v776_v53 = vadd.f32 %v1099_v48, %v769_v50  ;;  %v1176_v54 = vpop.f32.mrb[11].mxu0 }
 0x177   : > { %v785_v55 = vpack.c.bf16 %v776_v53, %v776_v53 }
 0x179   : > { %1182 = vmatmul.mubr.msk.bf16.vlgmr.msra.gmra.mrb[8].mxu1 %vm498_vm1, %v785_v55 }
 0x17a   : > { %1197 = vmatprep.mubr.msk.bf16.mxu1 %vm1240_vm0, %v1239_v1  ;;  %v887_v56 = vpop.f32.mrb[12].mxu0  ;;  %1194 = vmatpush3.bf16.msra.mxu1 %v1228_v60 }
 0x17b   : > { %v1191_v57 = vpop.f32.mrb[13].mxu0  ;;  %1195 = vmatprep.subr.bf16.mxu1 %v1239_v1  ;;  %v1107_v1 = vld [vmem:[%s1456_s10] ss:$0 sm:$0xff] }
 0x17c   : > { %v890_v58 = vpop.f32.mrb[14].mxu0 }
 0x17d   : > { %v1192_v59 = vpop.f32.mrb[15].mxu0 }
 0x17e   : > { %1196 = vmatpush3.bf16.msra.mxu1 %v1229_v61 }
 0x24c   : > { %v835_v62 = vpop.f32.mrb[8].mxu1 }
 0x24d   : > { %v888_v0 = vadd.f32 %v887_v56, %v835_v62  ;;  %v1183_v2 = vpop.f32.mrb[9].mxu1 }
 0x24e   : > { %v838_v3 = vpop.f32.mrb[10].mxu1 }
 0x24f   : > { %v900_v4 = vadd.f32 %v1106_v63, %v888_v0  ;;  %v1184_v5 = vpop.f32.mrb[11].mxu1 }
 0x251   : > { %v901_v6 = vmax.f32 %v900_v4, 0.0 }
 0x253   : > { %v902_v7 = vpack.c.bf16 %v901_v6, %v901_v6 }
 0x255   : > { %1198 = vmatmul.mubr.msk.bf16.vlgmr.msra.gmra.mrb[12].mxu1 %vm498_vm1, %v902_v7 }
 0x328   : > { %v963_v8 = vpop.f32.mrb[12].mxu1 }
 0x329   : > { %v964_v9 = vadd.f32 %v1107_v1, %v963_v8  ;;  %v1199_v10 = vpop.f32.mrb[13].mxu1 }
 0x32a   : > { %v966_v11 = vpop.f32.mrb[14].mxu1 }
 0x32b   : > { %v969_v12 = vpack.c.bf16 %v964_v9, %v964_v9  ;;  %v1200_v13 = vpop.f32.mrb[15].mxu1 }
 0x32d   : > { %971 = vst.msk [vmem:[%s449_s30] sm:$0xf] %vm970_vm4, %v969_v12 }
 0x32e PF: > { %s21_s17 = sadd.s32 1, %s1236_s17  }
 0x32f   : > { %p18_p4 = scmp.ge.s32.totalorder %s21_s17, 4  }
 0x331   :  { %20 = sbr.rel (!%p18_p4) target bundleno = 1 (0x1), region = 106 }

// kernel: run.36
= control target key start
LH: loop header
LB: loop body
LE: loop exit
PB: predicated region body
PF: predicated region fallthrough
CT: control target
= control target key end

     0   :  { %s844_s29 = smov 0   ;;  %s904_s0 = inlined_call_operand.vmem [shape: bf16[30,32], index: 0, kind: input, shape index: {}]   ;;  %s905_s1 = inlined_call_operand.vmem [shape: bf16[30,32], index: 1, kind: input, shape index: {}]   ;;  %s906_s2 = inlined_call_operand.vmem [shape: bf16[64,64], index: 2, kind: input, shape index: {}]   ;;  %s907_s3 = inlined_call_operand.vmem [shape: f32[1,64], index: 3, kind: input, shape index: {}]   ;;  %s908_s4 = inlined_call_operand.vmem [shape: bf16[64,128], index: 4, kind: input, shape index: {}]   ;;  %s909_s5 = inlined_call_operand.vmem [shape: f32[1,128], index: 5, kind: input, shape index: {}]   ;;  %s910_s6 = inlined_call_operand.vmem [shape: f32[1,64], index: 6, kind: input, shape index: {}]   ;;  %s911_s7 = inlined_call_operand.<no memory space> [shape: f32[1,1], index: 7, kind: input, shape index: {}]   ;;  %s912_s8 = inlined_call_operand.vmem [shape: f32[30,128], index: 8, kind: output, shape index: {}]  }
   0x1   :  { %v13_v0 = vstv %s911_s7 }
   0x2   :  { %14 = vst [vmem:[#allocation2] sm:$0x1] %v13_v0 }
   0x3 LB: > { %s683_s30 = sadd.s32 4294967295, %s791_s29   ;;  %p687_p0 = scmp.ge.s32.totalorder %s791_s29, 1  ;;  %s791_s29 = sphi %s844_s29, %s20_s29  }
   0x4   : > { %p276_p1 = scmp.lt.s32.totalorder %s791_s29, 3 }
   0x6   : > { %p277_p2 = pnand %p687_p0, %p276_p1 }
   0x7   : > { %v767_v1 = vld [vmem:[%s906_s2 + $0x10] sm:$0xff] (!%p277_p2)   ;;  %v793_v2 = vmov (!%p277_p2), 0.0   ;;  %v768_v3 = vld [vmem:[%s906_s2 + $0x18] sm:$0xff] (!%p277_p2)   ;;  %vm794_vm0 = vmmov (!%p277_p2), 0   ;;  %s688_s12 = sshll.u32 (!%p277_p2), %s683_s30, 1  ;;  %vm363_vm1 = vcmask (!%p277_p2), 261120  }
   0x8   : > { %280 = sbr.rel (%p277_p2) target bundleno = 553 (0x229), region = 52  ;;  %726 = vmatprep.subr.bf16.mxu1 (!%p277_p2), %v793_v2  ;;  %742 = vmatprep.subr.bf16.mxu0 (!%p277_p2), %v793_v2  ;;  %p316_p3 = scmp.lt.s32.totalorder (!%p277_p2), %s688_s12, 3  ;;  %v770_v4 = vld [vmem:[%s906_s2] sm:$0xff] (!%p277_p2)   ;;  %v771_v6 = vld [vmem:[%s906_s2 + $0x8] sm:$0xff] (!%p277_p2)   ;;  %v775_v10 = vld [vmem:[%s908_s4 + $0x10] sm:$0xff] (!%p277_p2)   ;;  %vm520_vm2 = vcmask (!%p277_p2), 523264  }
   0x9   : > { %727 = vmatpush3.bf16.msra.mxu1 (!%p277_p2), %v767_v1  ;;  %730 = vmatprep.mubr.msk.bf16.mxu1 (!%p277_p2), %vm794_vm0, %v793_v2  ;;  %v773_v8 = vld [vmem:[%s908_s4] sm:$0xff] (!%p277_p2)   ;;  %v774_v9 = vld [vmem:[%s908_s4 + $0x8] sm:$0xff] (!%p277_p2)   ;;  %v776_v11 = vld [vmem:[%s908_s4 + $0x18] sm:$0xff] (!%p277_p2)   ;;  %v795_v33 = vmov (!%p277_p2), 0  }
   0xa   : > { %728 = vmatprep.subr.bf16.mxu1 (!%p277_p2), %v793_v2  ;;  %750 = vmatprep.mubr.msk.bf16.mxu0 (!%p277_p2), %vm794_vm0, %v793_v2  ;;  %v702_v17 = vld [vmem:[%s907_s3] ss:$0 sm:$0xff] (!%p277_p2) }
   0xb   : > { %743 = vmatpush3.bf16.msra.mxu0 (!%p277_p2), %v773_v8  ;;  %v709_v24 = vld [vmem:[%s910_s6] ss:$0 sm:$0xff] (!%p277_p2)  ;;  %765 = vset.pattern.permute.xlu1 (!%p277_p2), %v795_v33 }
   0xc   : > { %744 = vmatprep.subr.bf16.mxu0 (!%p277_p2), %v793_v2  ;;  %766 = vset.pattern.permute.xlu0 (!%p277_p2), %v795_v33  ;;  %v710_v34 = vld [vmem:[#allocation2] ss:$0 sm:$0xff] (!%p277_p2) }
   0xd   : > { %729 = vmatpush3.bf16.msra.mxu1 (!%p277_p2), %v768_v3  ;;  %v703_v51 = vld [vmem:[%s909_s5] ss:$0 sm:$0xff] (!%p277_p2) }
   0xe   : > { %734 = vmatprep.subr.bf16.mxu1 (!%p277_p2), %v793_v2 }
   0xf   : > { %s914_s12 = smov (!%p316_p3, %s688_s12), 3  ;;  %745 = vmatpush3.bf16.msra.mxu0 %v774_v9 }
  0x10   : > { %s689_s13 = sshll.u32 %s914_s12, 2  ;;  %746 = vmatprep.subr.bf16.mxu0 %v793_v2  ;;  %s693_s17 = sshll.u32 %s914_s12, 3 }
  0x11   : > { %s319_s16 = scalar_lea.vmem %s904_s0, %s689_s13  ;;  %s325_s19 = scalar_lea.vmem %s905_s1, %s689_s13 }
  0x12   : > { %v769_v5 = vld [vmem:[%s325_s19] sm:$0xff]   ;;  %s331_s20 = scalar_lea.vmem %s912_s8, %s693_s17 }
  0x13   : > { %731 = vmatmul.mubr.msk.bf16.vlgmr.msra.gmra.mrb[0].mxu1 %vm363_vm1, %v769_v5  ;;  %v772_v7 = vld [vmem:[%s319_s16] sm:$0xff]   ;;  %747 = vmatpush3.bf16.msra.mxu0 %v775_v10 }
  0x14   : > { %735 = vmatpush3.bf16.msra.mxu1 %v770_v4  ;;  %738 = vmatprep.mubr.msk.bf16.mxu1 %vm794_vm0, %v793_v2 }
  0x15   : > { %736 = vmatprep.subr.bf16.mxu1 %v793_v2  ;;  %748 = vmatprep.subr.bf16.mxu0 %v793_v2 }
  0x17   : > { %749 = vmatpush3.bf16.msra.mxu0 %v776_v11 }
  0x18   : > { %737 = vmatpush3.bf16.msra.mxu1 %v771_v6 }
  0x1b   : > { %739 = vmatmul.mubr.msk.bf16.vlgmr.msra.gmra.mrb[4].mxu1 %vm363_vm1, %v772_v7 }
  0xe6   : > { %v401_v12 = vpop.f32.mrb[0].mxu1 }
  0xe7   : > { %v732_v13 = vpop.f32.mrb[1].mxu1 }
  0xe8   : > { %v404_v14 = vpop.f32.mrb[2].mxu1 }
  0xe9   : > { %v733_v15 = vpop.f32.mrb[3].mxu1 }
  0xee   : > { %v462_v16 = vpop.f32.mrb[4].mxu1 }
  0xef   : > { %v463_v18 = vadd.f32 %v462_v16, %v401_v12  ;;  %v740_v19 = vpop.f32.mrb[5].mxu1 }
  0xf0   : > { %v465_v20 = vpop.f32.mrb[6].mxu1 }
  0xf1   : > { %v476_v21 = vadd.f32 %v702_v17, %v463_v18  ;;  %v466_v22 = vadd.f32 %v465_v20, %v404_v14  ;;  %v741_v23 = vpop.f32.mrb[7].mxu1 }
  0xf3   : > { %v478_v25 = vmax.f32 %v476_v21, 0.0  ;;  %v477_v26 = vadd.f32 %v702_v17, %v466_v22 }
  0xf5   : > { %v479_v27 = vmax.f32 %v477_v26, 0.0  ;;  %v572_v28 = vmul.f32 %v709_v24, %v478_v25 }
  0xf7   : > { %v480_v29 = vpack.c.bf16 %v479_v27, %v478_v25  ;;  %v574_v30 = vsel %vm520_vm2, %v572_v28, 0.0  ;;  %v573_v31 = vmul.f32 %v709_v24, %v479_v27 }
  0xf8   : > { %575 = vadd.xlane.f32.xlu0 %v574_v30 }
  0xf9   : > { %751 = vmatmul.mubr.msk.bf16.vlgmr.msra.gmra.mrb[0].mxu0 %vm520_vm2, %v480_v29  ;;  %v577_v32 = vsel %vm520_vm2, %v573_v31, 0.0 }
  0xfc   : > { %578 = vadd.xlane.f32.xlu0 %v577_v32 }
 0x185   : > { %v576_v35 = vpop.xlane.xlu0 %575 }
 0x186   : > { %v587_v36 = vadd.f32 %v710_v34, %v576_v35 }
 0x188   : > { %v711_v37 = vmul.f32 -1.442695, %v587_v36 }
 0x189   : > { %v579_v38 = vpop.xlane.xlu0 %578 }
 0x18a   : > { %777 = vpow2.f32 %v711_v37  ;;  %v588_v39 = vadd.f32 %v710_v34, %v579_v38 }
 0x18c   : > { %v712_v40 = vmul.f32 -1.442695, %v588_v39 }
 0x18e   : > { %779 = vpow2.f32 %v712_v40 }
 0x194   : > { %v778_v41 = vpop.eup %777 }
 0x195   : > { %v595_v42 = vadd.f32 1.0, %v778_v41 }
 0x197   : > { %781 = vrcp.f32 %v595_v42 }
 0x198   : > { %v780_v43 = vpop.eup %779 }
 0x199   : > { %v596_v44 = vadd.f32 1.0, %v780_v43 }
 0x19b   : > { %783 = vrcp.f32 %v596_v44 }
 0x1a1   : > { %v782_v45 = vpop.eup %781 }
 0x1a2   : > { %603 = vperm.xlu1 %765, %v782_v45  }
 0x1a5   : > { %v784_v46 = vpop.eup %783 }
 0x1a6   : > { %608 = vperm.xlu1 %765, %v784_v46  }
 0x1cc   : > { %v558_v47 = vpop.f32.mrb[0].mxu0 }
 0x1cd   : > { %v752_v48 = vpop.f32.mrb[1].mxu0  ;;  %v559_v52 = vadd.f32 %v703_v51, %v558_v47 }
 0x1ce   : > { %v561_v49 = vpop.f32.mrb[2].mxu0 }
 0x1cf   : > { %v753_v50 = vpop.f32.mrb[3].mxu0  ;;  %v562_v55 = vadd.f32 %v703_v51, %v561_v49 }
 0x221   : > { %v604_v53 = vpop.permute.xlu1 %603 }
 0x222   : > { %v611_v54 = vmul.f32 %v604_v53, %v559_v52 }
 0x224   : > { %613 = vst [vmem:[%s331_s20] sm:$0xff] %v611_v54 }
 0x225   : > { %v609_v56 = vpop.permute.xlu1 %608 }
 0x226   : > { %v612_v57 = vmul.f32 %v609_v56, %v562_v55 }
 0x228   : > { %614 = vst [vmem:[%s331_s20 + $0x8] sm:$0xff] %v612_v57 }
 0x229 PF: > { %s20_s29 = sadd.s32 1, %s791_s29  }
 0x22a   : > { %p17_p4 = scmp.ge.s32.totalorder %s20_s29, 4  }
 0x22c   :  { %19 = sbr.rel (!%p17_p4) target bundleno = 3 (0x3), region = 85 }

// kernel: run.37
= control target key start
LH: loop header
LB: loop body
LE: loop exit
PB: predicated region body
PF: predicated region fallthrough
CT: control target
= control target key end

     0   :  { %s1302_s17 = smov 0   ;;  %s1446_s0 = inlined_call_operand.vmem [shape: bf16[10,32], index: 0, kind: input, shape index: {}]   ;;  %s1447_s1 = inlined_call_operand.vmem [shape: f32[10,64], index: 1, kind: input, shape index: {}]   ;;  %s1448_s2 = inlined_call_operand.vmem [shape: f32[10,32], index: 2, kind: input, shape index: {}]   ;;  %s1449_s3 = inlined_call_operand.vmem [shape: f32[10,32], index: 3, kind: input, shape index: {}]   ;;  %s1450_s4 = inlined_call_operand.vmem [shape: f32[10,1], index: 4, kind: input, shape index: {}]   ;;  %s1451_s5 = inlined_call_operand.vmem [shape: bf16[160,32], index: 5, kind: input, shape index: {}]   ;;  %s1452_s6 = inlined_call_operand.vmem [shape: f32[1,32], index: 6, kind: input, shape index: {}]   ;;  %s1453_s7 = inlined_call_operand.vmem [shape: bf16[64,32], index: 7, kind: input, shape index: {}]   ;;  %s1454_s8 = inlined_call_operand.vmem [shape: f32[1,32], index: 8, kind: input, shape index: {}]   ;;  %s1455_s9 = inlined_call_operand.vmem [shape: bf16[32,32], index: 9, kind: input, shape index: {}]   ;;  %s1456_s10 = inlined_call_operand.vmem [shape: f32[1,32], index: 10, kind: input, shape index: {}]   ;;  %s1457_s11 = inlined_call_operand.vmem [shape: bf16[10,32], index: 11, kind: output, shape index: {}]  }
   0x1 LB: > { %s1073_s18 = sadd.s32 4294967295, %s1236_s17   ;;  %p1077_p0 = scmp.ge.s32.totalorder %s1236_s17, 1  ;;  %s1236_s17 = sphi %s1302_s17, %s21_s17  }
   0x2   : > { %p372_p1 = scmp.lt.s32.totalorder %s1236_s17, 3 }
   0x4   : > { %p373_p2 = pnand %p1077_p0, %p372_p1 }
   0x5   : > { %p426_p3 = scmp.lt.s32.totalorder (!%p373_p2), %s1073_s18, 1  ;;  %v1238_v0 = vmov (!%p373_p2), 0   ;;  %v1239_v1 = vmov (!%p373_p2), 0.0   ;;  %v1214_v2 = vld [vmem:[%s1451_s5 + $0x10] sm:$0xff] (!%p373_p2)   ;;  %v1215_v3 = vld [vmem:[%s1451_s5] sm:$0xff] (!%p373_p2)   ;;  %vm1240_vm0 = vmmov (!%p373_p2), 0  }
   0x6   : > { %376 = sbr.rel (%p373_p2) target bundleno = 814 (0x32e), region = 64  ;;  %1213 = vset.pattern.permute.xlu0 (!%p373_p2), %v1238_v0  ;;  %1137 = vmatprep.subr.bf16.mxu0 (!%p373_p2), %v1239_v1  ;;  %v1216_v4 = vld [vmem:[%s1451_s5 + $0x18] sm:$0xff] (!%p373_p2)   ;;  %v1217_v5 = vld [vmem:[%s1451_s5 + $0x8] sm:$0xff] (!%p373_p2)   ;;  %vm498_vm1 = vcmask (!%p373_p2), 261120   ;;  %v1218_v9 = vld [vmem:[%s1451_s5 + $0x20] sm:$0xff] (!%p373_p2)   ;;  %vm970_vm4 = vcmask (!%p373_p2), 257024  }
   0x7   : > { %1145 = vmatprep.subr.bf16.mxu1 (!%p373_p2), %v1239_v1  ;;  %1141 = vmatprep.mubr.msk.bf16.mxu0 (!%p373_p2), %vm1240_vm0, %v1239_v1  ;;  %v1219_v12 = vld [vmem:[%s1451_s5 + $0x30] sm:$0xff] (!%p373_p2)   ;;  %v1220_v13 = vld [vmem:[%s1451_s5 + $0x28] sm:$0xff] (!%p373_p2)   ;;  %v1221_v14 = vld [vmem:[%s1451_s5 + $0x38] sm:$0xff] (!%p373_p2)  }
   0x8   : > { %1138 = vmatpush3.bf16.msra.mxu0 (!%p373_p2), %v1214_v2  ;;  %1149 = vmatprep.mubr.msk.bf16.mxu1 (!%p373_p2), %vm1240_vm0, %v1239_v1  ;;  %v1222_v20 = vld [vmem:[%s1451_s5 + $0x40] sm:$0xff] (!%p373_p2)   ;;  %v1223_v23 = vld [vmem:[%s1451_s5 + $0x48] sm:$0xff] (!%p373_p2)   ;;  %v1225_v35 = vld [vmem:[%s1453_s7 + $0x10] sm:$0xff] (!%p373_p2)  }
   0x9   : > { %1139 = vmatprep.subr.bf16.mxu0 (!%p373_p2), %v1239_v1  ;;  %1146 = vmatpush3.bf16.msra.mxu1 (!%p373_p2), %v1215_v3  ;;  %v1224_v34 = vld [vmem:[%s1453_s7] sm:$0xff] (!%p373_p2)   ;;  %v1226_v36 = vld [vmem:[%s1453_s7 + $0x8] sm:$0xff] (!%p373_p2)   ;;  %v1227_v37 = vld [vmem:[%s1453_s7 + $0x18] sm:$0xff] (!%p373_p2)  }
   0xa   : > { %1147 = vmatprep.subr.bf16.mxu1 (!%p373_p2), %v1239_v1  ;;  %v1099_v48 = vld [vmem:[%s1452_s6] ss:$0 sm:$0xff] (!%p373_p2)  ;;  %v1229_v61 = vld [vmem:[%s1455_s9 + $0x8] sm:$0xff] (!%p373_p2)  }
   0xb   : > { %v1228_v60 = vld [vmem:[%s1455_s9] sm:$0xff] (!%p373_p2)  }
   0xc   : > { %1140 = vmatpush3.bf16.msra.mxu0 (!%p373_p2), %v1216_v4  ;;  %v1106_v63 = vld [vmem:[%s1454_s8] ss:$0 sm:$0xff] (!%p373_p2) }
   0xd   : > { %s1459_s18 = smov (!%p426_p3, %s1073_s18), 1  ;;  %1148 = vmatpush3.bf16.msra.mxu1 %v1217_v5  ;;  %1153 = vmatprep.subr.bf16.mxu0 %v1239_v1 }
   0xe   : > { %s1328_s25 = sshll.u32 %s1459_s18, 3  ;;  %s1078_s28 = sshll.u32 %s1459_s18, 2  ;;  %1161 = vmatprep.subr.bf16.mxu1 %v1239_v1 }
   0xf   : > { %s445_s12 = scalar_lea.vmem %s1450_s4, %s1328_s25  ;;  %s433_s15 = scalar_lea.vmem %s1447_s1, %s1328_s25 }
  0x10   : > { %v455_v6 = vld [vmem:[%s445_s12] sm:$0xff]  ;;  %s429_s20 = scalar_lea.vmem %s1446_s0, %s1078_s28  ;;  %s1241_s12 = smov 96  }
  0x11   : > { %v452_v7 = vld [vmem:[%s433_s15] sm:$0xff]  ;;  %vm477_vm2 = vcmp.gt.f32.partialorder %v455_v6, 0.0  ;;  %s437_s15 = scalar_lea.vmem %s1448_s2, %s1328_s25  ;;  %s449_s30 = scalar_lea.vmem %s1457_s11, %s1078_s28 }
  0x12   : > { %v1349_v8 = vld [vmem:[%s429_s20] sm:$0xf]  ;;  %v478_v10 = vsel %vm477_vm2, 1, %v1238_v0  ;;  %v485_v11 = vpack.c.bf16 %v452_v7, %v452_v7  ;;  %s441_s20 = scalar_lea.vmem %s1449_s3, %s1328_s25 }
  0x13   : > { %480 = vperm.xlu0 %1213, %v478_v10   ;;  %1150 = vmatmul.mubr.msk.bf16.vlgmr.msra.gmra.mrb[0].mxu1 %vm498_vm1, %v1349_v8  ;;  %v453_v15 = vld [vmem:[%s437_s15] sm:$0xff] }
  0x14   : > { %1142 = vmatmul.mubr.msk.bf16.vlgmr.msra.gmra.mrb[0].mxu0 %vm498_vm1, %v485_v11  ;;  %1162 = vmatpush3.bf16.msra.mxu1 %v1219_v12  ;;  %v454_v16 = vld [vmem:[%s441_s20] sm:$0xff] }
  0x15   : > { %1154 = vmatpush3.bf16.msra.mxu0 %v1218_v9  ;;  %1163 = vmatprep.subr.bf16.mxu1 %v1239_v1 }
  0x16   : > { %1155 = vmatprep.subr.bf16.mxu0 %v1239_v1  ;;  %1157 = vmatprep.mubr.msk.bf16.mxu0 %vm1240_vm0, %v1239_v1 }
  0x17   : > { %712 = vrot.lane.b32.xlu0 %v485_v11, %s1241_s12  ;;  %1165 = vmatprep.mubr.msk.bf16.mxu1 %vm1240_vm0, %v1239_v1 }
  0x18   : > { %1164 = vmatpush3.bf16.msra.mxu1 %v1221_v14 }
  0x19   : > { %1156 = vmatpush3.bf16.msra.mxu0 %v1220_v13  ;;  %1177 = vmatprep.subr.bf16.mxu1 %v1239_v1 }
  0x1a   : > { %1169 = vmatprep.subr.bf16.mxu0 %v1239_v1 }
  0x92   : > { %v481_v17 = vpop.permute.xlu0 %480 }
  0x93   : > { %vm482_vm3 = vcmp.eq.s32.totalorder %v481_v17, 1 }
  0x94   : > { %v483_v18 = vsel %vm482_vm3, %v453_v15, 0.0  ;;  %v484_v19 = vsel %vm482_vm3, %v454_v16, 0.0 }
  0x95   : > { %v597_v21 = vpack.c.bf16 %v483_v18, %v483_v18  ;;  %v654_v22 = vpack.c.bf16 %v484_v19, %v484_v19 }
  0x96   : > { %v713_v24 = vpop.permute.xlu0 %712 }
  0x97   : > { %1158 = vmatmul.mubr.msk.bf16.vlgmr.msra.gmra.mrb[4].mxu0 %vm498_vm1, %v597_v21  ;;  %1166 = vmatmul.mubr.msk.bf16.vlgmr.msra.gmra.mrb[4].mxu1 %vm498_vm1, %v654_v22 }
  0x98   : > { %1170 = vmatpush3.bf16.msra.mxu0 %v1222_v20  ;;  %1173 = vmatprep.mubr.msk.bf16.mxu0 %vm1240_vm0, %v1239_v1 }
  0x99   : > { %1171 = vmatprep.subr.bf16.mxu0 %v1239_v1  ;;  %1181 = vmatprep.mubr.msk.bf16.mxu1 %vm1240_vm0, %v1239_v1 }
  0x9a   : > { %1178 = vmatpush3.bf16.msra.mxu1 %v1225_v35 }
  0x9b   : > { %1179 = vmatprep.subr.bf16.mxu1 %v1239_v1 }
  0x9c   : > { %1172 = vmatpush3.bf16.msra.mxu0 %v1223_v23 }
  0x9d   : > { %1185 = vmatprep.subr.bf16.mxu0 %v1239_v1 }
  0x9e   : > { %1180 = vmatpush3.bf16.msra.mxu1 %v1227_v37 }
  0x9f   : > { %1174 = vmatmul.mubr.msk.bf16.vlgmr.msra.gmra.mrb[8].mxu0 %vm498_vm1, %v713_v24  ;;  %1193 = vmatprep.subr.bf16.mxu1 %v1239_v1 }
  0xa0   : > { %1189 = vmatprep.mubr.msk.bf16.mxu0 %vm1240_vm0, %v1239_v1  ;;  %1186 = vmatpush3.bf16.msra.mxu0 %v1224_v34 }
  0xa1   : > { %1187 = vmatprep.subr.bf16.mxu0 %v1239_v1 }
  0xa4   : > { %1188 = vmatpush3.bf16.msra.mxu0 %v1226_v36 }
  0xa7   : > { %1190 = vmatmul.mubr.msk.bf16.vlgmr.msra.gmra.mrb[12].mxu0 %vm498_vm1, %v1349_v8 }
  0xe6   : > { %v591_v27 = vpop.f32.mrb[0].mxu1 }
  0xe7   : > { %v536_v25 = vpop.f32.mrb[0].mxu0  ;;  %v1151_v30 = vpop.f32.mrb[1].mxu1 }
  0xe8   : > { %v1143_v26 = vpop.f32.mrb[1].mxu0  ;;  %v592_v29 = vadd.f32 %v591_v27, %v536_v25  ;;  %v594_v32 = vpop.f32.mrb[2].mxu1 }
  0xe9   : > { %v539_v28 = vpop.f32.mrb[2].mxu0  ;;  %v1152_v33 = vpop.f32.mrb[3].mxu1 }
  0xea   : > { %v1144_v31 = vpop.f32.mrb[3].mxu0 }
 0x16a   : > { %v647_v38 = vpop.f32.mrb[4].mxu0  ;;  %v704_v39 = vpop.f32.mrb[4].mxu1 }
 0x16b   : > { %v653_v40 = vadd.f32 %v647_v38, %v592_v29  ;;  %v1159_v41 = vpop.f32.mrb[5].mxu0  ;;  %v1167_v42 = vpop.f32.mrb[5].mxu1 }
 0x16c   : > { %v650_v43 = vpop.f32.mrb[6].mxu0  ;;  %v707_v44 = vpop.f32.mrb[6].mxu1 }
 0x16d   : > { %v710_v45 = vadd.f32 %v704_v39, %v653_v40  ;;  %v1160_v46 = vpop.f32.mrb[7].mxu0  ;;  %v1168_v47 = vpop.f32.mrb[7].mxu1 }
 0x172   : > { %v763_v49 = vpop.f32.mrb[8].mxu0 }
 0x173   : > { %v769_v50 = vadd.f32 %v763_v49, %v710_v45  ;;  %v1175_v51 = vpop.f32.mrb[9].mxu0 }
 0x174   : > { %v766_v52 = vpop.f32.mrb[10].mxu0 }
 0x175   : > { %v776_v53 = vadd.f32 %v1099_v48, %v769_v50  ;;  %v1176_v54 = vpop.f32.mrb[11].mxu0 }
 0x177   : > { %v785_v55 = vpack.c.bf16 %v776_v53, %v776_v53 }
 0x179   : > { %1182 = vmatmul.mubr.msk.bf16.vlgmr.msra.gmra.mrb[8].mxu1 %vm498_vm1, %v785_v55 }
 0x17a   : > { %1197 = vmatprep.mubr.msk.bf16.mxu1 %vm1240_vm0, %v1239_v1  ;;  %v887_v56 = vpop.f32.mrb[12].mxu0  ;;  %1194 = vmatpush3.bf16.msra.mxu1 %v1228_v60 }
 0x17b   : > { %v1191_v57 = vpop.f32.mrb[13].mxu0  ;;  %1195 = vmatprep.subr.bf16.mxu1 %v1239_v1  ;;  %v1107_v1 = vld [vmem:[%s1456_s10] ss:$0 sm:$0xff] }
 0x17c   : > { %v890_v58 = vpop.f32.mrb[14].mxu0 }
 0x17d   : > { %v1192_v59 = vpop.f32.mrb[15].mxu0 }
 0x17e   : > { %1196 = vmatpush3.bf16.msra.mxu1 %v1229_v61 }
 0x24c   : > { %v835_v62 = vpop.f32.mrb[8].mxu1 }
 0x24d   : > { %v888_v0 = vadd.f32 %v887_v56, %v835_v62  ;;  %v1183_v2 = vpop.f32.mrb[9].mxu1 }
 0x24e   : > { %v838_v3 = vpop.f32.mrb[10].mxu1 }
 0x24f   : > { %v900_v4 = vadd.f32 %v1106_v63, %v888_v0  ;;  %v1184_v5 = vpop.f32.mrb[11].mxu1 }
 0x251   : > { %v901_v6 = vmax.f32 %v900_v4, 0.0 }
 0x253   : > { %v902_v7 = vpack.c.bf16 %v901_v6, %v901_v6 }
 0x255   : > { %1198 = vmatmul.mubr.msk.bf16.vlgmr.msra.gmra.mrb[12].mxu1 %vm498_vm1, %v902_v7 }
 0x328   : > { %v963_v8 = vpop.f32.mrb[12].mxu1 }
 0x329   : > { %v964_v9 = vadd.f32 %v1107_v1, %v963_v8  ;;  %v1199_v10 = vpop.f32.mrb[13].mxu1 }
 0x32a   : > { %v966_v11 = vpop.f32.mrb[14].mxu1 }
 0x32b   : > { %v969_v12 = vpack.c.bf16 %v964_v9, %v964_v9  ;;  %v1200_v13 = vpop.f32.mrb[15].mxu1 }
 0x32d   : > { %971 = vst.msk [vmem:[%s449_s30] sm:$0xf] %vm970_vm4, %v969_v12 }
 0x32e PF: > { %s21_s17 = sadd.s32 1, %s1236_s17  }
 0x32f   : > { %p18_p4 = scmp.ge.s32.totalorder %s21_s17, 4  }
 0x331   :  { %20 = sbr.rel (!%p18_p4) target bundleno = 1 (0x1), region = 106 }

// kernel: run.39
= control target key start
LH: loop header
LB: loop body
LE: loop exit
PB: predicated region body
PF: predicated region fallthrough
CT: control target
= control target key end

     0   :  { %s999_s11 = smov 0   ;;  %s1072_s0 = inlined_call_operand.vmem [shape: bf16[30,32], index: 0, kind: input, shape index: {}]   ;;  %s1073_s1 = inlined_call_operand.vmem [shape: bf16[30,32], index: 1, kind: input, shape index: {}]   ;;  %s1074_s2 = inlined_call_operand.vmem [shape: bf16[30,32], index: 2, kind: input, shape index: {}]   ;;  %s1075_s3 = inlined_call_operand.vmem [shape: bf16[96,64], index: 3, kind: input, shape index: {}]   ;;  %s1076_s4 = inlined_call_operand.vmem [shape: f32[1,64], index: 4, kind: input, shape index: {}]   ;;  %s1077_s5 = inlined_call_operand.vmem [shape: bf16[64,128], index: 5, kind: input, shape index: {}]   ;;  %s1078_s6 = inlined_call_operand.vmem [shape: f32[1,128], index: 6, kind: input, shape index: {}]   ;;  %s1079_s7 = inlined_call_operand.vmem [shape: f32[1,64], index: 7, kind: input, shape index: {}]   ;;  %s1080_s8 = inlined_call_operand.<no memory space> [shape: f32[1,1], index: 8, kind: input, shape index: {}]   ;;  %s1081_s9 = inlined_call_operand.vmem [shape: f32[30,128], index: 9, kind: output, shape index: {}]  }
   0x1   :  { %v14_v0 = vstv %s1080_s8 }
   0x2   :  { %15 = vst [vmem:[#allocation2] sm:$0x1] %v14_v0 }
   0x3 LB: > { %s813_s12 = sadd.s32 4294967295, %s941_s11   ;;  %p817_p0 = scmp.ge.s32.totalorder %s941_s11, 1  ;;  %s941_s11 = sphi %s999_s11, %s21_s11  }
   0x4   : > { %p312_p1 = scmp.lt.s32.totalorder %s941_s11, 3 }
   0x6   : > { %p313_p2 = pnand %p817_p0, %p312_p1 }
   0x7   : > { %v914_v1 = vld [vmem:[%s1075_s3 + $0x10] sm:$0xff] (!%p313_p2)   ;;  %v943_v2 = vmov (!%p313_p2), 0.0   ;;  %v915_v3 = vld [vmem:[%s1075_s3] sm:$0xff] (!%p313_p2)   ;;  %v916_v4 = vld [vmem:[%s1075_s3 + $0x18] sm:$0xff] (!%p313_p2)   ;;  %vm944_vm0 = vmmov (!%p313_p2), 0   ;;  %s818_s18 = sshll.u32 (!%p313_p2), %s813_s12, 1 }
   0x8   : > { %316 = sbr.rel (%p313_p2) target bundleno = 553 (0x229), region = 56  ;;  %865 = vmatprep.subr.bf16.mxu0 (!%p313_p2), %v943_v2  ;;  %873 = vmatprep.subr.bf16.mxu1 (!%p313_p2), %v943_v2  ;;  %v917_v5 = vld [vmem:[%s1075_s3 + $0x8] sm:$0xff] (!%p313_p2)   ;;  %p359_p3 = scmp.lt.s32.totalorder (!%p313_p2), %s818_s18, 3  ;;  %vm416_vm1 = vcmask (!%p313_p2), 261120   ;;  %v920_v6 = vld [vmem:[%s1075_s3 + $0x20] sm:$0xff] (!%p313_p2)   ;;  %v925_v13 = vld [vmem:[%s1077_s5 + $0x10] sm:$0xff] (!%p313_p2)  }
   0x9   : > { %866 = vmatpush3.bf16.msra.mxu0 (!%p313_p2), %v914_v1  ;;  %869 = vmatprep.mubr.msk.bf16.mxu0 (!%p313_p2), %vm944_vm0, %v943_v2  ;;  %v921_v9 = vld [vmem:[%s1075_s3 + $0x28] sm:$0xff] (!%p313_p2)   ;;  %v923_v11 = vld [vmem:[%s1077_s5] sm:$0xff] (!%p313_p2)   ;;  %v926_v14 = vld [vmem:[%s1077_s5 + $0x18] sm:$0xff] (!%p313_p2)   ;;  %vm638_vm2 = vcmask (!%p313_p2), 523264   ;;  %v945_v42 = vmov (!%p313_p2), 0  }
   0xa   : > { %874 = vmatpush3.bf16.msra.mxu1 (!%p313_p2), %v915_v3  ;;  %867 = vmatprep.subr.bf16.mxu0 (!%p313_p2), %v943_v2  ;;  %v924_v12 = vld [vmem:[%s1077_s5 + $0x8] sm:$0xff] (!%p313_p2)   ;;  %v838_v26 = vld [vmem:[%s1076_s4] ss:$0 sm:$0xff] (!%p313_p2) }
   0xb   : > { %875 = vmatprep.subr.bf16.mxu1 (!%p313_p2), %v943_v2  ;;  %877 = vmatprep.mubr.msk.bf16.mxu1 (!%p313_p2), %vm944_vm0, %v943_v2  ;;  %v845_v33 = vld [vmem:[%s1079_s7] ss:$0 sm:$0xff] (!%p313_p2) }
   0xc   : > { %912 = vset.pattern.permute.xlu1 (!%p313_p2), %v945_v42  ;;  %913 = vset.pattern.permute.xlu0 (!%p313_p2), %v945_v42  ;;  %v846_v43 = vld [vmem:[#allocation2] ss:$0 sm:$0xff] (!%p313_p2) }
   0xd   : > { %868 = vmatpush3.bf16.msra.mxu0 (!%p313_p2), %v916_v4  ;;  %v839_v60 = vld [vmem:[%s1078_s6] ss:$0 sm:$0xff] (!%p313_p2) }
   0xe   : > { %876 = vmatpush3.bf16.msra.mxu1 (!%p313_p2), %v917_v5  ;;  %881 = vmatprep.subr.bf16.mxu0 (!%p313_p2), %v943_v2 }
   0xf   : > { %s1083_s18 = smov (!%p359_p3, %s818_s18), 3  ;;  %889 = vmatprep.subr.bf16.mxu1 %v943_v2 }
  0x10   : > { %s819_s21 = sshll.u32 %s1083_s18, 2 }
  0x11   : > { %s368_s26 = scalar_lea.vmem %s1073_s1, %s819_s21  ;;  %s362_s29 = scalar_lea.vmem %s1072_s0, %s819_s21 }
  0x12   : > { %v918_v7 = vld [vmem:[%s368_s26] sm:$0xff]   ;;  %s374_s12 = scalar_lea.vmem %s1074_s2, %s819_s21 }
  0x13   : > { %v919_v8 = vld [vmem:[%s362_s29] sm:$0xff]   ;;  %870 = vmatmul.mubr.msk.bf16.vlgmr.msra.gmra.mrb[0].mxu0 %vm416_vm1, %v918_v7  ;;  %s825_s29 = sshll.u32 %s1083_s18, 3 }
  0x14   : > { %878 = vmatmul.mubr.msk.bf16.vlgmr.msra.gmra.mrb[0].mxu1 %vm416_vm1, %v919_v8  ;;  %882 = vmatpush3.bf16.msra.mxu0 %v920_v6  ;;  %v922_v10 = vld [vmem:[%s374_s12] sm:$0xff]   ;;  %s380_s12 = scalar_lea.vmem %s1081_s9, %s825_s29 }
  0x15   : > { %883 = vmatprep.subr.bf16.mxu0 %v943_v2  ;;  %885 = vmatprep.mubr.msk.bf16.mxu0 %vm944_vm0, %v943_v2 }
  0x16   : > { %897 = vmatprep.mubr.msk.bf16.mxu1 %vm944_vm0, %v943_v2  ;;  %890 = vmatpush3.bf16.msra.mxu1 %v923_v11 }
  0x17   : > { %891 = vmatprep.subr.bf16.mxu1 %v943_v2 }
  0x18   : > { %884 = vmatpush3.bf16.msra.mxu0 %v921_v9 }
  0x1a   : > { %892 = vmatpush3.bf16.msra.mxu1 %v924_v12 }
  0x1b   : > { %886 = vmatmul.mubr.msk.bf16.vlgmr.msra.gmra.mrb[4].mxu0 %vm416_vm1, %v922_v10  ;;  %893 = vmatprep.subr.bf16.mxu1 %v943_v2 }
  0x1e   : > { %894 = vmatpush3.bf16.msra.mxu1 %v925_v13 }
  0x1f   : > { %895 = vmatprep.subr.bf16.mxu1 %v943_v2 }
  0x22   : > { %896 = vmatpush3.bf16.msra.mxu1 %v926_v14 }
  0xe6   : > { %v454_v15 = vpop.f32.mrb[0].mxu0 }
  0xe7   : > { %v515_v16 = vpop.f32.mrb[0].mxu1  ;;  %v871_v17 = vpop.f32.mrb[1].mxu0 }
  0xe8   : > { %v516_v18 = vadd.f32 %v515_v16, %v454_v15  ;;  %v879_v19 = vpop.f32.mrb[1].mxu1  ;;  %v457_v20 = vpop.f32.mrb[2].mxu0 }
  0xe9   : > { %v518_v21 = vpop.f32.mrb[2].mxu1  ;;  %v872_v22 = vpop.f32.mrb[3].mxu0 }
  0xea   : > { %v519_v23 = vadd.f32 %v518_v21, %v457_v20  ;;  %v880_v24 = vpop.f32.mrb[3].mxu1 }
  0xee   : > { %v578_v25 = vpop.f32.mrb[4].mxu0 }
  0xef   : > { %v585_v27 = vadd.f32 %v578_v25, %v516_v18  ;;  %v887_v28 = vpop.f32.mrb[5].mxu0 }
  0xf0   : > { %v581_v29 = vpop.f32.mrb[6].mxu0 }
  0xf1   : > { %v594_v30 = vadd.f32 %v838_v26, %v585_v27  ;;  %v586_v31 = vadd.f32 %v581_v29, %v519_v23  ;;  %v888_v32 = vpop.f32.mrb[7].mxu0 }
  0xf3   : > { %v596_v34 = vmax.f32 %v594_v30, 0.0  ;;  %v595_v35 = vadd.f32 %v838_v26, %v586_v31 }
  0xf5   : > { %v597_v36 = vmax.f32 %v595_v35, 0.0  ;;  %v690_v37 = vmul.f32 %v845_v33, %v596_v34 }
  0xf7   : > { %v598_v38 = vpack.c.bf16 %v597_v36, %v596_v34  ;;  %v692_v39 = vsel %vm638_vm2, %v690_v37, 0.0  ;;  %v691_v40 = vmul.f32 %v845_v33, %v597_v36 }
  0xf8   : > { %693 = vadd.xlane.f32.xlu0 %v692_v39 }
  0xf9   : > { %898 = vmatmul.mubr.msk.bf16.vlgmr.msra.gmra.mrb[4].mxu1 %vm638_vm2, %v598_v38  ;;  %v695_v41 = vsel %vm638_vm2, %v691_v40, 0.0 }
  0xfc   : > { %696 = vadd.xlane.f32.xlu0 %v695_v41 }
 0x185   : > { %v694_v44 = vpop.xlane.xlu0 %693 }
 0x186   : > { %v705_v45 = vadd.f32 %v846_v43, %v694_v44 }
 0x188   : > { %v847_v46 = vmul.f32 -1.442695, %v705_v45 }
 0x189   : > { %v697_v47 = vpop.xlane.xlu0 %696 }
 0x18a   : > { %927 = vpow2.f32 %v847_v46  ;;  %v706_v48 = vadd.f32 %v846_v43, %v697_v47 }
 0x18c   : > { %v848_v49 = vmul.f32 -1.442695, %v706_v48 }
 0x18e   : > { %929 = vpow2.f32 %v848_v49 }
 0x194   : > { %v928_v50 = vpop.eup %927 }
 0x195   : > { %v713_v51 = vadd.f32 1.0, %v928_v50 }
 0x197   : > { %931 = vrcp.f32 %v713_v51 }
 0x198   : > { %v930_v52 = vpop.eup %929 }
 0x199   : > { %v714_v53 = vadd.f32 1.0, %v930_v52 }
 0x19b   : > { %933 = vrcp.f32 %v714_v53 }
 0x1a1   : > { %v932_v54 = vpop.eup %931 }
 0x1a2   : > { %721 = vperm.xlu1 %912, %v932_v54  }
 0x1a5   : > { %v934_v55 = vpop.eup %933 }
 0x1a6   : > { %726 = vperm.xlu1 %912, %v934_v55  }
 0x1cc   : > { %v676_v56 = vpop.f32.mrb[4].mxu1 }
 0x1cd   : > { %v899_v57 = vpop.f32.mrb[5].mxu1  ;;  %v677_v61 = vadd.f32 %v839_v60, %v676_v56 }
 0x1ce   : > { %v679_v58 = vpop.f32.mrb[6].mxu1 }
 0x1cf   : > { %v900_v59 = vpop.f32.mrb[7].mxu1  ;;  %v680_v0 = vadd.f32 %v839_v60, %v679_v58 }
 0x221   : > { %v722_v62 = vpop.permute.xlu1 %721 }
 0x222   : > { %v729_v63 = vmul.f32 %v722_v62, %v677_v61 }
 0x224   : > { %731 = vst [vmem:[%s380_s12] sm:$0xff] %v729_v63 }
 0x225   : > { %v727_v1 = vpop.permute.xlu1 %726 }
 0x226   : > { %v730_v2 = vmul.f32 %v727_v1, %v680_v0 }
 0x228   : > { %732 = vst [vmem:[%s380_s12 + $0x8] sm:$0xff] %v730_v2 }
 0x229 PF: > { %s21_s11 = sadd.s32 1, %s941_s11  }
 0x22a   : > { %p18_p4 = scmp.ge.s32.totalorder %s21_s11, 4  }
 0x22c   :  { %20 = sbr.rel (!%p18_p4) target bundleno = 3 (0x3), region = 92 }

// kernel: run.53
= control target key start
LH: loop header
LB: loop body
LE: loop exit
PB: predicated region body
PF: predicated region fallthrough
CT: control target
= control target key end

     0   :  { %s496_s15 = smov 0   ;;  %s531_s0 = inlined_call_operand.vmem [shape: bf16[10,32], index: 0, kind: input, shape index: {}]   ;;  %s532_s1 = inlined_call_operand.vmem [shape: bf16[10,32], index: 1, kind: input, shape index: {}]   ;;  %s533_s2 = inlined_call_operand.vmem [shape: bf16[64,32], index: 2, kind: input, shape index: {}]   ;;  %s534_s3 = inlined_call_operand.vmem [shape: f32[1,32], index: 3, kind: input, shape index: {}]   ;;  %s535_s4 = inlined_call_operand.vmem [shape: bf16[10,32], index: 4, kind: output, shape index: {}]  }
   0x1 LB: > { %s408_s16 = sadd.s32 4294967295, %s467_s15   ;;  %p412_p0 = scmp.ge.s32.totalorder %s467_s15, 1  ;;  %s467_s15 = sphi %s496_s15, %s14_s15  }
   0x2   : > { %p170_p1 = scmp.lt.s32.totalorder %s467_s15, 3 }
   0x4   : > { %p171_p2 = pnand %p412_p0, %p170_p1 }
   0x5   : > { %v457_v0 = vld [vmem:[%s533_s2 + $0x10] sm:$0xff] (!%p171_p2)   ;;  %v469_v1 = vmov (!%p171_p2), 0.0   ;;  %v458_v2 = vld [vmem:[%s533_s2] sm:$0xff] (!%p171_p2)   ;;  %v459_v3 = vld [vmem:[%s533_s2 + $0x18] sm:$0xff] (!%p171_p2)   ;;  %vm470_vm0 = vmmov (!%p171_p2), 0   ;;  %p198_p3 = scmp.lt.s32.totalorder (!%p171_p2), %s408_s16, 1 }
   0x6   : > { %174 = sbr.rel (%p171_p2) target bundleno = 237 (0xed), region = 36  ;;  %431 = vmatprep.subr.bf16.mxu0 (!%p171_p2), %v469_v1  ;;  %439 = vmatprep.subr.bf16.mxu1 (!%p171_p2), %v469_v1  ;;  %v460_v4 = vld [vmem:[%s533_s2 + $0x8] sm:$0xff] (!%p171_p2)   ;;  %vm233_vm1 = vcmask (!%p171_p2), 261120   ;;  %v422_v9 = vld [vmem:[%s534_s3] ss:$0 sm:$0xff] (!%p171_p2)  ;;  %vm341_vm2 = vcmask (!%p171_p2), 257024  }
   0x7   : > { %432 = vmatpush3.bf16.msra.mxu0 (!%p171_p2), %v457_v0  ;;  %435 = vmatprep.mubr.msk.bf16.mxu0 (!%p171_p2), %vm470_vm0, %v469_v1 }
   0x8   : > { %440 = vmatpush3.bf16.msra.mxu1 (!%p171_p2), %v458_v2  ;;  %433 = vmatprep.subr.bf16.mxu0 (!%p171_p2), %v469_v1 }
   0x9   : > { %441 = vmatprep.subr.bf16.mxu1 (!%p171_p2), %v469_v1  ;;  %443 = vmatprep.mubr.msk.bf16.mxu1 (!%p171_p2), %vm470_vm0, %v469_v1 }
   0xb   : > { %434 = vmatpush3.bf16.msra.mxu0 (!%p171_p2), %v459_v3 }
   0xc   : > { %442 = vmatpush3.bf16.msra.mxu1 (!%p171_p2), %v460_v4 }
   0xd   : > { %s537_s16 = smov (!%p198_p3, %s408_s16), 1 }
   0xe   : > { %s413_s25 = sshll.u32 %s537_s16, 2 }
   0xf   : > { %s205_s28 = scalar_lea.vmem %s532_s1, %s413_s25  ;;  %s201_s5 = scalar_lea.vmem %s531_s0, %s413_s25 }
  0x10   : > { %v220_v5 = vld [vmem:[%s205_s28] sm:$0xf]  ;;  %s209_s10 = scalar_lea.vmem %s535_s4, %s413_s25 }
  0x11   : > { %436 = vmatmul.mubr.msk.bf16.vlgmr.msra.gmra.mrb[0].mxu0 %vm233_vm1, %v220_v5  ;;  %v219_v6 = vld [vmem:[%s201_s5] sm:$0xf] }
  0x12   : > { %444 = vmatmul.mubr.msk.bf16.vlgmr.msra.gmra.mrb[0].mxu1 %vm233_vm1, %v219_v6 }
  0xe4   : > { %v271_v7 = vpop.f32.mrb[0].mxu0 }
  0xe5   : > { %v326_v8 = vpop.f32.mrb[0].mxu1  ;;  %v437_v10 = vpop.f32.mrb[1].mxu0 }
  0xe6   : > { %v327_v11 = vadd.f32 %v326_v8, %v271_v7  ;;  %v445_v12 = vpop.f32.mrb[1].mxu1  ;;  %v274_v13 = vpop.f32.mrb[2].mxu0 }
  0xe7   : > { %v329_v14 = vpop.f32.mrb[2].mxu1  ;;  %v438_v15 = vpop.f32.mrb[3].mxu0 }
  0xe8   : > { %v339_v16 = vadd.f32 %v422_v9, %v327_v11  ;;  %v446_v17 = vpop.f32.mrb[3].mxu1 }
  0xea   : > { %v340_v18 = vpack.c.bf16 %v339_v16, %v339_v16 }
  0xec   : > { %342 = vst.msk [vmem:[%s209_s10] sm:$0xf] %vm341_vm2, %v340_v18 }
  0xed PF: > { %s14_s15 = sadd.s32 1, %s467_s15  }
  0xee   : > { %p11_p4 = scmp.ge.s32.totalorder %s14_s15, 4  }
  0xf0   :  { %13 = sbr.rel (!%p11_p4) target bundleno = 1 (0x1), region = 69 }

// kernel: run.40
= control target key start
LH: loop header
LB: loop body
LE: loop exit
PB: predicated region body
PF: predicated region fallthrough
CT: control target
= control target key end

     0   :  { %s496_s15 = smov 0   ;;  %s531_s0 = inlined_call_operand.vmem [shape: bf16[12,32], index: 0, kind: input, shape index: {}]   ;;  %s532_s1 = inlined_call_operand.vmem [shape: bf16[12,32], index: 1, kind: input, shape index: {}]   ;;  %s533_s2 = inlined_call_operand.vmem [shape: bf16[64,32], index: 2, kind: input, shape index: {}]   ;;  %s534_s3 = inlined_call_operand.vmem [shape: f32[1,32], index: 3, kind: input, shape index: {}]   ;;  %s535_s4 = inlined_call_operand.vmem [shape: bf16[12,32], index: 4, kind: output, shape index: {}]  }
   0x1 LB: > { %s408_s16 = sadd.s32 4294967295, %s467_s15   ;;  %p412_p0 = scmp.ge.s32.totalorder %s467_s15, 1  ;;  %s467_s15 = sphi %s496_s15, %s14_s15  }
   0x2   : > { %p170_p1 = scmp.lt.s32.totalorder %s467_s15, 3 }
   0x4   : > { %p171_p2 = pnand %p412_p0, %p170_p1 }
   0x5   : > { %v457_v0 = vld [vmem:[%s533_s2 + $0x10] sm:$0xff] (!%p171_p2)   ;;  %v469_v1 = vmov (!%p171_p2), 0.0   ;;  %v458_v2 = vld [vmem:[%s533_s2] sm:$0xff] (!%p171_p2)   ;;  %v459_v3 = vld [vmem:[%s533_s2 + $0x18] sm:$0xff] (!%p171_p2)   ;;  %vm470_vm0 = vmmov (!%p171_p2), 0   ;;  %p198_p3 = scmp.lt.s32.totalorder (!%p171_p2), %s408_s16, 1 }
   0x6   : > { %174 = sbr.rel (%p171_p2) target bundleno = 237 (0xed), region = 36  ;;  %431 = vmatprep.subr.bf16.mxu0 (!%p171_p2), %v469_v1  ;;  %439 = vmatprep.subr.bf16.mxu1 (!%p171_p2), %v469_v1  ;;  %v460_v4 = vld [vmem:[%s533_s2 + $0x8] sm:$0xff] (!%p171_p2)   ;;  %vm233_vm1 = vcmask (!%p171_p2), 261120   ;;  %v422_v9 = vld [vmem:[%s534_s3] ss:$0 sm:$0xff] (!%p171_p2)  ;;  %vm341_vm2 = vcmask (!%p171_p2), 257024  }
   0x7   : > { %432 = vmatpush3.bf16.msra.mxu0 (!%p171_p2), %v457_v0  ;;  %435 = vmatprep.mubr.msk.bf16.mxu0 (!%p171_p2), %vm470_vm0, %v469_v1 }
   0x8   : > { %440 = vmatpush3.bf16.msra.mxu1 (!%p171_p2), %v458_v2  ;;  %433 = vmatprep.subr.bf16.mxu0 (!%p171_p2), %v469_v1 }
   0x9   : > { %441 = vmatprep.subr.bf16.mxu1 (!%p171_p2), %v469_v1  ;;  %443 = vmatprep.mubr.msk.bf16.mxu1 (!%p171_p2), %vm470_vm0, %v469_v1 }
   0xb   : > { %434 = vmatpush3.bf16.msra.mxu0 (!%p171_p2), %v459_v3 }
   0xc   : > { %442 = vmatpush3.bf16.msra.mxu1 (!%p171_p2), %v460_v4 }
   0xd   : > { %s537_s16 = smov (!%p198_p3, %s408_s16), 1 }
   0xe   : > { %s413_s25 = sshll.u32 %s537_s16, 2 }
   0xf   : > { %s205_s28 = scalar_lea.vmem %s532_s1, %s413_s25  ;;  %s201_s5 = scalar_lea.vmem %s531_s0, %s413_s25 }
  0x10   : > { %v220_v5 = vld [vmem:[%s205_s28] sm:$0xf]  ;;  %s209_s10 = scalar_lea.vmem %s535_s4, %s413_s25 }
  0x11   : > { %436 = vmatmul.mubr.msk.bf16.vlgmr.msra.gmra.mrb[0].mxu0 %vm233_vm1, %v220_v5  ;;  %v219_v6 = vld [vmem:[%s201_s5] sm:$0xf] }
  0x12   : > { %444 = vmatmul.mubr.msk.bf16.vlgmr.msra.gmra.mrb[0].mxu1 %vm233_vm1, %v219_v6 }
  0xe4   : > { %v271_v7 = vpop.f32.mrb[0].mxu0 }
  0xe5   : > { %v326_v8 = vpop.f32.mrb[0].mxu1  ;;  %v437_v10 = vpop.f32.mrb[1].mxu0 }
  0xe6   : > { %v327_v11 = vadd.f32 %v326_v8, %v271_v7  ;;  %v445_v12 = vpop.f32.mrb[1].mxu1  ;;  %v274_v13 = vpop.f32.mrb[2].mxu0 }
  0xe7   : > { %v329_v14 = vpop.f32.mrb[2].mxu1  ;;  %v438_v15 = vpop.f32.mrb[3].mxu0 }
  0xe8   : > { %v339_v16 = vadd.f32 %v422_v9, %v327_v11  ;;  %v446_v17 = vpop.f32.mrb[3].mxu1 }
  0xea   : > { %v340_v18 = vpack.c.bf16 %v339_v16, %v339_v16 }
  0xec   : > { %342 = vst.msk [vmem:[%s209_s10] sm:$0xf] %vm341_vm2, %v340_v18 }
  0xed PF: > { %s14_s15 = sadd.s32 1, %s467_s15  }
  0xee   : > { %p11_p4 = scmp.ge.s32.totalorder %s14_s15, 4  }
  0xf0   :  { %13 = sbr.rel (!%p11_p4) target bundleno = 1 (0x1), region = 69 }

// kernel: run.51
= control target key start
LH: loop header
LB: loop body
LE: loop exit
PB: predicated region body
PF: predicated region fallthrough
CT: control target
= control target key end

     0   :  { %s999_s11 = smov 0   ;;  %s1072_s0 = inlined_call_operand.vmem [shape: bf16[32,32], index: 0, kind: input, shape index: {}]   ;;  %s1073_s1 = inlined_call_operand.vmem [shape: bf16[32,32], index: 1, kind: input, shape index: {}]   ;;  %s1074_s2 = inlined_call_operand.vmem [shape: bf16[32,32], index: 2, kind: input, shape index: {}]   ;;  %s1075_s3 = inlined_call_operand.vmem [shape: bf16[96,64], index: 3, kind: input, shape index: {}]   ;;  %s1076_s4 = inlined_call_operand.vmem [shape: f32[1,64], index: 4, kind: input, shape index: {}]   ;;  %s1077_s5 = inlined_call_operand.vmem [shape: bf16[64,128], index: 5, kind: input, shape index: {}]   ;;  %s1078_s6 = inlined_call_operand.vmem [shape: f32[1,128], index: 6, kind: input, shape index: {}]   ;;  %s1079_s7 = inlined_call_operand.vmem [shape: f32[1,64], index: 7, kind: input, shape index: {}]   ;;  %s1080_s8 = inlined_call_operand.<no memory space> [shape: f32[1,1], index: 8, kind: input, shape index: {}]   ;;  %s1081_s9 = inlined_call_operand.vmem [shape: f32[32,128], index: 9, kind: output, shape index: {}]  }
   0x1   :  { %v14_v0 = vstv %s1080_s8 }
   0x2   :  { %15 = vst [vmem:[#allocation2] sm:$0x1] %v14_v0 }
   0x3 LB: > { %s813_s12 = sadd.s32 4294967295, %s941_s11   ;;  %p817_p0 = scmp.ge.s32.totalorder %s941_s11, 1  ;;  %s941_s11 = sphi %s999_s11, %s21_s11  }
   0x4   : > { %p312_p1 = scmp.lt.s32.totalorder %s941_s11, 3 }
   0x6   : > { %p313_p2 = pnand %p817_p0, %p312_p1 }
   0x7   : > { %v914_v1 = vld [vmem:[%s1075_s3 + $0x10] sm:$0xff] (!%p313_p2)   ;;  %v943_v2 = vmov (!%p313_p2), 0.0   ;;  %v915_v3 = vld [vmem:[%s1075_s3] sm:$0xff] (!%p313_p2)   ;;  %v916_v4 = vld [vmem:[%s1075_s3 + $0x18] sm:$0xff] (!%p313_p2)   ;;  %vm944_vm0 = vmmov (!%p313_p2), 0   ;;  %s818_s18 = sshll.u32 (!%p313_p2), %s813_s12, 1 }
   0x8   : > { %316 = sbr.rel (%p313_p2) target bundleno = 553 (0x229), region = 56  ;;  %865 = vmatprep.subr.bf16.mxu0 (!%p313_p2), %v943_v2  ;;  %873 = vmatprep.subr.bf16.mxu1 (!%p313_p2), %v943_v2  ;;  %v917_v5 = vld [vmem:[%s1075_s3 + $0x8] sm:$0xff] (!%p313_p2)   ;;  %p359_p3 = scmp.lt.s32.totalorder (!%p313_p2), %s818_s18, 3  ;;  %vm416_vm1 = vcmask (!%p313_p2), 261120   ;;  %v920_v6 = vld [vmem:[%s1075_s3 + $0x20] sm:$0xff] (!%p313_p2)   ;;  %v925_v13 = vld [vmem:[%s1077_s5 + $0x10] sm:$0xff] (!%p313_p2)  }
   0x9   : > { %866 = vmatpush3.bf16.msra.mxu0 (!%p313_p2), %v914_v1  ;;  %869 = vmatprep.mubr.msk.bf16.mxu0 (!%p313_p2), %vm944_vm0, %v943_v2  ;;  %v921_v9 = vld [vmem:[%s1075_s3 + $0x28] sm:$0xff] (!%p313_p2)   ;;  %v923_v11 = vld [vmem:[%s1077_s5] sm:$0xff] (!%p313_p2)   ;;  %v926_v14 = vld [vmem:[%s1077_s5 + $0x18] sm:$0xff] (!%p313_p2)   ;;  %vm638_vm2 = vcmask (!%p313_p2), 523264   ;;  %v945_v42 = vmov (!%p313_p2), 0  }
   0xa   : > { %874 = vmatpush3.bf16.msra.mxu1 (!%p313_p2), %v915_v3  ;;  %867 = vmatprep.subr.bf16.mxu0 (!%p313_p2), %v943_v2  ;;  %v924_v12 = vld [vmem:[%s1077_s5 + $0x8] sm:$0xff] (!%p313_p2)   ;;  %v838_v26 = vld [vmem:[%s1076_s4] ss:$0 sm:$0xff] (!%p313_p2) }
   0xb   : > { %875 = vmatprep.subr.bf16.mxu1 (!%p313_p2), %v943_v2  ;;  %877 = vmatprep.mubr.msk.bf16.mxu1 (!%p313_p2), %vm944_vm0, %v943_v2  ;;  %v845_v33 = vld [vmem:[%s1079_s7] ss:$0 sm:$0xff] (!%p313_p2) }
   0xc   : > { %912 = vset.pattern.permute.xlu1 (!%p313_p2), %v945_v42  ;;  %913 = vset.pattern.permute.xlu0 (!%p313_p2), %v945_v42  ;;  %v846_v43 = vld [vmem:[#allocation2] ss:$0 sm:$0xff] (!%p313_p2) }
   0xd   : > { %868 = vmatpush3.bf16.msra.mxu0 (!%p313_p2), %v916_v4  ;;  %v839_v60 = vld [vmem:[%s1078_s6] ss:$0 sm:$0xff] (!%p313_p2) }
   0xe   : > { %876 = vmatpush3.bf16.msra.mxu1 (!%p313_p2), %v917_v5  ;;  %881 = vmatprep.subr.bf16.mxu0 (!%p313_p2), %v943_v2 }
   0xf   : > { %s1083_s18 = smov (!%p359_p3, %s818_s18), 3  ;;  %889 = vmatprep.subr.bf16.mxu1 %v943_v2 }
  0x10   : > { %s819_s21 = sshll.u32 %s1083_s18, 2 }
  0x11   : > { %s368_s26 = scalar_lea.vmem %s1073_s1, %s819_s21  ;;  %s362_s29 = scalar_lea.vmem %s1072_s0, %s819_s21 }
  0x12   : > { %v918_v7 = vld [vmem:[%s368_s26] sm:$0xff]   ;;  %s374_s12 = scalar_lea.vmem %s1074_s2, %s819_s21 }
  0x13   : > { %v919_v8 = vld [vmem:[%s362_s29] sm:$0xff]   ;;  %870 = vmatmul.mubr.msk.bf16.vlgmr.msra.gmra.mrb[0].mxu0 %vm416_vm1, %v918_v7  ;;  %s825_s29 = sshll.u32 %s1083_s18, 3 }
  0x14   : > { %878 = vmatmul.mubr.msk.bf16.vlgmr.msra.gmra.mrb[0].mxu1 %vm416_vm1, %v919_v8  ;;  %882 = vmatpush3.bf16.msra.mxu0 %v920_v6  ;;  %v922_v10 = vld [vmem:[%s374_s12] sm:$0xff]   ;;  %s380_s12 = scalar_lea.vmem %s1081_s9, %s825_s29 }
  0x15   : > { %883 = vmatprep.subr.bf16.mxu0 %v943_v2  ;;  %885 = vmatprep.mubr.msk.bf16.mxu0 %vm944_vm0, %v943_v2 }
  0x16   : > { %897 = vmatprep.mubr.msk.bf16.mxu1 %vm944_vm0, %v943_v2  ;;  %890 = vmatpush3.bf16.msra.mxu1 %v923_v11 }
  0x17   : > { %891 = vmatprep.subr.bf16.mxu1 %v943_v2 }
  0x18   : > { %884 = vmatpush3.bf16.msra.mxu0 %v921_v9 }
  0x1a   : > { %892 = vmatpush3.bf16.msra.mxu1 %v924_v12 }
  0x1b   : > { %886 = vmatmul.mubr.msk.bf16.vlgmr.msra.gmra.mrb[4].mxu0 %vm416_vm1, %v922_v10  ;;  %893 = vmatprep.subr.bf16.mxu1 %v943_v2 }
  0x1e   : > { %894 = vmatpush3.bf16.msra.mxu1 %v925_v13 }
  0x1f   : > { %895 = vmatprep.subr.bf16.mxu1 %v943_v2 }
  0x22   : > { %896 = vmatpush3.bf16.msra.mxu1 %v926_v14 }
  0xe6   : > { %v454_v15 = vpop.f32.mrb[0].mxu0 }
  0xe7   : > { %v515_v16 = vpop.f32.mrb[0].mxu1  ;;  %v871_v17 = vpop.f32.mrb[1].mxu0 }
  0xe8   : > { %v516_v18 = vadd.f32 %v515_v16, %v454_v15  ;;  %v879_v19 = vpop.f32.mrb[1].mxu1  ;;  %v457_v20 = vpop.f32.mrb[2].mxu0 }
  0xe9   : > { %v518_v21 = vpop.f32.mrb[2].mxu1  ;;  %v872_v22 = vpop.f32.mrb[3].mxu0 }
  0xea   : > { %v519_v23 = vadd.f32 %v518_v21, %v457_v20  ;;  %v880_v24 = vpop.f32.mrb[3].mxu1 }
  0xee   : > { %v578_v25 = vpop.f32.mrb[4].mxu0 }
  0xef   : > { %v585_v27 = vadd.f32 %v578_v25, %v516_v18  ;;  %v887_v28 = vpop.f32.mrb[5].mxu0 }
  0xf0   : > { %v581_v29 = vpop.f32.mrb[6].mxu0 }
  0xf1   : > { %v594_v30 = vadd.f32 %v838_v26, %v585_v27  ;;  %v586_v31 = vadd.f32 %v581_v29, %v519_v23  ;;  %v888_v32 = vpop.f32.mrb[7].mxu0 }
  0xf3   : > { %v596_v34 = vmax.f32 %v594_v30, 0.0  ;;  %v595_v35 = vadd.f32 %v838_v26, %v586_v31 }
  0xf5   : > { %v597_v36 = vmax.f32 %v595_v35, 0.0  ;;  %v690_v37 = vmul.f32 %v845_v33, %v596_v34 }
  0xf7   : > { %v598_v38 = vpack.c.bf16 %v597_v36, %v596_v34  ;;  %v692_v39 = vsel %vm638_vm2, %v690_v37, 0.0  ;;  %v691_v40 = vmul.f32 %v845_v33, %v597_v36 }
  0xf8   : > { %693 = vadd.xlane.f32.xlu0 %v692_v39 }
  0xf9   : > { %898 = vmatmul.mubr.msk.bf16.vlgmr.msra.gmra.mrb[4].mxu1 %vm638_vm2, %v598_v38  ;;  %v695_v41 = vsel %vm638_vm2, %v691_v40, 0.0 }
  0xfc   : > { %696 = vadd.xlane.f32.xlu0 %v695_v41 }
 0x185   : > { %v694_v44 = vpop.xlane.xlu0 %693 }
 0x186   : > { %v705_v45 = vadd.f32 %v846_v43, %v694_v44 }
 0x188   : > { %v847_v46 = vmul.f32 -1.442695, %v705_v45 }
 0x189   : > { %v697_v47 = vpop.xlane.xlu0 %696 }
 0x18a   : > { %927 = vpow2.f32 %v847_v46  ;;  %v706_v48 = vadd.f32 %v846_v43, %v697_v47 }
 0x18c   : > { %v848_v49 = vmul.f32 -1.442695, %v706_v48 }
 0x18e   : > { %929 = vpow2.f32 %v848_v49 }
 0x194   : > { %v928_v50 = vpop.eup %927 }
 0x195   : > { %v713_v51 = vadd.f32 1.0, %v928_v50 }
 0x197   : > { %931 = vrcp.f32 %v713_v51 }
 0x198   : > { %v930_v52 = vpop.eup %929 }
 0x199   : > { %v714_v53 = vadd.f32 1.0, %v930_v52 }
 0x19b   : > { %933 = vrcp.f32 %v714_v53 }
 0x1a1   : > { %v932_v54 = vpop.eup %931 }
 0x1a2   : > { %721 = vperm.xlu1 %912, %v932_v54  }
 0x1a5   : > { %v934_v55 = vpop.eup %933 }
 0x1a6   : > { %726 = vperm.xlu1 %912, %v934_v55  }
 0x1cc   : > { %v676_v56 = vpop.f32.mrb[4].mxu1 }
 0x1cd   : > { %v899_v57 = vpop.f32.mrb[5].mxu1  ;;  %v677_v61 = vadd.f32 %v839_v60, %v676_v56 }
 0x1ce   : > { %v679_v58 = vpop.f32.mrb[6].mxu1 }
 0x1cf   : > { %v900_v59 = vpop.f32.mrb[7].mxu1  ;;  %v680_v0 = vadd.f32 %v839_v60, %v679_v58 }
 0x221   : > { %v722_v62 = vpop.permute.xlu1 %721 }
 0x222   : > { %v729_v63 = vmul.f32 %v722_v62, %v677_v61 }
 0x224   : > { %731 = vst [vmem:[%s380_s12] sm:$0xff] %v729_v63 }
 0x225   : > { %v727_v1 = vpop.permute.xlu1 %726 }
 0x226   : > { %v730_v2 = vmul.f32 %v727_v1, %v680_v0 }
 0x228   : > { %732 = vst [vmem:[%s380_s12 + $0x8] sm:$0xff] %v730_v2 }
 0x229 PF: > { %s21_s11 = sadd.s32 1, %s941_s11  }
 0x22a   : > { %p18_p4 = scmp.ge.s32.totalorder %s21_s11, 4  }
 0x22c   :  { %20 = sbr.rel (!%p18_p4) target bundleno = 3 (0x3), region = 92 }

// kernel: run.41
= control target key start
LH: loop header
LB: loop body
LE: loop exit
PB: predicated region body
PF: predicated region fallthrough
CT: control target
= control target key end

     0   :  { %s1853_s18 = smov 0   ;;  %s2050_s0 = inlined_call_operand.vmem [shape: bf16[10,32], index: 0, kind: input, shape index: {}]   ;;  %s2051_s1 = inlined_call_operand.vmem [shape: f32[10,64], index: 1, kind: input, shape index: {}]   ;;  %s2052_s2 = inlined_call_operand.vmem [shape: f32[10,32], index: 2, kind: input, shape index: {}]   ;;  %s2053_s3 = inlined_call_operand.vmem [shape: f32[10,32], index: 3, kind: input, shape index: {}]   ;;  %s2054_s4 = inlined_call_operand.vmem [shape: f32[10,1], index: 4, kind: input, shape index: {}]   ;;  %s2055_s5 = inlined_call_operand.vmem [shape: f32[10,64], index: 5, kind: input, shape index: {}]   ;;  %s2056_s6 = inlined_call_operand.vmem [shape: f32[10,32], index: 6, kind: input, shape index: {}]   ;;  %s2057_s7 = inlined_call_operand.vmem [shape: f32[10,32], index: 7, kind: input, shape index: {}]   ;;  %s2058_s8 = inlined_call_operand.vmem [shape: f32[10,1], index: 8, kind: input, shape index: {}]   ;;  %s2059_s9 = inlined_call_operand.vmem [shape: bf16[160,32], index: 9, kind: input, shape index: {}]   ;;  %s2060_s10 = inlined_call_operand.vmem [shape: f32[1,32], index: 10, kind: input, shape index: {}]   ;;  %s2061_s11 = inlined_call_operand.vmem [shape: bf16[160,32], index: 11, kind: input, shape index: {}]   ;;  %s2062_s12 = inlined_call_operand.vmem [shape: f32[1,32], index: 12, kind: input, shape index: {}]   ;;  %s2063_s13 = inlined_call_operand.vmem [shape: bf16[32,32], index: 13, kind: input, shape index: {}]   ;;  %s2064_s14 = inlined_call_operand.vmem [shape: f32[1,32], index: 14, kind: input, shape index: {}]   ;;  %s2065_s15 = inlined_call_operand.vmem [shape: bf16[10,32], index: 15, kind: output, shape index: {}]  }
   0x1 LB: > { %s1512_s19 = sadd.s32 4294967295, %s1767_s18   ;;  %p1516_p0 = scmp.ge.s32.totalorder %s1767_s18, 1  ;;  %s1767_s18 = sphi %s1853_s18, %s25_s18  }
   0x2   : > { %p508_p1 = scmp.lt.s32.totalorder %s1767_s18, 3 }
   0x4   : > { %p509_p2 = pnand %p1516_p0, %p508_p1 }
   0x5   : > { %p586_p3 = scmp.lt.s32.totalorder (!%p509_p2), %s1512_s19, 1  ;;  %v1735_v0 = vld [vmem:[%s2059_s9 + $0x10] sm:$0xff] (!%p509_p2)   ;;  %v1769_v1 = vmov (!%p509_p2), 0   ;;  %v1770_v2 = vmov (!%p509_p2), 0.0   ;;  %v1736_v3 = vld [vmem:[%s2059_s9 + $0x18] sm:$0xff] (!%p509_p2)   ;;  %vm1771_vm0 = vmmov (!%p509_p2), 0  }
   0x6   : > { %512 = sbr.rel (%p509_p2) target bundleno = 770 (0x302), region = 80  ;;  %1733 = vset.pattern.permute.xlu0 (!%p509_p2), %v1769_v1  ;;  %1598 = vmatprep.subr.bf16.mxu1 (!%p509_p2), %v1770_v2  ;;  %vm682_vm1 = vcmask (!%p509_p2), 261120   ;;  %v1737_v8 = vld [vmem:[%s2059_s9] sm:$0xff] (!%p509_p2)   ;;  %v1738_v11 = vld [vmem:[%s2059_s9 + $0x8] sm:$0xff] (!%p509_p2)   ;;  %v1741_v24 = vld [vmem:[%s2059_s9 + $0x30] sm:$0xff] (!%p509_p2)   ;;  %vm1361_vm6 = vcmask (!%p509_p2), 257024  }
   0x7   : > { %1599 = vmatpush3.bf16.msra.mxu1 (!%p509_p2), %v1735_v0  ;;  %1734 = vset.pattern.permute.xlu1 (!%p509_p2), %v1769_v1  ;;  %v1739_v14 = vld [vmem:[%s2059_s9 + $0x20] sm:$0xff] (!%p509_p2)   ;;  %v1740_v15 = vld [vmem:[%s2059_s9 + $0x28] sm:$0xff] (!%p509_p2)   ;;  %v1742_v29 = vld [vmem:[%s2059_s9 + $0x38] sm:$0xff] (!%p509_p2)  }
   0x8   : > { %1600 = vmatprep.subr.bf16.mxu1 (!%p509_p2), %v1770_v2  ;;  %1602 = vmatprep.mubr.msk.bf16.mxu1 (!%p509_p2), %vm1771_vm0, %v1770_v2  ;;  %v1743_v17 = vld [vmem:[%s2059_s9 + $0x40] sm:$0xff] (!%p509_p2)   ;;  %v1744_v18 = vld [vmem:[%s2059_s9 + $0x48] sm:$0xff] (!%p509_p2)   ;;  %v1745_v38 = vld [vmem:[%s2061_s11 + $0x10] sm:$0xff] (!%p509_p2)  }
   0x9   : > { %1630 = vmatprep.subr.bf16.mxu0 (!%p509_p2), %v1770_v2  ;;  %1634 = vmatprep.mubr.msk.bf16.mxu0 (!%p509_p2), %vm1771_vm0, %v1770_v2  ;;  %v1755_v37 = vld [vmem:[%s2063_s13] sm:$0xff] (!%p509_p2)   ;;  %v1746_v40 = vld [vmem:[%s2061_s11 + $0x18] sm:$0xff] (!%p509_p2)   ;;  %v1748_v43 = vld [vmem:[%s2061_s11 + $0x8] sm:$0xff] (!%p509_p2)  }
   0xa   : > { %1631 = vmatpush3.bf16.msra.mxu0 (!%p509_p2), %v1743_v17  ;;  %v1747_v42 = vld [vmem:[%s2061_s11] sm:$0xff] (!%p509_p2)   ;;  %v1750_v46 = vld [vmem:[%s2061_s11 + $0x28] sm:$0xff] (!%p509_p2)   ;;  %v1751_v50 = vld [vmem:[%s2061_s11 + $0x30] sm:$0xff] (!%p509_p2)  }
   0xb   : > { %1601 = vmatpush3.bf16.msra.mxu1 (!%p509_p2), %v1736_v3  ;;  %1632 = vmatprep.subr.bf16.mxu0 (!%p509_p2), %v1770_v2  ;;  %v1749_v44 = vld [vmem:[%s2061_s11 + $0x20] sm:$0xff] (!%p509_p2)   ;;  %v1752_v51 = vld [vmem:[%s2061_s11 + $0x38] sm:$0xff] (!%p509_p2)   ;;  %v1754_v56 = vld [vmem:[%s2061_s11 + $0x48] sm:$0xff] (!%p509_p2)  }
   0xc   : > { %1606 = vmatprep.subr.bf16.mxu1 (!%p509_p2), %v1770_v2  ;;  %v1753_v54 = vld [vmem:[%s2061_s11 + $0x40] sm:$0xff] (!%p509_p2)   ;;  %v1756_v62 = vld [vmem:[%s2063_s13 + $0x8] sm:$0xff] (!%p509_p2)  }
   0xd   : > { %s2067_s19 = smov (!%p586_p3, %s1512_s19), 1  ;;  %v1542_v63 = vld [vmem:[%s2060_s10] ss:$0 sm:$0xff] }
   0xe   : > { %s1874_s24 = sshll.u32 %s2067_s19, 3  ;;  %s1517_s23 = sshll.u32 %s2067_s19, 2  ;;  %1633 = vmatpush3.bf16.msra.mxu0 %v1744_v18 }
   0xf   : > { %s605_s27 = scalar_lea.vmem %s2054_s4, %s1874_s24  ;;  %s621_s30 = scalar_lea.vmem %s2058_s8, %s1874_s24  ;;  %1638 = vmatprep.subr.bf16.mxu0 %v1770_v2 }
  0x10   : > { %v631_v4 = vld [vmem:[%s605_s27] sm:$0xff]  ;;  %s593_s20 = scalar_lea.vmem %s2051_s1, %s1874_s24  ;;  %s589_s29 = scalar_lea.vmem %s2050_s0, %s1517_s23 }
  0x11   : > { %v965_v5 = vld [vmem:[%s621_s30] sm:$0xff]  ;;  %v661_v6 = vmax.f32 %v631_v4, 1.0  ;;  %vm653_vm2 = vcmp.gt.f32.partialorder %v631_v4, 0.0  ;;  %s609_s21 = scalar_lea.vmem %s2055_s5, %s1874_s24  ;;  %s601_s26 = scalar_lea.vmem %s2053_s3, %s1874_s24 }
  0x12   : > { %v628_v7 = vld [vmem:[%s593_s20] sm:$0xff]  ;;  %v995_v9 = vmax.f32 %v965_v5, 1.0  ;;  %v654_v12 = vsel %vm653_vm2, 1, %v1769_v1  ;;  %vm987_vm3 = vcmp.gt.f32.partialorder %v965_v5, 0.0  ;;  %s613_s20 = scalar_lea.vmem %s2056_s6, %s1874_s24 }
  0x13   : > { %v669_v10 = vpack.c.bf16 %v628_v7, %v628_v7  ;;  %664 = vperm.xlu0 %1733, %v661_v6   ;;  %v1909_v13 = vld [vmem:[%s589_s29] sm:$0xf]  ;;  %v988_v16 = vsel %vm987_vm3, 1, %v1769_v1  ;;  %s597_s29 = scalar_lea.vmem %s2052_s2, %s1874_s24 }
  0x14   : > { %v629_v21 = vld [vmem:[%s597_s29] sm:$0xff]  ;;  %s1772_s29 = smov 96  }
  0x15   : > { %1603 = vmatmul.mubr.msk.bf16.vlgmr.msra.gmra.mrb[0].mxu1 %vm682_vm1, %v669_v10  ;;  %v962_v31 = vld [vmem:[%s609_s21] sm:$0xff] }
  0x16   : > { %1607 = vmatpush3.bf16.msra.mxu1 %v1737_v8  ;;  %1610 = vmatprep.mubr.msk.bf16.mxu1 %vm1771_vm0, %v1770_v2  ;;  %v630_v32 = vld [vmem:[%s601_s26] sm:$0xff]  ;;  %v1003_v41 = vpack.c.bf16 %v962_v31, %v962_v31 }
  0x17   : > { %1608 = vmatprep.subr.bf16.mxu1 %v1770_v2  ;;  %998 = vperm.xlu0 %1733, %v995_v9   ;;  %v963_v47 = vld [vmem:[%s613_s20] sm:$0xff] }
  0x18   : > { %v1558_v1 = vld [vmem:[%s2062_s12] ss:$0 sm:$0xff] }
  0x19   : > { %v1559_v9 = vld [vmem:[%s2064_s14] ss:$0 sm:$0xff] }
  0x1a   : > { %1609 = vmatpush3.bf16.msra.mxu1 %v1738_v11 }
  0x1b   : > { %1614 = vmatprep.subr.bf16.mxu1 %v1770_v2  ;;  %656 = vperm.xlu0 %1733, %v654_v12  }
  0x21   : > { %1611 = vmatmul.mubr.msk.bf16.vlgmr.msra.gmra.mrb[0].mxu1 %vm682_vm1, %v1909_v13 }
  0x22   : > { %1615 = vmatpush3.bf16.msra.mxu1 %v1739_v14  ;;  %1618 = vmatprep.mubr.msk.bf16.mxu1 %vm1771_vm0, %v1770_v2 }
  0x23   : > { %1616 = vmatprep.subr.bf16.mxu1 %v1770_v2 }
  0x26   : > { %1617 = vmatpush3.bf16.msra.mxu1 %v1740_v15 }
  0x27   : > { %1622 = vmatprep.subr.bf16.mxu1 %v1770_v2 }
  0x92   : > { %v665_v19 = vpop.permute.xlu0 %664 }
  0x93   : > { %1757 = vrcp.f32 %v665_v19 }
  0x96   : > { %v999_v20 = vpop.permute.xlu0 %998 }
  0x97   : > { %1759 = vrcp.f32 %v999_v20 }
  0x9a   : > { %v657_v22 = vpop.permute.xlu0 %656 }
  0x9b   : > { %vm658_vm4 = vcmp.eq.s32.totalorder %v657_v22, 1 }
  0x9c   : > { %v659_v23 = vsel %vm658_vm4, %v629_v21, 0.0  ;;  %v660_v34 = vsel %vm658_vm4, %v630_v32, 0.0 }
  0x9d   : > { %v1758_v25 = vpop.eup %1757  ;;  %v781_v26 = vpack.c.bf16 %v659_v23, %v659_v23  ;;  %v838_v36 = vpack.c.bf16 %v660_v34, %v660_v34 }
  0x9e   : > { %v668_v27 = vmul.f32 %v1758_v25, %v628_v7 }
  0x9f   : > { %1619 = vmatmul.mubr.msk.bf16.vlgmr.msra.gmra.mrb[0].mxu1 %vm682_vm1, %v781_v26 }
  0xa0   : > { %v895_v28 = vpack.c.bf16 %v668_v27, %v668_v27  ;;  %1623 = vmatpush3.bf16.msra.mxu1 %v1741_v24  ;;  %1626 = vmatprep.mubr.msk.bf16.mxu1 %vm1771_vm0, %v1770_v2 }
  0xa1   : > { %v1760_v30 = vpop.eup %1759  ;;  %1624 = vmatprep.subr.bf16.mxu1 %v1770_v2 }
  0xa2   : > { %897 = vrot.lane.b32.xlu1 %v895_v28, %s1772_s29  ;;  %v1002_v33 = vmul.f32 %v1760_v30, %v962_v31 }
  0xa4   : > { %1625 = vmatpush3.bf16.msra.mxu1 %v1742_v29  ;;  %v1225_v35 = vpack.c.bf16 %v1002_v33, %v1002_v33 }
  0xa5   : > { %1678 = vmatprep.subr.bf16.mxu1 %v1770_v2 }
  0xa6   : > { %990 = vperm.xlu1 %1734, %v988_v16  }
  0xaa   : > { %1227 = vrot.lane.b32.xlu1 %v1225_v35, %s1772_s29  ;;  %s617_s29 = scalar_lea.vmem %s2057_s7, %s1874_s24  ;;  %s625_s24 = scalar_lea.vmem %s2065_s15, %s1517_s23 }
  0xab   : > { %1627 = vmatmul.mubr.msk.bf16.vlgmr.msra.gmra.mrb[0].mxu1 %vm682_vm1, %v838_v36  ;;  %v964_v52 = vld [vmem:[%s617_s29] sm:$0xff] }
  0xac   : > { %1682 = vmatprep.mubr.msk.bf16.mxu1 %vm1771_vm0, %v1770_v2  ;;  %1679 = vmatpush3.bf16.msra.mxu1 %v1755_v37 }
  0xad   : > { %1680 = vmatprep.subr.bf16.mxu1 %v1770_v2 }
  0xb0   : > { %1681 = vmatpush3.bf16.msra.mxu1 %v1756_v62 }
 0x114   : > { %v898_v39 = vpop.permute.xlu1 %897 }
 0x115   : > { %1635 = vmatmul.mubr.msk.bf16.vlgmr.msra.gmra.mrb[0].mxu0 %vm682_vm1, %v898_v39 }
 0x116   : > { %1639 = vmatpush3.bf16.msra.mxu0 %v1745_v38  ;;  %1642 = vmatprep.mubr.msk.bf16.mxu0 %vm1771_vm0, %v1770_v2 }
 0x117   : > { %1640 = vmatprep.subr.bf16.mxu0 %v1770_v2 }
 0x11a   : > { %1641 = vmatpush3.bf16.msra.mxu0 %v1746_v40 }
 0x11b   : > { %1646 = vmatprep.subr.bf16.mxu0 %v1770_v2 }
 0x121   : > { %1643 = vmatmul.mubr.msk.bf16.vlgmr.msra.gmra.mrb[0].mxu0 %vm682_vm1, %v1003_v41 }
 0x122   : > { %1647 = vmatpush3.bf16.msra.mxu0 %v1747_v42  ;;  %1650 = vmatprep.mubr.msk.bf16.mxu0 %vm1771_vm0, %v1770_v2 }
 0x123   : > { %1648 = vmatprep.subr.bf16.mxu0 %v1770_v2 }
 0x125   : > { %v991_v45 = vpop.permute.xlu1 %990 }
 0x126   : > { %1649 = vmatpush3.bf16.msra.mxu0 %v1748_v43  ;;  %vm992_vm5 = vcmp.eq.s32.totalorder %v991_v45, 1 }
 0x127   : > { %1654 = vmatprep.subr.bf16.mxu0 %v1770_v2  ;;  %v993_v48 = vsel %vm992_vm5, %v963_v47, 0.0  ;;  %v994_v53 = vsel %vm992_vm5, %v964_v52, 0.0 }
 0x128   : > { %v1111_v49 = vpack.c.bf16 %v993_v48, %v993_v48  ;;  %v1168_v55 = vpack.c.bf16 %v994_v53, %v994_v53 }
 0x129   : > { %v1228_v57 = vpop.permute.xlu1 %1227 }
 0x12d   : > { %1651 = vmatmul.mubr.msk.bf16.vlgmr.msra.gmra.mrb[0].mxu0 %vm682_vm1, %v1909_v13 }
 0x12e   : > { %1655 = vmatpush3.bf16.msra.mxu0 %v1749_v44  ;;  %1658 = vmatprep.mubr.msk.bf16.mxu0 %vm1771_vm0, %v1770_v2 }
 0x12f   : > { %1656 = vmatprep.subr.bf16.mxu0 %v1770_v2 }
 0x132   : > { %1657 = vmatpush3.bf16.msra.mxu0 %v1750_v46 }
 0x133   : > { %1662 = vmatprep.subr.bf16.mxu0 %v1770_v2 }
 0x139   : > { %1659 = vmatmul.mubr.msk.bf16.vlgmr.msra.gmra.mrb[0].mxu0 %vm682_vm1, %v1111_v49 }
 0x13a   : > { %1663 = vmatpush3.bf16.msra.mxu0 %v1751_v50  ;;  %1666 = vmatprep.mubr.msk.bf16.mxu0 %vm1771_vm0, %v1770_v2 }
 0x13b   : > { %1664 = vmatprep.subr.bf16.mxu0 %v1770_v2 }
 0x13e   : > { %1665 = vmatpush3.bf16.msra.mxu0 %v1752_v51 }
 0x13f   : > { %1670 = vmatprep.subr.bf16.mxu0 %v1770_v2 }
 0x145   : > { %1667 = vmatmul.mubr.msk.bf16.vlgmr.msra.gmra.mrb[0].mxu0 %vm682_vm1, %v1168_v55 }
 0x146   : > { %1671 = vmatpush3.bf16.msra.mxu0 %v1753_v54  ;;  %1674 = vmatprep.mubr.msk.bf16.mxu0 %vm1771_vm0, %v1770_v2 }
 0x147   : > { %1672 = vmatprep.subr.bf16.mxu0 %v1770_v2 }
 0x14a   : > { %1673 = vmatpush3.bf16.msra.mxu0 %v1754_v56 }
 0x151   : > { %1675 = vmatmul.mubr.msk.bf16.vlgmr.msra.gmra.mrb[0].mxu0 %vm682_vm1, %v1228_v57 }
 0x17e   : > { %v888_v58 = vpop.f32.mrb[0].mxu1 }
 0x17f   : > { %v1628_v59 = vpop.f32.mrb[1].mxu1  ;;  %v1686_v0 = vadd.f32 %v1542_v63, %v888_v58 }
 0x180   : > { %v891_v60 = vpop.f32.mrb[2].mxu1 }
 0x181   : > { %v1629_v61 = vpop.f32.mrb[3].mxu1  ;;  %v1687_v2 = vadd.f32 %v1686_v0, %v1558_v1 }
 0x224   : > { %v1278_v3 = vpop.f32.mrb[0].mxu0 }
 0x225   : > { %v1688_v4 = vadd.f32 %v1687_v2, %v1278_v3  ;;  %v1676_v5 = vpop.f32.mrb[1].mxu0 }
 0x226   : > { %v1281_v6 = vpop.f32.mrb[2].mxu0 }
 0x227   : > { %v1293_v7 = vpack.c.bf16 %v1688_v4, %v1688_v4  ;;  %v1677_v8 = vpop.f32.mrb[3].mxu0 }
 0x229   : > { %1683 = vmatmul.mubr.msk.bf16.vlgmr.msra.gmra.mrb[4].mxu1 %vm682_vm1, %v1293_v7 }
 0x2fc   : > { %v1354_v10 = vpop.f32.mrb[4].mxu1 }
 0x2fd   : > { %v1355_v11 = vadd.f32 %v1559_v9, %v1354_v10  ;;  %v1684_v12 = vpop.f32.mrb[5].mxu1 }
 0x2fe   : > { %v1357_v13 = vpop.f32.mrb[6].mxu1 }
 0x2ff   : > { %v1360_v14 = vpack.c.bf16 %v1355_v11, %v1355_v11  ;;  %v1685_v15 = vpop.f32.mrb[7].mxu1 }
 0x301   : > { %1362 = vst.msk [vmem:[%s625_s24] sm:$0xf] %vm1361_vm6, %v1360_v14 }
 0x302 PF: > { %s25_s18 = sadd.s32 1, %s1767_s18  }
 0x303   : > { %p22_p4 = scmp.ge.s32.totalorder %s25_s18, 4  }
 0x305   :  { %24 = sbr.rel (!%p22_p4) target bundleno = 1 (0x1), region = 134 }

// kernel: run.61
= control target key start
LH: loop header
LB: loop body
LE: loop exit
PB: predicated region body
PF: predicated region fallthrough
CT: control target
= control target key end

     0   :  { %s653_s24 = smov 0   ;;  %s704_s0 = inlined_call_operand.vmem [shape: bf16[12,32], index: 0, kind: input, shape index: {}]   ;;  %s705_s1 = inlined_call_operand.vmem [shape: bf16[32,32], index: 1, kind: input, shape index: {}]   ;;  %s706_s2 = inlined_call_operand.vmem [shape: f32[1,32], index: 2, kind: input, shape index: {}]   ;;  %s707_s3 = inlined_call_operand.vmem [shape: bf16[32,32], index: 3, kind: input, shape index: {}]   ;;  %s708_s4 = inlined_call_operand.vmem [shape: f32[1,32], index: 4, kind: input, shape index: {}]   ;;  %s709_s5 = inlined_call_operand.vmem [shape: bf16[32,2], index: 5, kind: input, shape index: {}]   ;;  %s710_s6 = inlined_call_operand.vmem [shape: f32[1,2], index: 6, kind: input, shape index: {}]   ;;  %s711_s7 = inlined_call_operand.vmem [shape: f32[12,2], index: 7, kind: output, shape index: {}]  }
   0x1 LB: > { %s533_s25 = sadd.s32 4294967295, %s609_s24   ;;  %p537_p0 = scmp.ge.s32.totalorder %s609_s24, 1  ;;  %s609_s24 = sphi %s653_s24, %s17_s24  }
   0x2   : > { %p236_p1 = scmp.lt.s32.totalorder %s609_s24, 3 }
   0x4   : > { %p237_p2 = pnand %p537_p0, %p236_p1 }
   0x5   : > { %v597_v0 = vld [vmem:[%s705_s1] sm:$0xff] (!%p237_p2)   ;;  %v611_v1 = vmov (!%p237_p2), 0.0   ;;  %v598_v2 = vld [vmem:[%s705_s1 + $0x8] sm:$0xff] (!%p237_p2)   ;;  %vm612_vm0 = vmmov (!%p237_p2), 0   ;;  %p266_p3 = scmp.lt.s32.totalorder (!%p237_p2), %s533_s25, 1  ;;  %vm299_vm1 = vcmask (!%p237_p2), 261120  }
   0x6   : > { %240 = sbr.rel (%p237_p2) target bundleno = 666 (0x29a), region = 48  ;;  %563 = vmatprep.subr.bf16.mxu0 (!%p237_p2), %v611_v1  ;;  %571 = vmatprep.subr.bf16.mxu1 (!%p237_p2), %v611_v1  ;;  %v599_v4 = vld [vmem:[%s707_s3] sm:$0xff] (!%p237_p2)   ;;  %v600_v5 = vld [vmem:[%s707_s3 + $0x8] sm:$0xff] (!%p237_p2)   ;;  %vm478_vm2 = vcmask (!%p237_p2), 15360  }
   0x7   : > { %564 = vmatpush3.bf16.msra.mxu0 (!%p237_p2), %v597_v0  ;;  %567 = vmatprep.mubr.msk.bf16.mxu0 (!%p237_p2), %vm612_vm0, %v611_v1  ;;  %v601_v6 = vld [vmem:[%s709_s5] sm:$0xff] (!%p237_p2)   ;;  %v602_v15 = vld [vmem:[%s709_s5 + $0x8] sm:$0xff] (!%p237_p2)  }
   0x8   : > { %565 = vmatprep.subr.bf16.mxu0 (!%p237_p2), %v611_v1  ;;  %575 = vmatprep.mubr.msk.bf16.mxu1 (!%p237_p2), %vm612_vm0, %v611_v1  ;;  %v540_v7 = vld [vmem:[%s706_s2] ss:$0 sm:$0xff] (!%p237_p2) }
   0x9   : > { %572 = vmatpush3.bf16.msra.mxu1 (!%p237_p2), %v599_v4  ;;  %v544_v16 = vld [vmem:[%s708_s4] ss:$0 sm:$0xff] (!%p237_p2) }
   0xa   : > { %573 = vmatprep.subr.bf16.mxu1 (!%p237_p2), %v611_v1  ;;  %v548_v23 = vld [vmem:[%s710_s6] ss:$0 sm:$0xff] (!%p237_p2) }
   0xb   : > { %566 = vmatpush3.bf16.msra.mxu0 (!%p237_p2), %v598_v2 }
   0xc   : > { %579 = vmatprep.subr.bf16.mxu0 (!%p237_p2), %v611_v1 }
   0xd   : > { %s713_s25 = smov (!%p266_p3, %s533_s25), 1  ;;  %574 = vmatpush3.bf16.msra.mxu1 %v600_v5 }
   0xe   : > { %s538_s30 = sshll.u32 %s713_s25, 2  ;;  %s539_s23 = sshll.u32 %s713_s25, 3 }
   0xf   : > { %s269_s10 = scalar_lea.vmem %s704_s0, %s538_s30  ;;  %s273_s30 = scalar_lea.vmem %s711_s7, %s539_s23 }
  0x10   : > { %v275_v3 = vld [vmem:[%s269_s10] sm:$0xf] }
  0x11   : > { %568 = vmatmul.mubr.msk.bf16.vlgmr.msra.gmra.mrb[0].mxu0 %vm299_vm1, %v275_v3 }
  0x12   : > { %583 = vmatprep.mubr.msk.bf16.mxu0 %vm612_vm0, %v611_v1  ;;  %580 = vmatpush3.bf16.msra.mxu0 %v601_v6 }
  0x13   : > { %581 = vmatprep.subr.bf16.mxu0 %v611_v1 }
  0x16   : > { %582 = vmatpush3.bf16.msra.mxu0 %v602_v15 }
  0xe4   : > { %v337_v8 = vpop.f32.mrb[0].mxu0 }
  0xe5   : > { %v338_v9 = vadd.f32 %v540_v7, %v337_v8  ;;  %v569_v10 = vpop.f32.mrb[1].mxu0 }
  0xe6   : > { %v340_v11 = vpop.f32.mrb[2].mxu0 }
  0xe7   : > { %v343_v12 = vmax.f32 %v338_v9, 0.0  ;;  %v570_v13 = vpop.f32.mrb[3].mxu0 }
  0xe9   : > { %v344_v14 = vpack.c.bf16 %v343_v12, %v343_v12 }
  0xeb   : > { %576 = vmatmul.mubr.msk.bf16.vlgmr.msra.gmra.mrb[0].mxu1 %vm299_vm1, %v344_v14 }
 0x1be   : > { %v405_v17 = vpop.f32.mrb[0].mxu1 }
 0x1bf   : > { %v406_v18 = vadd.f32 %v544_v16, %v405_v17  ;;  %v577_v19 = vpop.f32.mrb[1].mxu1 }
 0x1c0   : > { %v408_v20 = vpop.f32.mrb[2].mxu1 }
 0x1c1   : > { %v411_v21 = vpack.c.bf16 %v406_v18, %v406_v18  ;;  %v578_v22 = vpop.f32.mrb[3].mxu1 }
 0x1c3   : > { %584 = vmatmul.mubr.msk.bf16.vlgmr.msra.gmra.mrb[4].mxu0 %vm299_vm1, %v411_v21 }
 0x296   : > { %v472_v24 = vpop.f32.mrb[4].mxu0 }
 0x297   : > { %v473_v25 = vadd.f32 %v548_v23, %v472_v24  ;;  %v585_v26 = vpop.f32.mrb[5].mxu0 }
 0x298   : > { %v475_v27 = vpop.f32.mrb[6].mxu0 }
 0x299   : > { %479 = vst.msk [vmem:[%s273_s30] sm:$0xff] %vm478_vm2, %v473_v25  ;;  %v586_v28 = vpop.f32.mrb[7].mxu0 }
 0x29a PF: > { %s17_s24 = sadd.s32 1, %s609_s24  }
 0x29b   : > { %p14_p4 = scmp.ge.s32.totalorder %s17_s24, 4  }
 0x29d   :  { %16 = sbr.rel (!%p14_p4) target bundleno = 1 (0x1), region = 78 }

// kernel: run.52
= control target key start
LH: loop header
LB: loop body
LE: loop exit
PB: predicated region body
PF: predicated region fallthrough
CT: control target
= control target key end

     0   :  { %s1853_s18 = smov 0   ;;  %s2050_s0 = inlined_call_operand.vmem [shape: bf16[12,32], index: 0, kind: input, shape index: {}]   ;;  %s2051_s1 = inlined_call_operand.vmem [shape: f32[12,64], index: 1, kind: input, shape index: {}]   ;;  %s2052_s2 = inlined_call_operand.vmem [shape: f32[12,32], index: 2, kind: input, shape index: {}]   ;;  %s2053_s3 = inlined_call_operand.vmem [shape: f32[12,32], index: 3, kind: input, shape index: {}]   ;;  %s2054_s4 = inlined_call_operand.vmem [shape: f32[12,1], index: 4, kind: input, shape index: {}]   ;;  %s2055_s5 = inlined_call_operand.vmem [shape: f32[12,64], index: 5, kind: input, shape index: {}]   ;;  %s2056_s6 = inlined_call_operand.vmem [shape: f32[12,32], index: 6, kind: input, shape index: {}]   ;;  %s2057_s7 = inlined_call_operand.vmem [shape: f32[12,32], index: 7, kind: input, shape index: {}]   ;;  %s2058_s8 = inlined_call_operand.vmem [shape: f32[12,1], index: 8, kind: input, shape index: {}]   ;;  %s2059_s9 = inlined_call_operand.vmem [shape: bf16[160,32], index: 9, kind: input, shape index: {}]   ;;  %s2060_s10 = inlined_call_operand.vmem [shape: f32[1,32], index: 10, kind: input, shape index: {}]   ;;  %s2061_s11 = inlined_call_operand.vmem [shape: bf16[160,32], index: 11, kind: input, shape index: {}]   ;;  %s2062_s12 = inlined_call_operand.vmem [shape: f32[1,32], index: 12, kind: input, shape index: {}]   ;;  %s2063_s13 = inlined_call_operand.vmem [shape: bf16[32,32], index: 13, kind: input, shape index: {}]   ;;  %s2064_s14 = inlined_call_operand.vmem [shape: f32[1,32], index: 14, kind: input, shape index: {}]   ;;  %s2065_s15 = inlined_call_operand.vmem [shape: bf16[12,32], index: 15, kind: output, shape index: {}]  }
   0x1 LB: > { %s1512_s19 = sadd.s32 4294967295, %s1767_s18   ;;  %p1516_p0 = scmp.ge.s32.totalorder %s1767_s18, 1  ;;  %s1767_s18 = sphi %s1853_s18, %s25_s18  }
   0x2   : > { %p508_p1 = scmp.lt.s32.totalorder %s1767_s18, 3 }
   0x4   : > { %p509_p2 = pnand %p1516_p0, %p508_p1 }
   0x5   : > { %p586_p3 = scmp.lt.s32.totalorder (!%p509_p2), %s1512_s19, 1  ;;  %v1735_v0 = vld [vmem:[%s2059_s9 + $0x10] sm:$0xff] (!%p509_p2)   ;;  %v1769_v1 = vmov (!%p509_p2), 0   ;;  %v1770_v2 = vmov (!%p509_p2), 0.0   ;;  %v1736_v3 = vld [vmem:[%s2059_s9 + $0x18] sm:$0xff] (!%p509_p2)   ;;  %vm1771_vm0 = vmmov (!%p509_p2), 0  }
   0x6   : > { %512 = sbr.rel (%p509_p2) target bundleno = 770 (0x302), region = 80  ;;  %1733 = vset.pattern.permute.xlu0 (!%p509_p2), %v1769_v1  ;;  %1598 = vmatprep.subr.bf16.mxu1 (!%p509_p2), %v1770_v2  ;;  %vm682_vm1 = vcmask (!%p509_p2), 261120   ;;  %v1737_v8 = vld [vmem:[%s2059_s9] sm:$0xff] (!%p509_p2)   ;;  %v1738_v11 = vld [vmem:[%s2059_s9 + $0x8] sm:$0xff] (!%p509_p2)   ;;  %v1741_v24 = vld [vmem:[%s2059_s9 + $0x30] sm:$0xff] (!%p509_p2)   ;;  %vm1361_vm6 = vcmask (!%p509_p2), 257024  }
   0x7   : > { %1599 = vmatpush3.bf16.msra.mxu1 (!%p509_p2), %v1735_v0  ;;  %1734 = vset.pattern.permute.xlu1 (!%p509_p2), %v1769_v1  ;;  %v1739_v14 = vld [vmem:[%s2059_s9 + $0x20] sm:$0xff] (!%p509_p2)   ;;  %v1740_v15 = vld [vmem:[%s2059_s9 + $0x28] sm:$0xff] (!%p509_p2)   ;;  %v1742_v29 = vld [vmem:[%s2059_s9 + $0x38] sm:$0xff] (!%p509_p2)  }
   0x8   : > { %1600 = vmatprep.subr.bf16.mxu1 (!%p509_p2), %v1770_v2  ;;  %1602 = vmatprep.mubr.msk.bf16.mxu1 (!%p509_p2), %vm1771_vm0, %v1770_v2  ;;  %v1743_v17 = vld [vmem:[%s2059_s9 + $0x40] sm:$0xff] (!%p509_p2)   ;;  %v1744_v18 = vld [vmem:[%s2059_s9 + $0x48] sm:$0xff] (!%p509_p2)   ;;  %v1745_v38 = vld [vmem:[%s2061_s11 + $0x10] sm:$0xff] (!%p509_p2)  }
   0x9   : > { %1630 = vmatprep.subr.bf16.mxu0 (!%p509_p2), %v1770_v2  ;;  %1634 = vmatprep.mubr.msk.bf16.mxu0 (!%p509_p2), %vm1771_vm0, %v1770_v2  ;;  %v1755_v37 = vld [vmem:[%s2063_s13] sm:$0xff] (!%p509_p2)   ;;  %v1746_v40 = vld [vmem:[%s2061_s11 + $0x18] sm:$0xff] (!%p509_p2)   ;;  %v1748_v43 = vld [vmem:[%s2061_s11 + $0x8] sm:$0xff] (!%p509_p2)  }
   0xa   : > { %1631 = vmatpush3.bf16.msra.mxu0 (!%p509_p2), %v1743_v17  ;;  %v1747_v42 = vld [vmem:[%s2061_s11] sm:$0xff] (!%p509_p2)   ;;  %v1750_v46 = vld [vmem:[%s2061_s11 + $0x28] sm:$0xff] (!%p509_p2)   ;;  %v1751_v50 = vld [vmem:[%s2061_s11 + $0x30] sm:$0xff] (!%p509_p2)  }
   0xb   : > { %1601 = vmatpush3.bf16.msra.mxu1 (!%p509_p2), %v1736_v3  ;;  %1632 = vmatprep.subr.bf16.mxu0 (!%p509_p2), %v1770_v2  ;;  %v1749_v44 = vld [vmem:[%s2061_s11 + $0x20] sm:$0xff] (!%p509_p2)   ;;  %v1752_v51 = vld [vmem:[%s2061_s11 + $0x38] sm:$0xff] (!%p509_p2)   ;;  %v1754_v56 = vld [vmem:[%s2061_s11 + $0x48] sm:$0xff] (!%p509_p2)  }
   0xc   : > { %1606 = vmatprep.subr.bf16.mxu1 (!%p509_p2), %v1770_v2  ;;  %v1753_v54 = vld [vmem:[%s2061_s11 + $0x40] sm:$0xff] (!%p509_p2)   ;;  %v1756_v62 = vld [vmem:[%s2063_s13 + $0x8] sm:$0xff] (!%p509_p2)  }
   0xd   : > { %s2067_s19 = smov (!%p586_p3, %s1512_s19), 1  ;;  %v1542_v63 = vld [vmem:[%s2060_s10] ss:$0 sm:$0xff] }
   0xe   : > { %s1874_s24 = sshll.u32 %s2067_s19, 3  ;;  %s1517_s23 = sshll.u32 %s2067_s19, 2  ;;  %1633 = vmatpush3.bf16.msra.mxu0 %v1744_v18 }
   0xf   : > { %s605_s27 = scalar_lea.vmem %s2054_s4, %s1874_s24  ;;  %s621_s30 = scalar_lea.vmem %s2058_s8, %s1874_s24  ;;  %1638 = vmatprep.subr.bf16.mxu0 %v1770_v2 }
  0x10   : > { %v631_v4 = vld [vmem:[%s605_s27] sm:$0xff]  ;;  %s593_s20 = scalar_lea.vmem %s2051_s1, %s1874_s24  ;;  %s589_s29 = scalar_lea.vmem %s2050_s0, %s1517_s23 }
  0x11   : > { %v965_v5 = vld [vmem:[%s621_s30] sm:$0xff]  ;;  %v661_v6 = vmax.f32 %v631_v4, 1.0  ;;  %vm653_vm2 = vcmp.gt.f32.partialorder %v631_v4, 0.0  ;;  %s609_s21 = scalar_lea.vmem %s2055_s5, %s1874_s24  ;;  %s601_s26 = scalar_lea.vmem %s2053_s3, %s1874_s24 }
  0x12   : > { %v628_v7 = vld [vmem:[%s593_s20] sm:$0xff]  ;;  %v995_v9 = vmax.f32 %v965_v5, 1.0  ;;  %v654_v12 = vsel %vm653_vm2, 1, %v1769_v1  ;;  %vm987_vm3 = vcmp.gt.f32.partialorder %v965_v5, 0.0  ;;  %s613_s20 = scalar_lea.vmem %s2056_s6, %s1874_s24 }
  0x13   : > { %v669_v10 = vpack.c.bf16 %v628_v7, %v628_v7  ;;  %664 = vperm.xlu0 %1733, %v661_v6   ;;  %v1909_v13 = vld [vmem:[%s589_s29] sm:$0xf]  ;;  %v988_v16 = vsel %vm987_vm3, 1, %v1769_v1  ;;  %s597_s29 = scalar_lea.vmem %s2052_s2, %s1874_s24 }
  0x14   : > { %v629_v21 = vld [vmem:[%s597_s29] sm:$0xff]  ;;  %s1772_s29 = smov 96  }
  0x15   : > { %1603 = vmatmul.mubr.msk.bf16.vlgmr.msra.gmra.mrb[0].mxu1 %vm682_vm1, %v669_v10  ;;  %v962_v31 = vld [vmem:[%s609_s21] sm:$0xff] }
  0x16   : > { %1607 = vmatpush3.bf16.msra.mxu1 %v1737_v8  ;;  %1610 = vmatprep.mubr.msk.bf16.mxu1 %vm1771_vm0, %v1770_v2  ;;  %v630_v32 = vld [vmem:[%s601_s26] sm:$0xff]  ;;  %v1003_v41 = vpack.c.bf16 %v962_v31, %v962_v31 }
  0x17   : > { %1608 = vmatprep.subr.bf16.mxu1 %v1770_v2  ;;  %998 = vperm.xlu0 %1733, %v995_v9   ;;  %v963_v47 = vld [vmem:[%s613_s20] sm:$0xff] }
  0x18   : > { %v1558_v1 = vld [vmem:[%s2062_s12] ss:$0 sm:$0xff] }
  0x19   : > { %v1559_v9 = vld [vmem:[%s2064_s14] ss:$0 sm:$0xff] }
  0x1a   : > { %1609 = vmatpush3.bf16.msra.mxu1 %v1738_v11 }
  0x1b   : > { %1614 = vmatprep.subr.bf16.mxu1 %v1770_v2  ;;  %656 = vperm.xlu0 %1733, %v654_v12  }
  0x21   : > { %1611 = vmatmul.mubr.msk.bf16.vlgmr.msra.gmra.mrb[0].mxu1 %vm682_vm1, %v1909_v13 }
  0x22   : > { %1615 = vmatpush3.bf16.msra.mxu1 %v1739_v14  ;;  %1618 = vmatprep.mubr.msk.bf16.mxu1 %vm1771_vm0, %v1770_v2 }
  0x23   : > { %1616 = vmatprep.subr.bf16.mxu1 %v1770_v2 }
  0x26   : > { %1617 = vmatpush3.bf16.msra.mxu1 %v1740_v15 }
  0x27   : > { %1622 = vmatprep.subr.bf16.mxu1 %v1770_v2 }
  0x92   : > { %v665_v19 = vpop.permute.xlu0 %664 }
  0x93   : > { %1757 = vrcp.f32 %v665_v19 }
  0x96   : > { %v999_v20 = vpop.permute.xlu0 %998 }
  0x97   : > { %1759 = vrcp.f32 %v999_v20 }
  0x9a   : > { %v657_v22 = vpop.permute.xlu0 %656 }
  0x9b   : > { %vm658_vm4 = vcmp.eq.s32.totalorder %v657_v22, 1 }
  0x9c   : > { %v659_v23 = vsel %vm658_vm4, %v629_v21, 0.0  ;;  %v660_v34 = vsel %vm658_vm4, %v630_v32, 0.0 }
  0x9d   : > { %v1758_v25 = vpop.eup %1757  ;;  %v781_v26 = vpack.c.bf16 %v659_v23, %v659_v23  ;;  %v838_v36 = vpack.c.bf16 %v660_v34, %v660_v34 }
  0x9e   : > { %v668_v27 = vmul.f32 %v1758_v25, %v628_v7 }
  0x9f   : > { %1619 = vmatmul.mubr.msk.bf16.vlgmr.msra.gmra.mrb[0].mxu1 %vm682_vm1, %v781_v26 }
  0xa0   : > { %v895_v28 = vpack.c.bf16 %v668_v27, %v668_v27  ;;  %1623 = vmatpush3.bf16.msra.mxu1 %v1741_v24  ;;  %1626 = vmatprep.mubr.msk.bf16.mxu1 %vm1771_vm0, %v1770_v2 }
  0xa1   : > { %v1760_v30 = vpop.eup %1759  ;;  %1624 = vmatprep.subr.bf16.mxu1 %v1770_v2 }
  0xa2   : > { %897 = vrot.lane.b32.xlu1 %v895_v28, %s1772_s29  ;;  %v1002_v33 = vmul.f32 %v1760_v30, %v962_v31 }
  0xa4   : > { %1625 = vmatpush3.bf16.msra.mxu1 %v1742_v29  ;;  %v1225_v35 = vpack.c.bf16 %v1002_v33, %v1002_v33 }
  0xa5   : > { %1678 = vmatprep.subr.bf16.mxu1 %v1770_v2 }
  0xa6   : > { %990 = vperm.xlu1 %1734, %v988_v16  }
  0xaa   : > { %1227 = vrot.lane.b32.xlu1 %v1225_v35, %s1772_s29  ;;  %s617_s29 = scalar_lea.vmem %s2057_s7, %s1874_s24  ;;  %s625_s24 = scalar_lea.vmem %s2065_s15, %s1517_s23 }
  0xab   : > { %1627 = vmatmul.mubr.msk.bf16.vlgmr.msra.gmra.mrb[0].mxu1 %vm682_vm1, %v838_v36  ;;  %v964_v52 = vld [vmem:[%s617_s29] sm:$0xff] }
  0xac   : > { %1682 = vmatprep.mubr.msk.bf16.mxu1 %vm1771_vm0, %v1770_v2  ;;  %1679 = vmatpush3.bf16.msra.mxu1 %v1755_v37 }
  0xad   : > { %1680 = vmatprep.subr.bf16.mxu1 %v1770_v2 }
  0xb0   : > { %1681 = vmatpush3.bf16.msra.mxu1 %v1756_v62 }
 0x114   : > { %v898_v39 = vpop.permute.xlu1 %897 }
 0x115   : > { %1635 = vmatmul.mubr.msk.bf16.vlgmr.msra.gmra.mrb[0].mxu0 %vm682_vm1, %v898_v39 }
 0x116   : > { %1639 = vmatpush3.bf16.msra.mxu0 %v1745_v38  ;;  %1642 = vmatprep.mubr.msk.bf16.mxu0 %vm1771_vm0, %v1770_v2 }
 0x117   : > { %1640 = vmatprep.subr.bf16.mxu0 %v1770_v2 }
 0x11a   : > { %1641 = vmatpush3.bf16.msra.mxu0 %v1746_v40 }
 0x11b   : > { %1646 = vmatprep.subr.bf16.mxu0 %v1770_v2 }
 0x121   : > { %1643 = vmatmul.mubr.msk.bf16.vlgmr.msra.gmra.mrb[0].mxu0 %vm682_vm1, %v1003_v41 }
 0x122   : > { %1647 = vmatpush3.bf16.msra.mxu0 %v1747_v42  ;;  %1650 = vmatprep.mubr.msk.bf16.mxu0 %vm1771_vm0, %v1770_v2 }
 0x123   : > { %1648 = vmatprep.subr.bf16.mxu0 %v1770_v2 }
 0x125   : > { %v991_v45 = vpop.permute.xlu1 %990 }
 0x126   : > { %1649 = vmatpush3.bf16.msra.mxu0 %v1748_v43  ;;  %vm992_vm5 = vcmp.eq.s32.totalorder %v991_v45, 1 }
 0x127   : > { %1654 = vmatprep.subr.bf16.mxu0 %v1770_v2  ;;  %v993_v48 = vsel %vm992_vm5, %v963_v47, 0.0  ;;  %v994_v53 = vsel %vm992_vm5, %v964_v52, 0.0 }
 0x128   : > { %v1111_v49 = vpack.c.bf16 %v993_v48, %v993_v48  ;;  %v1168_v55 = vpack.c.bf16 %v994_v53, %v994_v53 }
 0x129   : > { %v1228_v57 = vpop.permute.xlu1 %1227 }
 0x12d   : > { %1651 = vmatmul.mubr.msk.bf16.vlgmr.msra.gmra.mrb[0].mxu0 %vm682_vm1, %v1909_v13 }
 0x12e   : > { %1655 = vmatpush3.bf16.msra.mxu0 %v1749_v44  ;;  %1658 = vmatprep.mubr.msk.bf16.mxu0 %vm1771_vm0, %v1770_v2 }
 0x12f   : > { %1656 = vmatprep.subr.bf16.mxu0 %v1770_v2 }
 0x132   : > { %1657 = vmatpush3.bf16.msra.mxu0 %v1750_v46 }
 0x133   : > { %1662 = vmatprep.subr.bf16.mxu0 %v1770_v2 }
 0x139   : > { %1659 = vmatmul.mubr.msk.bf16.vlgmr.msra.gmra.mrb[0].mxu0 %vm682_vm1, %v1111_v49 }
 0x13a   : > { %1663 = vmatpush3.bf16.msra.mxu0 %v1751_v50  ;;  %1666 = vmatprep.mubr.msk.bf16.mxu0 %vm1771_vm0, %v1770_v2 }
 0x13b   : > { %1664 = vmatprep.subr.bf16.mxu0 %v1770_v2 }
 0x13e   : > { %1665 = vmatpush3.bf16.msra.mxu0 %v1752_v51 }
 0x13f   : > { %1670 = vmatprep.subr.bf16.mxu0 %v1770_v2 }
 0x145   : > { %1667 = vmatmul.mubr.msk.bf16.vlgmr.msra.gmra.mrb[0].mxu0 %vm682_vm1, %v1168_v55 }
 0x146   : > { %1671 = vmatpush3.bf16.msra.mxu0 %v1753_v54  ;;  %1674 = vmatprep.mubr.msk.bf16.mxu0 %vm1771_vm0, %v1770_v2 }
 0x147   : > { %1672 = vmatprep.subr.bf16.mxu0 %v1770_v2 }
 0x14a   : > { %1673 = vmatpush3.bf16.msra.mxu0 %v1754_v56 }
 0x151   : > { %1675 = vmatmul.mubr.msk.bf16.vlgmr.msra.gmra.mrb[0].mxu0 %vm682_vm1, %v1228_v57 }
 0x17e   : > { %v888_v58 = vpop.f32.mrb[0].mxu1 }
 0x17f   : > { %v1628_v59 = vpop.f32.mrb[1].mxu1  ;;  %v1686_v0 = vadd.f32 %v1542_v63, %v888_v58 }
 0x180   : > { %v891_v60 = vpop.f32.mrb[2].mxu1 }
 0x181   : > { %v1629_v61 = vpop.f32.mrb[3].mxu1  ;;  %v1687_v2 = vadd.f32 %v1686_v0, %v1558_v1 }
 0x224   : > { %v1278_v3 = vpop.f32.mrb[0].mxu0 }
 0x225   : > { %v1688_v4 = vadd.f32 %v1687_v2, %v1278_v3  ;;  %v1676_v5 = vpop.f32.mrb[1].mxu0 }
 0x226   : > { %v1281_v6 = vpop.f32.mrb[2].mxu0 }
 0x227   : > { %v1293_v7 = vpack.c.bf16 %v1688_v4, %v1688_v4  ;;  %v1677_v8 = vpop.f32.mrb[3].mxu0 }
 0x229   : > { %1683 = vmatmul.mubr.msk.bf16.vlgmr.msra.gmra.mrb[4].mxu1 %vm682_vm1, %v1293_v7 }
 0x2fc   : > { %v1354_v10 = vpop.f32.mrb[4].mxu1 }
 0x2fd   : > { %v1355_v11 = vadd.f32 %v1559_v9, %v1354_v10  ;;  %v1684_v12 = vpop.f32.mrb[5].mxu1 }
 0x2fe   : > { %v1357_v13 = vpop.f32.mrb[6].mxu1 }
 0x2ff   : > { %v1360_v14 = vpack.c.bf16 %v1355_v11, %v1355_v11  ;;  %v1685_v15 = vpop.f32.mrb[7].mxu1 }
 0x301   : > { %1362 = vst.msk [vmem:[%s625_s24] sm:$0xf] %vm1361_vm6, %v1360_v14 }
 0x302 PF: > { %s25_s18 = sadd.s32 1, %s1767_s18  }
 0x303   : > { %p22_p4 = scmp.ge.s32.totalorder %s25_s18, 4  }
 0x305   :  { %24 = sbr.rel (!%p22_p4) target bundleno = 1 (0x1), region = 134 }

</bundles_post_ra>
